<compile_context>
chip_gen: v7x
topology: tpu7x:2x2x1
jax: 0.10.0
libtpu: 0.0.40
codegen_flags: <defaults>
</compile_context>

<pallas_src>
import functools
from collections import namedtuple

import jax
import jax.numpy as jnp
from jax import lax
from jax.experimental import pallas as pl
from jax.experimental.pallas import tpu as pltpu


def _round_up(x, m):
    return (x + m - 1) // m * m


def _pick_tm(m, candidates=(1024, 512, 256, 128, 64, 32, 16, 8)):
    """Largest tile dividing M, preferring an EVEN number of blocks so both
    v7x TensorCores get equal work under dimension_semantics=('parallel',)."""
    best = None
    for c in candidates:
        if m % c == 0 and m // c >= 2:
            if (m // c) % 2 == 0:
                return c
            if best is None:
                best = c
    if best is not None:
        return best
    # Fallback: single full-M block.  Cap it so an awkward M can't blow the
    # (v7x: 64 MiB physical) VMEM budget.
    assert m <= 2048, f"M={m}: no suitable tile; pad M upstream"
    return m


# --------------------------------------------------------------------------
# Pallas kernels
# --------------------------------------------------------------------------
def _gemm_stats_kernel(a_ref, b_ref, y_ref, stat_ref):
    # Full-K GEMM for one M tile.  Slab is written bf16; per-column sum /
    # sum-of-squares come from the in-register f32 accumulator.
    y = jnp.dot(a_ref[...], b_ref[...], preferred_element_type=jnp.float32)
    y_ref[...] = y.astype(y_ref.dtype)
    s = jnp.sum(y, axis=0, keepdims=True)
    q = jnp.sum(y * y, axis=0, keepdims=True)
    stat_ref[...] = jnp.concatenate([s, q], axis=0)[None]        # (1, 2, N) block


def pallas_gemm_stats(a, b):
    """a: (M, K) bf16, b: (K, N) bf16 with N % 128 == 0.
    Returns y (M, N) bf16 and per-column f32 (sum, sumsq), each of shape (N,)."""
    m, k = a.shape
    k2, n = b.shape
    assert k == k2 and n % 128 == 0
    tm = _pick_tm(m)
    nb = m // tm
    y, stats = pl.pallas_call(
        _gemm_stats_kernel,
        out_shape=(jax.ShapeDtypeStruct((m, n), jnp.bfloat16),
                   jax.ShapeDtypeStruct((nb, 2, n), jnp.float32)),
        grid=(nb,),
        in_specs=[pl.BlockSpec((tm, k), lambda i: (i, 0)),
                  pl.BlockSpec((k, n), lambda i: (0, 0))],
        out_specs=(pl.BlockSpec((tm, n), lambda i: (i, 0)),
                   pl.BlockSpec((1, 2, n), lambda i: (i, 0, 0))),
        compiler_params=pltpu.CompilerParams(
            dimension_semantics=("parallel",)),
    )(a, b)
    col_sum = jnp.sum(stats[:, 0, :], axis=0)
    col_sq = jnp.sum(stats[:, 1, :], axis=0)
    return y, col_sum, col_sq


def _gemm_bias_tanh_kernel(a_ref, b_ref, bias_ref, o_ref):
    y = jnp.dot(a_ref[...], b_ref[...], preferred_element_type=jnp.float32)
    o_ref[...] = jnp.tanh(y + bias_ref[...]).astype(o_ref.dtype)


def pallas_gemm_bias_tanh(a, b, bias_cols):
    """Final layer: GEMM with fused per-column bias + tanh, bf16 output."""
    m, k = a.shape
    _, n = b.shape
    tm = _pick_tm(m)
    return pl.pallas_call(
        _gemm_bias_tanh_kernel,
        out_shape=jax.ShapeDtypeStruct((m, n), jnp.bfloat16),
        grid=(m // tm,),
        in_specs=[pl.BlockSpec((tm, k), lambda i: (i, 0)),
                  pl.BlockSpec((k, n), lambda i: (0, 0)),
                  pl.BlockSpec((1, n), lambda i: (0, 0))],
        out_specs=pl.BlockSpec((tm, n), lambda i: (i, 0)),
        compiler_params=pltpu.CompilerParams(
            dimension_semantics=("parallel",)),
    )(a, b, bias_cols.reshape(1, n))


def _scale_shift_relu_kernel(y_ref, scale_ref, shift_ref, o_ref):
    y = y_ref[...].astype(jnp.float32)
    o_ref[...] = jnp.maximum(y * scale_ref[...] + shift_ref[...],
                             0.0).astype(o_ref.dtype)


def pallas_scale_shift_relu(y, scale_cols, shift_cols):
    """BN apply (per-column affine) + ReLU, bf16 in / bf16 out."""
    m, n = y.shape
    tm = _pick_tm(m)
    return pl.pallas_call(
        _scale_shift_relu_kernel,
        out_shape=jax.ShapeDtypeStruct((m, n), jnp.bfloat16),
        grid=(m // tm,),
        in_specs=[pl.BlockSpec((tm, n), lambda i: (i, 0)),
                  pl.BlockSpec((1, n), lambda i: (0, 0)),
                  pl.BlockSpec((1, n), lambda i: (0, 0))],
        out_specs=pl.BlockSpec((tm, n), lambda i: (i, 0)),
        compiler_params=pltpu.CompilerParams(
            dimension_semantics=("parallel",)),
    )(y, scale_cols.reshape(1, n), shift_cols.reshape(1, n))


# --------------------------------------------------------------------------
# ConvTranspose2d -> single-GEMM lowering (sub-pixel phase decomposition)
# --------------------------------------------------------------------------
# stride=2, k=4, padding=1: output pixel (2q+r, 2j+c) only sees input taps
# ih = q + th - 1 (th in {0,1,2}); kernel row kh given by the map below.
_SUBPIXEL_TAP_TO_K = {(0, 0): 3, (0, 1): 1, (1, 1): 2, (1, 2): 0}   # (phase, tap)->k


def _subpixel_weight(wt):
    """wt: (Cin, Cout, 4, 4) -> B: (9*Cin, 4*Cout) GEMM weight.
    Row layout (th, tw, ci); column layout (r, c, co) with co fastest."""
    cin, cout = wt.shape[0], wt.shape[1]
    b = jnp.zeros((3, 3, cin, 2, 2, cout), jnp.float32)
    for (r, th), kh in _SUBPIXEL_TAP_TO_K.items():
        for (c, tw), kw in _SUBPIXEL_TAP_TO_K.items():
            b = b.at[th, tw, :, r, c, :].set(wt[:, :, kh, kw])
    return b.reshape(9 * cin, 4 * cout)


def _subpixel_patches(x_nhwc):
    """x: (N, H, W, Cin) bf16 -> A: (N*H*W, 9*Cin) bf16: 3x3 neighbourhood of the
    1-zero-padded input.  No stride-dilation zeros and no f32 slab materialised."""
    n, h, w, cin = x_nhwc.shape
    xp = jnp.pad(x_nhwc, ((0, 0), (1, 1), (1, 1), (0, 0)))
    taps = [xp[:, th:th + h, tw:tw + w, :] for th in range(3) for tw in range(3)]
    a = jnp.stack(taps, axis=3)                       # (N, H, W, 9, Cin)
    return a.reshape(n * h * w, 9 * cin)


def _phases_to_nhwc(y, n, hout, wout, cout, groups):
    """y: (M, groups*cout) GEMM output -> (N, Hout, Wout, Cout) NHWC."""
    if groups == 4:
        h, w = hout // 2, wout // 2
        y = y.reshape(n, h, w, 2, 2, cout).transpose(0, 1, 3, 2, 4, 5)
        return y.reshape(n, hout, wout, cout)
    return y.reshape(n, hout, wout, cout)             # 1x1-input layer: (kh, kw, co)


# --------------------------------------------------------------------------
# Generator (z_dim, channel_img, feature_g) — deterministic parameter init
# --------------------------------------------------------------------------
def init_generator_params(key, z_dim, channel_img, feature_g):
    fg = feature_g
    specs = [
        (z_dim,   fg * 16, 4, 1, 0),
        (fg * 16, fg * 8,  4, 2, 1),
        (fg * 8,  fg * 4,  4, 2, 1),
        (fg * 4,  fg * 2,  4, 2, 1),
        (fg * 2,  channel_img, 4, 2, 1),
    ]
    params = []
    keys = jax.random.split(key, len(specs) + 1)
    for i, (cin, cout, k, s, p) in enumerate(specs):
        layer = {
            "w": jax.random.normal(keys[i], (cin, cout, k, k), jnp.float32) * 0.02,
            "stride": s, "padding": p,
        }
        if i < len(specs) - 1:                   # conv-transpose + BN + ReLU block
            layer["gamma"] = jnp.ones((cout,), jnp.float32)
            layer["beta"] = jnp.zeros((cout,), jnp.float32)
        else:                                    # final conv-transpose (bias) + Tanh
            layer["bias"] = jax.random.normal(keys[-1], (cout,), jnp.float32) * 0.02
        params.append(layer)
    return params


# --------------------------------------------------------------------------
# One-time weight repacking (hoisted out of the jitted forward)
# --------------------------------------------------------------------------
LayerMeta = namedtuple("LayerMeta", "is_bn is_1x1_input groups cout ncols npad kernel")


def preprocess_params(params):
    arrays, metas = [], []
    for layer in params:
        wt = layer["w"]
        cin, cout, k, _ = wt.shape
        is_1x1_input = (layer["stride"] == 1 and layer["padding"] == 0)
        if is_1x1_input:
            # out[n, kh, kw, co] = sum_ci x[n, ci] * w[ci, co, kh, kw]
            b = wt.transpose(0, 2, 3, 1).reshape(cin, k * k * cout)
            groups = k * k
        else:
            assert layer["stride"] == 2 and layer["padding"] == 1 and k == 4, \
                "only the ConvTranspose2d configs used by this Generator are lowered"
            b = _subpixel_weight(wt)
            groups = 4
        ncols = groups * cout
        npad = _round_up(max(ncols, 128), 128)          # lane-dense output width
        b = jnp.pad(b, ((0, 0), (0, npad - ncols))).astype(jnp.bfloat16)
        entry = {"b": b}
        is_bn = "gamma" in layer
        if is_bn:
            entry["gamma"] = layer["gamma"]
            entry["beta"] = layer["beta"]
        else:
            entry["bias_cols"] = jnp.pad(jnp.tile(layer["bias"], groups),
                                         (0, npad - ncols))
        arrays.append(entry)
        metas.append(LayerMeta(is_bn, is_1x1_input, groups, cout, ncols, npad, k))
    return arrays, tuple(metas)


def _forward_impl(metas, prep, x_nchw, eps=1e-5):
    # External API is NCHW (PyTorch); internal compute is NHWC / (M, cols) bf16 slabs.
    x = jnp.transpose(x_nchw, (0, 2, 3, 1)).astype(jnp.bfloat16)
    for arrs, meta in zip(prep, metas):
        n, h, w, cin = x.shape
        if meta.is_1x1_input:
            a = x.reshape(n, cin)
            hout = wout = meta.kernel
        else:
            a = _subpixel_patches(x)                    # bf16 9-tap patches
            hout, wout = 2 * h, 2 * w
        m = a.shape[0]

        if meta.is_bn:
            # BN (training mode, biased variance) — stats fused into the GEMM.
            y, col_sum, col_sq = pallas_gemm_stats(a, arrs["b"])
            cnt = m * meta.groups                        # == N * Hout * Wout
            ch_sum = col_sum[:meta.ncols].reshape(meta.groups, meta.cout).sum(axis=0)
            ch_sq = col_sq[:meta.ncols].reshape(meta.groups, meta.cout).sum(axis=0)
            mean = ch_sum / cnt
            # E[x^2]-E[x]^2 in f32; fine at these magnitudes / tolerance.
            var = ch_sq / cnt - mean * mean
            inv_std = lax.rsqrt(var + eps)
            scale_ch = arrs["gamma"] * inv_std
            shift_ch = arrs["beta"] - mean * scale_ch
            scale_cols = jnp.pad(jnp.tile(scale_ch, meta.groups),
                                 (0, meta.npad - meta.ncols))
            shift_cols = jnp.pad(jnp.tile(shift_ch, meta.groups),
                                 (0, meta.npad - meta.ncols))
            out = pallas_scale_shift_relu(y, scale_cols, shift_cols)
        else:
            out = pallas_gemm_bias_tanh(a, arrs["b"], arrs["bias_cols"])

        x = _phases_to_nhwc(out[:, :meta.ncols], n, hout, wout, meta.cout, meta.groups)
    return jnp.transpose(x, (0, 3, 1, 2)).astype(jnp.float32)


def make_generator(params):
    prep, metas = preprocess_params(params)
    fwd = jax.jit(functools.partial(_forward_impl, metas))
    return lambda x: fwd(prep, x)


# --------------------------------------------------------------------------
# Pure-JAX f32 reference (matches PyTorch ConvTranspose2d / BatchNorm2d)
# --------------------------------------------------------------------------
def reference_forward(params, x_nchw, eps=1e-5):
    x = x_nchw.astype(jnp.float32)
    for layer in params:
        wt, s, p = layer["w"], layer["stride"], layer["padding"]
        _, _, k, _ = wt.shape
        weq = jnp.flip(wt, axis=(2, 3)).transpose(1, 0, 2, 3)   # (Cout, Cin, k, k)
        pe = k - 1 - p
        y = lax.conv_general_dilated(
            x, weq, window_strides=(1, 1),
            padding=[(pe, pe), (pe, pe)], lhs_dilation=(s, s),
            dimension_numbers=("NCHW", "OIHW", "NCHW"))
        if "gamma" in layer:
            mean = jnp.mean(y, axis=(0, 2, 3), keepdims=True)
            var = jnp.mean((y - mean) ** 2, axis=(0, 2, 3), keepdims=True)
            y = (y - mean) / jnp.sqrt(var + eps)
            y = y * layer["gamma"].reshape(1, -1, 1, 1) + layer["beta"].reshape(1, -1, 1, 1)
            y = jnp.maximum(y, 0.0)
        else:
            y = jnp.tanh(y + layer["bias"].reshape(1, -1, 1, 1))
        x = y
    return x


if __name__ == "__main__":
    z_dim, channel_img, feature_g = 16, 3, 8
    batch = 2

    key = jax.random.PRNGKey(0)
    kp, kx = jax.random.split(key)
    params = init_generator_params(kp, z_dim, channel_img, feature_g)
    x = jax.random.normal(kx, (batch, z_dim, 1, 1), jnp.float32)   # NCHW latent

    generator = make_generator(params)
    out = jax.block_until_ready(generator(x))
    assert out.shape == (batch, channel_img, 64, 64), out.shape
    assert out.dtype == jnp.float32

    ref = jax.block_until_ready(reference_forward(params, x))
    err = float(jnp.max(jnp.abs(out - ref)))
    # bf16 GEMM operands + bf16 activation slabs (f32 accumulation, f32 BN stats)
    # vs an all-f32 reference: tolerance loosened accordingly.
    assert err < 6e-2, f"max abs error {err}"

    print("KERNEL_OK")
</pallas_src>

<mosaic_0001>
module attributes {stable_mosaic.version = 11 : i64} {
  func.func @_gemm_stats_kernel(%arg0: i32, %arg1: memref<2x16xbf16, #tpu.memory_space<vmem>>, %arg2: memref<16x2048xbf16, #tpu.memory_space<vmem>>, %arg3: memref<2x2048xbf16, #tpu.memory_space<vmem>>, %arg4: memref<1x2x2048xf32, #tpu.memory_space<vmem>>) attributes {dimension_semantics = [#tpu.dimension_semantics<parallel>], iteration_bounds = array<i64: 1>, scalar_prefetch = 0 : i64, scratch_operands = 0 : i64, tpu.core_type = #tpu.core_type<tc>, window_params = [{transform_indices = @transform_0, window_bounds = array<i64: 2, 16>}, {pipeline_mode = #tpu.pipeline_mode<synchronous>, transform_indices = @transform_1, window_bounds = array<i64: 16, 2048>}, {transform_indices = @transform_2, window_bounds = array<i64: 2, 2048>}, {transform_indices = @transform_3, window_bounds = array<i64: 1, 2, 2048>}]} {
    %c0 = arith.constant 0 : index
    %c0_0 = arith.constant 0 : index
    %0 = vector.load %arg1[%c0, %c0_0] : memref<2x16xbf16, #tpu.memory_space<vmem>>, vector<2x16xbf16>
    %c0_1 = arith.constant 0 : index
    %c0_2 = arith.constant 0 : index
    %1 = vector.load %arg2[%c0_1, %c0_2] : memref<16x2048xbf16, #tpu.memory_space<vmem>>, vector<16x2048xbf16>
    %cst = arith.constant dense<0.000000e+00> : vector<2x2048xf32>
    %2 = tpu.matmul %0, %1, %cst {dimension_numbers = #tpu.dot_dimension_numbers<[1], [0], [0], [1], [0, 0, 1, 1], [], []>} : vector<2x16xbf16>, vector<16x2048xbf16>, vector<2x2048xf32> -> vector<2x2048xf32>
    %3 = arith.truncf %2 : vector<2x2048xf32> to vector<2x2048xbf16>
    %c0_3 = arith.constant 0 : index
    %c0_4 = arith.constant 0 : index
    %4 = vector.load %arg3[%c0_3, %c0_4] : memref<2x2048xbf16, #tpu.memory_space<vmem>>, vector<2x2048xbf16>
    tpu.vector_store %arg3[%c0_3, %c0_4], %3 {strides = array<i32>} : memref<2x2048xbf16, #tpu.memory_space<vmem>>, vector<2x2048xbf16>,
    %cst_5 = arith.constant dense<0.000000e+00> : vector<2048xf32>
    %5 = vector.multi_reduction <add>, %2, %cst_5 [0] : vector<2x2048xf32> to vector<2048xf32>
    %6 = vector.shape_cast %5 : vector<2048xf32> to vector<1x2048xf32>
    %7 = arith.mulf %2, %2 : vector<2x2048xf32>
    %cst_6 = arith.constant dense<0.000000e+00> : vector<2048xf32>
    %8 = vector.multi_reduction <add>, %7, %cst_6 [0] : vector<2x2048xf32> to vector<2048xf32>
    %9 = vector.shape_cast %8 : vector<2048xf32> to vector<1x2048xf32>
    %10 = tpu.concatenate %6, %9 in 0 : vector<1x2048xf32>, vector<1x2048xf32> -> vector<2x2048xf32>
    %11 = vector.shape_cast %10 : vector<2x2048xf32> to vector<1x2x2048xf32>
    %c0_7 = arith.constant 0 : index
    %c0_8 = arith.constant 0 : index
    %c0_9 = arith.constant 0 : index
    %12 = vector.load %arg4[%c0_7, %c0_8, %c0_9] : memref<1x2x2048xf32, #tpu.memory_space<vmem>>, vector<1x2x2048xf32>
    tpu.vector_store %arg4[%c0_7, %c0_8, %c0_9], %11 {strides = array<i32>} : memref<1x2x2048xf32, #tpu.memory_space<vmem>>, vector<1x2x2048xf32>,
    return
  }
  func.func @transform_0(%arg0: i32) -> (i32, i32) {
    %c0_i32 = arith.constant 0 : i32
    %c0_i32_0 = arith.constant 0 : i32
    return %arg0, %c0_i32 : i32, i32
  }
  func.func @transform_1(%arg0: i32) -> (i32, i32) {
    %c0_i32 = arith.constant 0 : i32
    %c0_i32_0 = arith.constant 0 : i32
    %c0_i32_1 = arith.constant 0 : i32
    return %c0_i32, %c0_i32_0 : i32, i32
  }
  func.func @transform_2(%arg0: i32) -> (i32, i32) {
    %c0_i32 = arith.constant 0 : i32
    %c0_i32_0 = arith.constant 0 : i32
    return %arg0, %c0_i32 : i32, i32
  }
  func.func @transform_3(%arg0: i32) -> (i32, i32, i32) {
    %c0_i32 = arith.constant 0 : i32
    %c0_i32_0 = arith.constant 0 : i32
    %c0_i32_1 = arith.constant 0 : i32
    return %arg0, %c0_i32, %c0_i32_0 : i32, i32, i32
  }
}

module attributes {stable_mosaic.version = 11 : i64} {
  func.func @_scale_shift_relu_kernel(%arg0: i32, %arg1: memref<2x2048xbf16, #tpu.memory_space<vmem>>, %arg2: memref<1x2048xf32, #tpu.memory_space<vmem>>, %arg3: memref<1x2048xf32, #tpu.memory_space<vmem>>, %arg4: memref<2x2048xbf16, #tpu.memory_space<vmem>>) attributes {dimension_semantics = [#tpu.dimension_semantics<parallel>], iteration_bounds = array<i64: 1>, scalar_prefetch = 0 : i64, scratch_operands = 0 : i64, tpu.core_type = #tpu.core_type<tc>, window_params = [{transform_indices = @transform_0, window_bounds = array<i64: 2, 2048>}, {pipeline_mode = #tpu.pipeline_mode<synchronous>, transform_indices = @transform_1, window_bounds = array<i64: 1, 2048>}, {pipeline_mode = #tpu.pipeline_mode<synchronous>, transform_indices = @transform_2, window_bounds = array<i64: 1, 2048>}, {transform_indices = @transform_3, window_bounds = array<i64: 2, 2048>}]} {
    %c0 = arith.constant 0 : index
    %c0_0 = arith.constant 0 : index
    %0 = vector.load %arg1[%c0, %c0_0] : memref<2x2048xbf16, #tpu.memory_space<vmem>>, vector<2x2048xbf16>
    %1 = arith.extf %0 : vector<2x2048xbf16> to vector<2x2048xf32>
    %c0_1 = arith.constant 0 : index
    %c0_2 = arith.constant 0 : index
    %2 = vector.load %arg2[%c0_1, %c0_2] : memref<1x2048xf32, #tpu.memory_space<vmem>>, vector<1x2048xf32>
    %3 = vector.broadcast %2 : vector<1x2048xf32> to vector<2x2048xf32>
    %4 = arith.mulf %1, %3 : vector<2x2048xf32>
    %c0_3 = arith.constant 0 : index
    %c0_4 = arith.constant 0 : index
    %5 = vector.load %arg3[%c0_3, %c0_4] : memref<1x2048xf32, #tpu.memory_space<vmem>>, vector<1x2048xf32>
    %6 = vector.broadcast %5 : vector<1x2048xf32> to vector<2x2048xf32>
    %7 = arith.addf %4, %6 : vector<2x2048xf32>
    %cst = arith.constant 0.000000e+00 : f32
    %8 = vector.broadcast %cst : f32 to vector<2x2048xf32>
    %9 = arith.maximumf %7, %8 : vector<2x2048xf32>
    %10 = arith.truncf %9 : vector<2x2048xf32> to vector<2x2048xbf16>
    %c0_5 = arith.constant 0 : index
    %c0_6 = arith.constant 0 : index
    %11 = vector.load %arg4[%c0_5, %c0_6] : memref<2x2048xbf16, #tpu.memory_space<vmem>>, vector<2x2048xbf16>
    tpu.vector_store %arg4[%c0_5, %c0_6], %10 {strides = array<i32>} : memref<2x2048xbf16, #tpu.memory_space<vmem>>, vector<2x2048xbf16>,
    return
  }
  func.func @transform_0(%arg0: i32) -> (i32, i32) {
    %c0_i32 = arith.constant 0 : i32
    %c0_i32_0 = arith.constant 0 : i32
    return %arg0, %c0_i32 : i32, i32
  }
  func.func @transform_1(%arg0: i32) -> (i32, i32) {
    %c0_i32 = arith.constant 0 : i32
    %c0_i32_0 = arith.constant 0 : i32
    %c0_i32_1 = arith.constant 0 : i32
    return %c0_i32, %c0_i32_0 : i32, i32
  }
  func.func @transform_2(%arg0: i32) -> (i32, i32) {
    %c0_i32 = arith.constant 0 : i32
    %c0_i32_0 = arith.constant 0 : i32
    %c0_i32_1 = arith.constant 0 : i32
    return %c0_i32, %c0_i32_0 : i32, i32
  }
  func.func @transform_3(%arg0: i32) -> (i32, i32) {
    %c0_i32 = arith.constant 0 : i32
    %c0_i32_0 = arith.constant 0 : i32
    return %arg0, %c0_i32 : i32, i32
  }
}

module attributes {stable_mosaic.version = 11 : i64} {
  func.func @_gemm_stats_kernel(%arg0: i32, %arg1: memref<16x1152xbf16, #tpu.memory_space<vmem>>, %arg2: memref<1152x256xbf16, #tpu.memory_space<vmem>>, %arg3: memref<16x256xbf16, #tpu.memory_space<vmem>>, %arg4: memref<1x2x256xf32, #tpu.memory_space<vmem>>) attributes {dimension_semantics = [#tpu.dimension_semantics<parallel>], iteration_bounds = array<i64: 2>, scalar_prefetch = 0 : i64, scratch_operands = 0 : i64, tpu.core_type = #tpu.core_type<tc>, window_params = [{transform_indices = @transform_0, window_bounds = array<i64: 16, 1152>}, {pipeline_mode = #tpu.pipeline_mode<synchronous>, transform_indices = @transform_1, window_bounds = array<i64: 1152, 256>}, {transform_indices = @transform_2, window_bounds = array<i64: 16, 256>}, {transform_indices = @transform_3, window_bounds = array<i64: 1, 2, 256>}]} {
    %c0 = arith.constant 0 : index
    %c0_0 = arith.constant 0 : index
    %0 = vector.load %arg1[%c0, %c0_0] : memref<16x1152xbf16, #tpu.memory_space<vmem>>, vector<16x1152xbf16>
    %c0_1 = arith.constant 0 : index
    %c0_2 = arith.constant 0 : index
    %1 = vector.load %arg2[%c0_1, %c0_2] : memref<1152x256xbf16, #tpu.memory_space<vmem>>, vector<1152x256xbf16>
    %cst = arith.constant dense<0.000000e+00> : vector<16x256xf32>
    %2 = tpu.matmul %0, %1, %cst {dimension_numbers = #tpu.dot_dimension_numbers<[1], [0], [0], [1], [0, 0, 1, 1], [], []>} : vector<16x1152xbf16>, vector<1152x256xbf16>, vector<16x256xf32> -> vector<16x256xf32>
    %3 = arith.truncf %2 : vector<16x256xf32> to vector<16x256xbf16>
    %c0_3 = arith.constant 0 : index
    %c0_4 = arith.constant 0 : index
    %4 = vector.load %arg3[%c0_3, %c0_4] : memref<16x256xbf16, #tpu.memory_space<vmem>>, vector<16x256xbf16>
    tpu.vector_store %arg3[%c0_3, %c0_4], %3 {strides = array<i32>} : memref<16x256xbf16, #tpu.memory_space<vmem>>, vector<16x256xbf16>,
    %cst_5 = arith.constant dense<0.000000e+00> : vector<256xf32>
    %5 = vector.multi_reduction <add>, %2, %cst_5 [0] : vector<16x256xf32> to vector<256xf32>
    %6 = vector.shape_cast %5 : vector<256xf32> to vector<1x256xf32>
    %7 = arith.mulf %2, %2 : vector<16x256xf32>
    %cst_6 = arith.constant dense<0.000000e+00> : vector<256xf32>
    %8 = vector.multi_reduction <add>, %7, %cst_6 [0] : vector<16x256xf32> to vector<256xf32>
    %9 = vector.shape_cast %8 : vector<256xf32> to vector<1x256xf32>
    %10 = tpu.concatenate %6, %9 in 0 : vector<1x256xf32>, vector<1x256xf32> -> vector<2x256xf32>
    %11 = vector.shape_cast %10 : vector<2x256xf32> to vector<1x2x256xf32>
    %c0_7 = arith.constant 0 : index
    %c0_8 = arith.constant 0 : index
    %c0_9 = arith.constant 0 : index
    %12 = vector.load %arg4[%c0_7, %c0_8, %c0_9] : memref<1x2x256xf32, #tpu.memory_space<vmem>>, vector<1x2x256xf32>
    tpu.vector_store %arg4[%c0_7, %c0_8, %c0_9], %11 {strides = array<i32>} : memref<1x2x256xf32, #tpu.memory_space<vmem>>, vector<1x2x256xf32>,
    return
  }
  func.func @transform_0(%arg0: i32) -> (i32, i32) {
    %c0_i32 = arith.constant 0 : i32
    %c0_i32_0 = arith.constant 0 : i32
    return %arg0, %c0_i32 : i32, i32
  }
  func.func @transform_1(%arg0: i32) -> (i32, i32) {
    %c0_i32 = arith.constant 0 : i32
    %c0_i32_0 = arith.constant 0 : i32
    %c0_i32_1 = arith.constant 0 : i32
    return %c0_i32, %c0_i32_0 : i32, i32
  }
  func.func @transform_2(%arg0: i32) -> (i32, i32) {
    %c0_i32 = arith.constant 0 : i32
    %c0_i32_0 = arith.constant 0 : i32
    return %arg0, %c0_i32 : i32, i32
  }
  func.func @transform_3(%arg0: i32) -> (i32, i32, i32) {
    %c0_i32 = arith.constant 0 : i32
    %c0_i32_0 = arith.constant 0 : i32
    %c0_i32_1 = arith.constant 0 : i32
    return %arg0, %c0_i32, %c0_i32_0 : i32, i32, i32
  }
}

module attributes {stable_mosaic.version = 11 : i64} {
  func.func @_scale_shift_relu_kernel(%arg0: i32, %arg1: memref<16x256xbf16, #tpu.memory_space<vmem>>, %arg2: memref<1x256xf32, #tpu.memory_space<vmem>>, %arg3: memref<1x256xf32, #tpu.memory_space<vmem>>, %arg4: memref<16x256xbf16, #tpu.memory_space<vmem>>) attributes {dimension_semantics = [#tpu.dimension_semantics<parallel>], iteration_bounds = array<i64: 2>, scalar_prefetch = 0 : i64, scratch_operands = 0 : i64, tpu.core_type = #tpu.core_type<tc>, window_params = [{transform_indices = @transform_0, window_bounds = array<i64: 16, 256>}, {pipeline_mode = #tpu.pipeline_mode<synchronous>, transform_indices = @transform_1, window_bounds = array<i64: 1, 256>}, {pipeline_mode = #tpu.pipeline_mode<synchronous>, transform_indices = @transform_2, window_bounds = array<i64: 1, 256>}, {transform_indices = @transform_3, window_bounds = array<i64: 16, 256>}]} {
    %c0 = arith.constant 0 : index
    %c0_0 = arith.constant 0 : index
    %0 = vector.load %arg1[%c0, %c0_0] : memref<16x256xbf16, #tpu.memory_space<vmem>>, vector<16x256xbf16>
    %1 = arith.extf %0 : vector<16x256xbf16> to vector<16x256xf32>
    %c0_1 = arith.constant 0 : index
    %c0_2 = arith.constant 0 : index
    %2 = vector.load %arg2[%c0_1, %c0_2] : memref<1x256xf32, #tpu.memory_space<vmem>>, vector<1x256xf32>
    %3 = vector.broadcast %2 : vector<1x256xf32> to vector<16x256xf32>
    %4 = arith.mulf %1, %3 : vector<16x256xf32>
    %c0_3 = arith.constant 0 : index
    %c0_4 = arith.constant 0 : index
    %5 = vector.load %arg3[%c0_3, %c0_4] : memref<1x256xf32, #tpu.memory_space<vmem>>, vector<1x256xf32>
    %6 = vector.broadcast %5 : vector<1x256xf32> to vector<16x256xf32>
    %7 = arith.addf %4, %6 : vector<16x256xf32>
    %cst = arith.constant 0.000000e+00 : f32
    %8 = vector.broadcast %cst : f32 to vector<16x256xf32>
    %9 = arith.maximumf %7, %8 : vector<16x256xf32>
    %10 = arith.truncf %9 : vector<16x256xf32> to vector<16x256xbf16>
    %c0_5 = arith.constant 0 : index
    %c0_6 = arith.constant 0 : index
    %11 = vector.load %arg4[%c0_5, %c0_6] : memref<16x256xbf16, #tpu.memory_space<vmem>>, vector<16x256xbf16>
    tpu.vector_store %arg4[%c0_5, %c0_6], %10 {strides = array<i32>} : memref<16x256xbf16, #tpu.memory_space<vmem>>, vector<16x256xbf16>,
    return
  }
  func.func @transform_0(%arg0: i32) -> (i32, i32) {
    %c0_i32 = arith.constant 0 : i32
    %c0_i32_0 = arith.constant 0 : i32
    return %arg0, %c0_i32 : i32, i32
  }
  func.func @transform_1(%arg0: i32) -> (i32, i32) {
    %c0_i32 = arith.constant 0 : i32
    %c0_i32_0 = arith.constant 0 : i32
    %c0_i32_1 = arith.constant 0 : i32
    return %c0_i32, %c0_i32_0 : i32, i32
  }
  func.func @transform_2(%arg0: i32) -> (i32, i32) {
    %c0_i32 = arith.constant 0 : i32
    %c0_i32_0 = arith.constant 0 : i32
    %c0_i32_1 = arith.constant 0 : i32
    return %c0_i32, %c0_i32_0 : i32, i32
  }
  func.func @transform_3(%arg0: i32) -> (i32, i32) {
    %c0_i32 = arith.constant 0 : i32
    %c0_i32_0 = arith.constant 0 : i32
    return %arg0, %c0_i32 : i32, i32
  }
}

module attributes {stable_mosaic.version = 11 : i64} {
  func.func @_gemm_stats_kernel(%arg0: i32, %arg1: memref<64x576xbf16, #tpu.memory_space<vmem>>, %arg2: memref<576x128xbf16, #tpu.memory_space<vmem>>, %arg3: memref<64x128xbf16, #tpu.memory_space<vmem>>, %arg4: memref<1x2x128xf32, #tpu.memory_space<vmem>>) attributes {dimension_semantics = [#tpu.dimension_semantics<parallel>], iteration_bounds = array<i64: 2>, scalar_prefetch = 0 : i64, scratch_operands = 0 : i64, tpu.core_type = #tpu.core_type<tc>, window_params = [{transform_indices = @transform_0, window_bounds = array<i64: 64, 576>}, {pipeline_mode = #tpu.pipeline_mode<synchronous>, transform_indices = @transform_1, window_bounds = array<i64: 576, 128>}, {transform_indices = @transform_2, window_bounds = array<i64: 64, 128>}, {transform_indices = @transform_3, window_bounds = array<i64: 1, 2, 128>}]} {
    %c0 = arith.constant 0 : index
    %c0_0 = arith.constant 0 : index
    %0 = vector.load %arg1[%c0, %c0_0] : memref<64x576xbf16, #tpu.memory_space<vmem>>, vector<64x576xbf16>
    %c0_1 = arith.constant 0 : index
    %c0_2 = arith.constant 0 : index
    %1 = vector.load %arg2[%c0_1, %c0_2] : memref<576x128xbf16, #tpu.memory_space<vmem>>, vector<576x128xbf16>
    %cst = arith.constant dense<0.000000e+00> : vector<64x128xf32>
    %2 = tpu.matmul %0, %1, %cst {dimension_numbers = #tpu.dot_dimension_numbers<[1], [0], [0], [1], [0, 0, 1, 1], [], []>} : vector<64x576xbf16>, vector<576x128xbf16>, vector<64x128xf32> -> vector<64x128xf32>
    %3 = arith.truncf %2 : vector<64x128xf32> to vector<64x128xbf16>
    %c0_3 = arith.constant 0 : index
    %c0_4 = arith.constant 0 : index
    %4 = vector.load %arg3[%c0_3, %c0_4] : memref<64x128xbf16, #tpu.memory_space<vmem>>, vector<64x128xbf16>
    tpu.vector_store %arg3[%c0_3, %c0_4], %3 {strides = array<i32>} : memref<64x128xbf16, #tpu.memory_space<vmem>>, vector<64x128xbf16>,
    %cst_5 = arith.constant dense<0.000000e+00> : vector<128xf32>
    %5 = vector.multi_reduction <add>, %2, %cst_5 [0] : vector<64x128xf32> to vector<128xf32>
    %6 = vector.shape_cast %5 : vector<128xf32> to vector<1x128xf32>
    %7 = arith.mulf %2, %2 : vector<64x128xf32>
    %cst_6 = arith.constant dense<0.000000e+00> : vector<128xf32>
    %8 = vector.multi_reduction <add>, %7, %cst_6 [0] : vector<64x128xf32> to vector<128xf32>
    %9 = vector.shape_cast %8 : vector<128xf32> to vector<1x128xf32>
    %10 = tpu.concatenate %6, %9 in 0 : vector<1x128xf32>, vector<1x128xf32> -> vector<2x128xf32>
    %11 = vector.shape_cast %10 : vector<2x128xf32> to vector<1x2x128xf32>
    %c0_7 = arith.constant 0 : index
    %c0_8 = arith.constant 0 : index
    %c0_9 = arith.constant 0 : index
    %12 = vector.load %arg4[%c0_7, %c0_8, %c0_9] : memref<1x2x128xf32, #tpu.memory_space<vmem>>, vector<1x2x128xf32>
    tpu.vector_store %arg4[%c0_7, %c0_8, %c0_9], %11 {strides = array<i32>} : memref<1x2x128xf32, #tpu.memory_space<vmem>>, vector<1x2x128xf32>,
    return
  }
  func.func @transform_0(%arg0: i32) -> (i32, i32) {
    %c0_i32 = arith.constant 0 : i32
    %c0_i32_0 = arith.constant 0 : i32
    return %arg0, %c0_i32 : i32, i32
  }
  func.func @transform_1(%arg0: i32) -> (i32, i32) {
    %c0_i32 = arith.constant 0 : i32
    %c0_i32_0 = arith.constant 0 : i32
    %c0_i32_1 = arith.constant 0 : i32
    return %c0_i32, %c0_i32_0 : i32, i32
  }
  func.func @transform_2(%arg0: i32) -> (i32, i32) {
    %c0_i32 = arith.constant 0 : i32
    %c0_i32_0 = arith.constant 0 : i32
    return %arg0, %c0_i32 : i32, i32
  }
  func.func @transform_3(%arg0: i32) -> (i32, i32, i32) {
    %c0_i32 = arith.constant 0 : i32
    %c0_i32_0 = arith.constant 0 : i32
    %c0_i32_1 = arith.constant 0 : i32
    return %arg0, %c0_i32, %c0_i32_0 : i32, i32, i32
  }
}

module attributes {stable_mosaic.version = 11 : i64} {
  func.func @_scale_shift_relu_kernel(%arg0: i32, %arg1: memref<64x128xbf16, #tpu.memory_space<vmem>>, %arg2: memref<1x128xf32, #tpu.memory_space<vmem>>, %arg3: memref<1x128xf32, #tpu.memory_space<vmem>>, %arg4: memref<64x128xbf16, #tpu.memory_space<vmem>>) attributes {dimension_semantics = [#tpu.dimension_semantics<parallel>], iteration_bounds = array<i64: 2>, scalar_prefetch = 0 : i64, scratch_operands = 0 : i64, tpu.core_type = #tpu.core_type<tc>, window_params = [{transform_indices = @transform_0, window_bounds = array<i64: 64, 128>}, {pipeline_mode = #tpu.pipeline_mode<synchronous>, transform_indices = @transform_1, window_bounds = array<i64: 1, 128>}, {pipeline_mode = #tpu.pipeline_mode<synchronous>, transform_indices = @transform_2, window_bounds = array<i64: 1, 128>}, {transform_indices = @transform_3, window_bounds = array<i64: 64, 128>}]} {
    %c0 = arith.constant 0 : index
    %c0_0 = arith.constant 0 : index
    %0 = vector.load %arg1[%c0, %c0_0] : memref<64x128xbf16, #tpu.memory_space<vmem>>, vector<64x128xbf16>
    %1 = arith.extf %0 : vector<64x128xbf16> to vector<64x128xf32>
    %c0_1 = arith.constant 0 : index
    %c0_2 = arith.constant 0 : index
    %2 = vector.load %arg2[%c0_1, %c0_2] : memref<1x128xf32, #tpu.memory_space<vmem>>, vector<1x128xf32>
    %3 = vector.broadcast %2 : vector<1x128xf32> to vector<64x128xf32>
    %4 = arith.mulf %1, %3 : vector<64x128xf32>
    %c0_3 = arith.constant 0 : index
    %c0_4 = arith.constant 0 : index
    %5 = vector.load %arg3[%c0_3, %c0_4] : memref<1x128xf32, #tpu.memory_space<vmem>>, vector<1x128xf32>
    %6 = vector.broadcast %5 : vector<1x128xf32> to vector<64x128xf32>
    %7 = arith.addf %4, %6 : vector<64x128xf32>
    %cst = arith.constant 0.000000e+00 : f32
    %8 = vector.broadcast %cst : f32 to vector<64x128xf32>
    %9 = arith.maximumf %7, %8 : vector<64x128xf32>
    %10 = arith.truncf %9 : vector<64x128xf32> to vector<64x128xbf16>
    %c0_5 = arith.constant 0 : index
    %c0_6 = arith.constant 0 : index
    %11 = vector.load %arg4[%c0_5, %c0_6] : memref<64x128xbf16, #tpu.memory_space<vmem>>, vector<64x128xbf16>
    tpu.vector_store %arg4[%c0_5, %c0_6], %10 {strides = array<i32>} : memref<64x128xbf16, #tpu.memory_space<vmem>>, vector<64x128xbf16>,
    return
  }
  func.func @transform_0(%arg0: i32) -> (i32, i32) {
    %c0_i32 = arith.constant 0 : i32
    %c0_i32_0 = arith.constant 0 : i32
    return %arg0, %c0_i32 : i32, i32
  }
  func.func @transform_1(%arg0: i32) -> (i32, i32) {
    %c0_i32 = arith.constant 0 : i32
    %c0_i32_0 = arith.constant 0 : i32
    %c0_i32_1 = arith.constant 0 : i32
    return %c0_i32, %c0_i32_0 : i32, i32
  }
  func.func @transform_2(%arg0: i32) -> (i32, i32) {
    %c0_i32 = arith.constant 0 : i32
    %c0_i32_0 = arith.constant 0 : i32
    %c0_i32_1 = arith.constant 0 : i32
    return %c0_i32, %c0_i32_0 : i32, i32
  }
  func.func @transform_3(%arg0: i32) -> (i32, i32) {
    %c0_i32 = arith.constant 0 : i32
    %c0_i32_0 = arith.constant 0 : i32
    return %arg0, %c0_i32 : i32, i32
  }
}

module attributes {stable_mosaic.version = 11 : i64} {
  func.func @_gemm_stats_kernel(%arg0: i32, %arg1: memref<256x288xbf16, #tpu.memory_space<vmem>>, %arg2: memref<288x128xbf16, #tpu.memory_space<vmem>>, %arg3: memref<256x128xbf16, #tpu.memory_space<vmem>>, %arg4: memref<1x2x128xf32, #tpu.memory_space<vmem>>) attributes {dimension_semantics = [#tpu.dimension_semantics<parallel>], iteration_bounds = array<i64: 2>, scalar_prefetch = 0 : i64, scratch_operands = 0 : i64, tpu.core_type = #tpu.core_type<tc>, window_params = [{transform_indices = @transform_0, window_bounds = array<i64: 256, 288>}, {pipeline_mode = #tpu.pipeline_mode<synchronous>, transform_indices = @transform_1, window_bounds = array<i64: 288, 128>}, {transform_indices = @transform_2, window_bounds = array<i64: 256, 128>}, {transform_indices = @transform_3, window_bounds = array<i64: 1, 2, 128>}]} {
    %c0 = arith.constant 0 : index
    %c0_0 = arith.constant 0 : index
    %0 = vector.load %arg1[%c0, %c0_0] : memref<256x288xbf16, #tpu.memory_space<vmem>>, vector<256x288xbf16>
    %c0_1 = arith.constant 0 : index
    %c0_2 = arith.constant 0 : index
    %1 = vector.load %arg2[%c0_1, %c0_2] : memref<288x128xbf16, #tpu.memory_space<vmem>>, vector<288x128xbf16>
    %cst = arith.constant dense<0.000000e+00> : vector<256x128xf32>
    %2 = tpu.matmul %0, %1, %cst {dimension_numbers = #tpu.dot_dimension_numbers<[1], [0], [0], [1], [0, 0, 1, 1], [], []>} : vector<256x288xbf16>, vector<288x128xbf16>, vector<256x128xf32> -> vector<256x128xf32>
    %3 = arith.truncf %2 : vector<256x128xf32> to vector<256x128xbf16>
    %c0_3 = arith.constant 0 : index
    %c0_4 = arith.constant 0 : index
    %4 = vector.load %arg3[%c0_3, %c0_4] : memref<256x128xbf16, #tpu.memory_space<vmem>>, vector<256x128xbf16>
    tpu.vector_store %arg3[%c0_3, %c0_4], %3 {strides = array<i32>} : memref<256x128xbf16, #tpu.memory_space<vmem>>, vector<256x128xbf16>,
    %cst_5 = arith.constant dense<0.000000e+00> : vector<128xf32>
    %5 = vector.multi_reduction <add>, %2, %cst_5 [0] : vector<256x128xf32> to vector<128xf32>
    %6 = vector.shape_cast %5 : vector<128xf32> to vector<1x128xf32>
    %7 = arith.mulf %2, %2 : vector<256x128xf32>
    %cst_6 = arith.constant dense<0.000000e+00> : vector<128xf32>
    %8 = vector.multi_reduction <add>, %7, %cst_6 [0] : vector<256x128xf32> to vector<128xf32>
    %9 = vector.shape_cast %8 : vector<128xf32> to vector<1x128xf32>
    %10 = tpu.concatenate %6, %9 in 0 : vector<1x128xf32>, vector<1x128xf32> -> vector<2x128xf32>
    %11 = vector.shape_cast %10 : vector<2x128xf32> to vector<1x2x128xf32>
    %c0_7 = arith.constant 0 : index
    %c0_8 = arith.constant 0 : index
    %c0_9 = arith.constant 0 : index
    %12 = vector.load %arg4[%c0_7, %c0_8, %c0_9] : memref<1x2x128xf32, #tpu.memory_space<vmem>>, vector<1x2x128xf32>
    tpu.vector_store %arg4[%c0_7, %c0_8, %c0_9], %11 {strides = array<i32>} : memref<1x2x128xf32, #tpu.memory_space<vmem>>, vector<1x2x128xf32>,
    return
  }
  func.func @transform_0(%arg0: i32) -> (i32, i32) {
    %c0_i32 = arith.constant 0 : i32
    %c0_i32_0 = arith.constant 0 : i32
    return %arg0, %c0_i32 : i32, i32
  }
  func.func @transform_1(%arg0: i32) -> (i32, i32) {
    %c0_i32 = arith.constant 0 : i32
    %c0_i32_0 = arith.constant 0 : i32
    %c0_i32_1 = arith.constant 0 : i32
    return %c0_i32, %c0_i32_0 : i32, i32
  }
  func.func @transform_2(%arg0: i32) -> (i32, i32) {
    %c0_i32 = arith.constant 0 : i32
    %c0_i32_0 = arith.constant 0 : i32
    return %arg0, %c0_i32 : i32, i32
  }
  func.func @transform_3(%arg0: i32) -> (i32, i32, i32) {
    %c0_i32 = arith.constant 0 : i32
    %c0_i32_0 = arith.constant 0 : i32
    %c0_i32_1 = arith.constant 0 : i32
    return %arg0, %c0_i32, %c0_i32_0 : i32, i32, i32
  }
}

module attributes {stable_mosaic.version = 11 : i64} {
  func.func @_scale_shift_relu_kernel(%arg0: i32, %arg1: memref<256x128xbf16, #tpu.memory_space<vmem>>, %arg2: memref<1x128xf32, #tpu.memory_space<vmem>>, %arg3: memref<1x128xf32, #tpu.memory_space<vmem>>, %arg4: memref<256x128xbf16, #tpu.memory_space<vmem>>) attributes {dimension_semantics = [#tpu.dimension_semantics<parallel>], iteration_bounds = array<i64: 2>, scalar_prefetch = 0 : i64, scratch_operands = 0 : i64, tpu.core_type = #tpu.core_type<tc>, window_params = [{transform_indices = @transform_0, window_bounds = array<i64: 256, 128>}, {pipeline_mode = #tpu.pipeline_mode<synchronous>, transform_indices = @transform_1, window_bounds = array<i64: 1, 128>}, {pipeline_mode = #tpu.pipeline_mode<synchronous>, transform_indices = @transform_2, window_bounds = array<i64: 1, 128>}, {transform_indices = @transform_3, window_bounds = array<i64: 256, 128>}]} {
    %c0 = arith.constant 0 : index
    %c0_0 = arith.constant 0 : index
    %0 = vector.load %arg1[%c0, %c0_0] : memref<256x128xbf16, #tpu.memory_space<vmem>>, vector<256x128xbf16>
    %1 = arith.extf %0 : vector<256x128xbf16> to vector<256x128xf32>
    %c0_1 = arith.constant 0 : index
    %c0_2 = arith.constant 0 : index
    %2 = vector.load %arg2[%c0_1, %c0_2] : memref<1x128xf32, #tpu.memory_space<vmem>>, vector<1x128xf32>
    %3 = vector.broadcast %2 : vector<1x128xf32> to vector<256x128xf32>
    %4 = arith.mulf %1, %3 : vector<256x128xf32>
    %c0_3 = arith.constant 0 : index
    %c0_4 = arith.constant 0 : index
    %5 = vector.load %arg3[%c0_3, %c0_4] : memref<1x128xf32, #tpu.memory_space<vmem>>, vector<1x128xf32>
    %6 = vector.broadcast %5 : vector<1x128xf32> to vector<256x128xf32>
    %7 = arith.addf %4, %6 : vector<256x128xf32>
    %cst = arith.constant 0.000000e+00 : f32
    %8 = vector.broadcast %cst : f32 to vector<256x128xf32>
    %9 = arith.maximumf %7, %8 : vector<256x128xf32>
    %10 = arith.truncf %9 : vector<256x128xf32> to vector<256x128xbf16>
    %c0_5 = arith.constant 0 : index
    %c0_6 = arith.constant 0 : index
    %11 = vector.load %arg4[%c0_5, %c0_6] : memref<256x128xbf16, #tpu.memory_space<vmem>>, vector<256x128xbf16>
    tpu.vector_store %arg4[%c0_5, %c0_6], %10 {strides = array<i32>} : memref<256x128xbf16, #tpu.memory_space<vmem>>, vector<256x128xbf16>,
    return
  }
  func.func @transform_0(%arg0: i32) -> (i32, i32) {
    %c0_i32 = arith.constant 0 : i32
    %c0_i32_0 = arith.constant 0 : i32
    return %arg0, %c0_i32 : i32, i32
  }
  func.func @transform_1(%arg0: i32) -> (i32, i32) {
    %c0_i32 = arith.constant 0 : i32
    %c0_i32_0 = arith.constant 0 : i32
    %c0_i32_1 = arith.constant 0 : i32
    return %c0_i32, %c0_i32_0 : i32, i32
  }
  func.func @transform_2(%arg0: i32) -> (i32, i32) {
    %c0_i32 = arith.constant 0 : i32
    %c0_i32_0 = arith.constant 0 : i32
    %c0_i32_1 = arith.constant 0 : i32
    return %c0_i32, %c0_i32_0 : i32, i32
  }
  func.func @transform_3(%arg0: i32) -> (i32, i32) {
    %c0_i32 = arith.constant 0 : i32
    %c0_i32_0 = arith.constant 0 : i32
    return %arg0, %c0_i32 : i32, i32
  }
}

module attributes {stable_mosaic.version = 11 : i64} {
  func.func @_gemm_bias_tanh_kernel(%arg0: i32, %arg1: memref<1024x144xbf16, #tpu.memory_space<vmem>>, %arg2: memref<144x128xbf16, #tpu.memory_space<vmem>>, %arg3: memref<1x128xf32, #tpu.memory_space<vmem>>, %arg4: memref<1024x128xbf16, #tpu.memory_space<vmem>>) attributes {dimension_semantics = [#tpu.dimension_semantics<parallel>], iteration_bounds = array<i64: 2>, scalar_prefetch = 0 : i64, scratch_operands = 0 : i64, tpu.core_type = #tpu.core_type<tc>, window_params = [{transform_indices = @transform_0, window_bounds = array<i64: 1024, 144>}, {pipeline_mode = #tpu.pipeline_mode<synchronous>, transform_indices = @transform_1, window_bounds = array<i64: 144, 128>}, {pipeline_mode = #tpu.pipeline_mode<synchronous>, transform_indices = @transform_2, window_bounds = array<i64: 1, 128>}, {transform_indices = @transform_3, window_bounds = array<i64: 1024, 128>}]} {
    %c0 = arith.constant 0 : index
    %c0_0 = arith.constant 0 : index
    %0 = vector.load %arg1[%c0, %c0_0] : memref<1024x144xbf16, #tpu.memory_space<vmem>>, vector<1024x144xbf16>
    %c0_1 = arith.constant 0 : index
    %c0_2 = arith.constant 0 : index
    %1 = vector.load %arg2[%c0_1, %c0_2] : memref<144x128xbf16, #tpu.memory_space<vmem>>, vector<144x128xbf16>
    %cst = arith.constant dense<0.000000e+00> : vector<1024x128xf32>
    %2 = tpu.matmul %0, %1, %cst {dimension_numbers = #tpu.dot_dimension_numbers<[1], [0], [0], [1], [0, 0, 1, 1], [], []>} : vector<1024x144xbf16>, vector<144x128xbf16>, vector<1024x128xf32> -> vector<1024x128xf32>
    %c0_3 = arith.constant 0 : index
    %c0_4 = arith.constant 0 : index
    %3 = vector.load %arg3[%c0_3, %c0_4] : memref<1x128xf32, #tpu.memory_space<vmem>>, vector<1x128xf32>
    %4 = vector.broadcast %3 : vector<1x128xf32> to vector<1024x128xf32>
    %5 = arith.addf %2, %4 : vector<1024x128xf32>
    %6 = math.tanh %5 : vector<1024x128xf32>
    %7 = arith.truncf %6 : vector<1024x128xf32> to vector<1024x128xbf16>
    %c0_5 = arith.constant 0 : index
    %c0_6 = arith.constant 0 : index
    %8 = vector.load %arg4[%c0_5, %c0_6] : memref<1024x128xbf16, #tpu.memory_space<vmem>>, vector<1024x128xbf16>
    tpu.vector_store %arg4[%c0_5, %c0_6], %7 {strides = array<i32>} : memref<1024x128xbf16, #tpu.memory_space<vmem>>, vector<1024x128xbf16>,
    return
  }
  func.func @transform_0(%arg0: i32) -> (i32, i32) {
    %c0_i32 = arith.constant 0 : i32
    %c0_i32_0 = arith.constant 0 : i32
    return %arg0, %c0_i32 : i32, i32
  }
  func.func @transform_1(%arg0: i32) -> (i32, i32) {
    %c0_i32 = arith.constant 0 : i32
    %c0_i32_0 = arith.constant 0 : i32
    %c0_i32_1 = arith.constant 0 : i32
    return %c0_i32, %c0_i32_0 : i32, i32
  }
  func.func @transform_2(%arg0: i32) -> (i32, i32) {
    %c0_i32 = arith.constant 0 : i32
    %c0_i32_0 = arith.constant 0 : i32
    %c0_i32_1 = arith.constant 0 : i32
    return %c0_i32, %c0_i32_0 : i32, i32
  }
  func.func @transform_3(%arg0: i32) -> (i32, i32) {
    %c0_i32 = arith.constant 0 : i32
    %c0_i32_0 = arith.constant 0 : i32
    return %arg0, %c0_i32 : i32, i32
  }
}

</mosaic_0001>

<bundles_post_ra>
// kernel: tile.48
= control target key start
LH: loop header
LB: loop body
LE: loop exit
PB: predicated region body
PF: predicated region fallthrough
CT: control target
= control target key end

     0   :  { %s28_s0 = inlined_call_operand.vmem [shape: f32[128], index: 0, kind: input, shape index: {}]   ;;  %s29_s1 = inlined_call_operand.vmem [shape: f32[16,128], index: 1, kind: output, shape index: {}]  }
   0x1   :  { %v4_v0 = vld [vmem:[%s28_s0] ss:$0 sm:$0xff] }
   0x2   :  { %5 = vst [vmem:[%s29_s1] sm:$0xff] %v4_v0  ;;  %8 = vst [vmem:[%s29_s1 + $0x8] sm:$0xff] %v4_v0 }

// kernel: _forward_impl.9
= control target key start
LH: loop header
LB: loop body
LE: loop exit
PB: predicated region body
PF: predicated region fallthrough
CT: control target
= control target key end

     0   :  { %9 = vsyncpa [#allocation3], 0  ;;  %s1012_s12 = smov [#allocation2]   ;;  %s1253_s0 = inlined_call_operand.vmem [shape: bf16[2,16], index: 0, kind: input, shape index: {}]   ;;  %s1254_s1 = inlined_call_operand.hbm [shape: bf16[16,2048], index: 1, kind: input, shape index: {}]   ;;  %s1255_s2 = inlined_call_operand.vmem [shape: bf16[2,2048], index: 2, kind: output, shape index: {0}]   ;;  %s1256_s3 = inlined_call_operand.vmem [shape: f32[1,2,2048], index: 3, kind: output, shape index: {1}]  }
   0x1   :  { %s17_s13 = sshll.u32 %s1012_s12, 4  ;;  %s988_s16 = scalar_lea.hbm %s1254_s1, 2048  ;;  %s18_s13 = int_to_ptr.vmem [resolvable:$true] %s17_s13 }
   0x2   :  { %p989_p0 = scmp.ne.s32.totalorder %s1254_s1, %s988_s16  ;;  %p992_p1 = scmp.lt.u32.totalorder %s988_s16, %s1254_s1 }
   0x4   :  { %p994_p2 = pnand %p992_p1, %p989_p0 }
   0x6   :  { %997 = shalt.err (!%p994_p2)
}
   0x7   :  { %s998_s21 = scalar_lea.vmem %s18_s13, 2048  ;;  %p1003_p4 = scmp.lt.s32.totalorder %s18_s13, %s18_s13 }
   0x8   :  { %p999_p3 = scmp.ne.s32.totalorder %s18_s13, %s998_s21  ;;  %p1004_p5 = scmp.lt.s32.totalorder %s998_s21, %s998_s21 }
   0xa   :  { %p1005_p6 = por %p1004_p5, %p1003_p4 }
   0xc   :  { %p1006_p7 = pnand %p1005_p6, %p999_p3 }
   0xe   :  { %1009 = shalt.err (!%p1006_p7)
}
   0xf   :  { %s1013_s22 = smov 1024   ;;  %s1014_s23 = smov 64  }
  0x10   :  { %23 = dma.hbm_to_vmem [thread:$0]  %s1254_s1, 2048, %s18_s13, [#allocation3], %s1013_s22, %s1013_s22, %s1014_s23  }
  0x11   :  { %1010 = dma.done.wait [#allocation3], 2048  }
  0x12   :  { %1011 = vsyncadd [#allocation3], 4294965248  ;;  %v1015_v0 = vmov 0   ;;  %v29_v1 = vld [vmem:[#allocation2] sm:$0xff]  ;;  %v30_v3 = vld [vmem:[#allocation2 + $0x8] sm:$0xff]  ;;  %vm125_vm0 = vcmask 130048   ;;  %v496_v36 = vlaneseq }
  0x13   :  { %161 = vmatprep.mubr.bf16.mxu0 %v1015_v0  ;;  %202 = vmatprep.mubr.bf16.mxu1 %v1015_v0  ;;  %v37_v2 = vld [vmem:[#allocation2 + $0x40] sm:$0xff]  ;;  %v38_v5 = vld [vmem:[#allocation2 + $0x48] sm:$0xff]  ;;  %v31_v7 = vld [vmem:[#allocation2 + $0x10] sm:$0xff]  ;;  %v1016_v34 = vmov 1966171168   ;;  %vm591_vm1 = vcmask 1041408  }
  0x14   :  { %v951_v4 = vcombine.high %v29_v1, %v37_v2  ;;  %v950_v6 = vcombine.low %v29_v1, %v37_v2  ;;  %v953_v8 = vcombine.high %v30_v3, %v38_v5  ;;  %v952_v9 = vcombine.low %v30_v3, %v38_v5  ;;  %v39_v10 = vld [vmem:[#allocation2 + $0x50] sm:$0xff]  ;;  %v32_v11 = vld [vmem:[#allocation2 + $0x18] sm:$0xff]  ;;  %v33_v15 = vld [vmem:[#allocation2 + $0x20] sm:$0xff] }
  0x15   :  { %v40_v12 = vld [vmem:[#allocation2 + $0x58] sm:$0xff]  ;;  %v955_v13 = vcombine.high %v31_v7, %v39_v10  ;;  %v41_v16 = vld [vmem:[#allocation2 + $0x60] sm:$0xff]  ;;  %v954_v18 = vcombine.low %v31_v7, %v39_v10  ;;  %v34_v19 = vld [vmem:[#allocation2 + $0x28] sm:$0xff]  ;;  %v494_v35 = vunpack.c.l.s4 %v1016_v34  ;;  %v1069_v38 = vshrl.u32 %v496_v36, 7 }
  0x16   :  { %129 = vmatprep.subr.bf16.mxu0 %v951_v4  ;;  %v957_v14 = vcombine.high %v32_v11, %v40_v12  ;;  %170 = vmatprep.subr.bf16.mxu1 %v953_v8  ;;  %v28_v17 = vld [vmem:[%s1253_s0] sm:$0x1]  ;;  %v42_v20 = vld [vmem:[#allocation2 + $0x68] sm:$0xff]  ;;  %v956_v21 = vcombine.low %v32_v11, %v40_v12  ;;  %v959_v22 = vcombine.high %v33_v15, %v41_v16  ;;  %v35_v24 = vld [vmem:[#allocation2 + $0x30] sm:$0xff]  ;;  %v1017_v39 = vmov 1983009808  }
  0x17   :  { %130 = vmatpush1.bf16.msra.mxu0 %v950_v6  ;;  %171 = vmatpush1.bf16.msra.mxu1 %v952_v9  ;;  %v961_v23 = vcombine.high %v34_v19, %v42_v20  ;;  %v43_v25 = vld [vmem:[#allocation2 + $0x70] sm:$0xff]  ;;  %v958_v26 = vcombine.low %v33_v15, %v41_v16  ;;  %v36_v27 = vld [vmem:[#allocation2 + $0x38] sm:$0xff]  ;;  %v960_v29 = vcombine.low %v34_v19, %v42_v20  ;;  %v495_v37 = vunpack.c.0.s8 %v494_v35 }
  0x18   :  { %211 = vmatprep.subr.bf16.mxu0 %v955_v13  ;;  %252 = vmatprep.subr.bf16.mxu1 %v957_v14  ;;  %v44_v28 = vld [vmem:[#allocation2 + $0x78] sm:$0xff]  ;;  %v963_v30 = vcombine.high %v35_v24, %v43_v25  ;;  %v962_v32 = vcombine.low %v35_v24, %v43_v25  ;;  %v1071_v40 = vunpack.c.l.s4 %v1017_v39  ;;  %vm832_vm2 = vcmask 1040384  }
  0x19   :  { %v965_v31 = vcombine.high %v36_v27, %v44_v28  ;;  %v964_v33 = vcombine.low %v36_v27, %v44_v28  ;;  %v1074_v42 = vsub.s32 %v495_v37, %v1069_v38 }
  0x1a   :  { %966 = vmatmul.mubr.msk.bf16.vlgmr.msra.gmra.mrb[0].mxu0 %vm125_vm0, %v28_v17  ;;  %967 = vmatmul.mubr.msk.bf16.vlgmr.msra.gmra.mrb[0].mxu1 %vm125_vm0, %v28_v17  ;;  %v869_v47 = vunpack.c.0.s8 %v1071_v40 }
  0x1b   :  { %212 = vmatpush1.bf16.msra.mxu0 %v954_v18  ;;  %253 = vmatpush1.bf16.msra.mxu1 %v956_v21 }
  0x1c   :  { %243 = vmatprep.mubr.bf16.mxu0 %v1015_v0  ;;  %284 = vmatprep.mubr.bf16.mxu1 %v1015_v0  ;;  %v1095_v39 = vsub.s32 %v869_v47, %v1069_v38 }
  0x1d   :  { %293 = vmatprep.subr.bf16.mxu0 %v959_v22  ;;  %334 = vmatprep.subr.bf16.mxu1 %v961_v23 }
  0x22   :  { %968 = vmatmul.mubr.msk.bf16.vlgmr.msra.gmra.mrb[4].mxu0 %vm125_vm0, %v28_v17  ;;  %969 = vmatmul.mubr.msk.bf16.vlgmr.msra.gmra.mrb[4].mxu1 %vm125_vm0, %v28_v17 }
  0x23   :  { %294 = vmatpush1.bf16.msra.mxu0 %v958_v26  ;;  %335 = vmatpush1.bf16.msra.mxu1 %v960_v29 }
  0x24   :  { %325 = vmatprep.mubr.bf16.mxu0 %v1015_v0  ;;  %366 = vmatprep.mubr.bf16.mxu1 %v1015_v0 }
  0x25   :  { %375 = vmatprep.subr.bf16.mxu0 %v963_v30  ;;  %416 = vmatprep.subr.bf16.mxu1 %v965_v31 }
  0x2a   :  { %970 = vmatmul.mubr.msk.bf16.vlgmr.msra.gmra.mrb[8].mxu0 %vm125_vm0, %v28_v17  ;;  %971 = vmatmul.mubr.msk.bf16.vlgmr.msra.gmra.mrb[8].mxu1 %vm125_vm0, %v28_v17 }
  0x2b   :  { %376 = vmatpush1.bf16.msra.mxu0 %v962_v32  ;;  %417 = vmatpush1.bf16.msra.mxu1 %v964_v33 }
  0x2c   :  { %407 = vmatprep.mubr.bf16.mxu0 %v1015_v0  ;;  %448 = vmatprep.mubr.bf16.mxu1 %v1015_v0 }
  0x32   :  { %972 = vmatmul.mubr.msk.bf16.vlgmr.msra.gmra.mrb[12].mxu0 %vm125_vm0, %v28_v17  ;;  %973 = vmatmul.mubr.msk.bf16.vlgmr.msra.gmra.mrb[12].mxu1 %vm125_vm0, %v28_v17 }
  0xed   :  { %v163_v41 = vpop.f32.mrb[0].mxu0  ;;  %v204_v45 = vpop.f32.mrb[0].mxu1 }
  0xee   :  { %v592_v43 = vsel %vm591_vm1, %v163_v41, 0.0  ;;  %v704_v44 = vmul.f32 %v163_v41, %v163_v41  ;;  %v165_v46 = vpop.f32.mrb[1].mxu0  ;;  %v606_v49 = vsel %vm591_vm1, %v204_v45, 0.0  ;;  %v706_v50 = vmul.f32 %v204_v45, %v204_v45  ;;  %v206_v52 = vpop.f32.mrb[1].mxu1 }
  0xef   :  { %v593_v48 = vrot.slane %v592_v43, 4  ;;  %v974_v51 = vpack.c.bf16 %v165_v46, %v163_v41  ;;  %v167_v53 = vpop.f32.mrb[2].mxu0  ;;  %v607_v55 = vrot.slane %v606_v49, 4  ;;  %v599_v56 = vsel %vm591_vm1, %v165_v46, 0.0  ;;  %v208_v58 = vpop.f32.mrb[2].mxu1 }
  0xf0   :  { %v720_v54 = vsel %vm591_vm1, %v704_v44, 0.0  ;;  %v705_v57 = vmul.f32 %v165_v46, %v165_v46  ;;  %v168_v59 = vpop.f32.mrb[3].mxu0  ;;  %v734_v62 = vsel %vm591_vm1, %v706_v50, 0.0  ;;  %v209_v0 = vpop.f32.mrb[3].mxu1  ;;  %v600_v3 = vrot.slane %v599_v56, 4 }
  0xf1   :  { %v594_v60 = vadd.f32 %v593_v48, %v592_v43  ;;  %v721_v61 = vrot.slane %v720_v54, 4  ;;  %v499_v63 = vrot.slane %v974_v51, %v1074_v42  ;;  %v608_v1 = vadd.f32 %v607_v55, %v606_v49 }
  0xf2   :  { %v735_v2 = vrot.slane %v734_v62, 4  ;;  %v727_v4 = vsel %vm591_vm1, %v705_v57, 0.0  ;;  %v975_v8 = vpack.c.bf16 %v206_v52, %v204_v45  ;;  %v601_v11 = vadd.f32 %v600_v3, %v599_v56 }
  0xf3   :  { %v595_v5 = vrot.slane %v594_v60, 2  ;;  %v722_v6 = vadd.f32 %v721_v61, %v720_v54  ;;  %v728_v7 = vrot.slane %v727_v4, 4  ;;  %v609_v9 = vrot.slane %v608_v1, 2 }
  0xf4   :  { %v736_v10 = vadd.f32 %v735_v2, %v734_v62  ;;  %v613_v12 = vsel %vm591_vm1, %v206_v52, 0.0  ;;  %v506_v16 = vrot.slane %v975_v8, %v1074_v42  ;;  %v602_v20 = vrot.slane %v601_v11, 2 }
  0xf5   :  { %v596_v13 = vadd.f32 %v595_v5, %v594_v60  ;;  %v723_v14 = vrot.slane %v722_v6, 2  ;;  %v729_v15 = vadd.f32 %v728_v7, %v727_v4  ;;  %v1086_v17 = vpop.f32.mrb[4].mxu0  ;;  %v610_v18 = vadd.f32 %v609_v9, %v608_v1  ;;  %v1088_v22 = vpop.f32.mrb[4].mxu1 }
  0xf6   :  { %v737_v19 = vrot.slane %v736_v10, 2  ;;  %v614_v21 = vrot.slane %v613_v12, 4  ;;  %v1090_v23 = vpop.f32.mrb[5].mxu0  ;;  %v521_v27 = vcombine.low %v499_v63, %v506_v16  ;;  %v1092_v28 = vpop.f32.mrb[5].mxu1  ;;  %v603_v31 = vadd.f32 %v602_v20, %v601_v11 }
  0xf7   :  { %v597_v24 = vrot.slane %v596_v13, 1  ;;  %v724_v25 = vadd.f32 %v723_v14, %v722_v6  ;;  %v730_v26 = vrot.slane %v729_v15, 2  ;;  %v249_v29 = vpop.f32.mrb[6].mxu0  ;;  %v290_v33 = vpop.f32.mrb[6].mxu1  ;;  %v611_v36 = vrot.slane %v610_v18, 1 }
  0xf8   :  { %v738_v30 = vadd.f32 %v737_v19, %v736_v10  ;;  %v615_v32 = vadd.f32 %v614_v21, %v613_v12  ;;  %v250_v34 = vpop.f32.mrb[7].mxu0  ;;  %v291_v40 = vpop.f32.mrb[7].mxu1  ;;  %v604_v44 = vrot.slane %v603_v31, 1  ;;  %v707_v49 = vmul.f32 %v206_v52, %v206_v52 }
  0xf9   :  { %v725_v35 = vrot.slane %v724_v25, 1  ;;  %v731_v37 = vadd.f32 %v730_v26, %v729_v15  ;;  %v598_v41 = vadd.f32 %v597_v24, %v596_v13  ;;  %v620_v50 = vsel %vm591_vm1, %v1086_v17, 0.0 }
  0xfa   :  { %v739_v43 = vrot.slane %v738_v30, 1  ;;  %v616_v45 = vrot.slane %v615_v32, 2  ;;  %v605_v51 = vadd.f32 %v604_v44, %v603_v31  ;;  %v1100_v53 = vrot.slane %v521_v27, %v1074_v42 }
  0xfb   :  { %v726_v46 = vadd.f32 %v725_v35, %v724_v25  ;;  %v732_v48 = vrot.slane %v731_v37, 1  ;;  %v621_v55 = vrot.slane %v620_v50, 4  ;;  %v741_v56 = vsel %vm591_vm1, %v707_v49, 0.0 }
  0xfc   :  { %v617_v54 = vadd.f32 %v616_v45, %v615_v32  ;;  %v708_v57 = vmul.f32 %v1086_v17, %v1086_v17  ;;  %v740_v52 = vadd.f32 %v739_v43, %v738_v30  ;;  %v742_v60 = vrot.slane %v741_v56, 4 }
  0xfd   :  { %v1103_v38 = vsel %vm832_vm2, %v598_v41, %v726_v46  ;;  %v733_v47 = vadd.f32 %v732_v48, %v731_v37  ;;  %v1108_v58 = vpop.f32.mrb[8].mxu0  ;;  %v622_v61 = vadd.f32 %v621_v55, %v620_v50  ;;  %v1110_v62 = vpop.f32.mrb[8].mxu1  ;;  %v634_v2 = vsel %vm591_vm1, %v1088_v22, 0.0 }
  0xfe   :  { %v618_v59 = vrot.slane %v617_v54, 1  ;;  %v1112_v63 = vpop.f32.mrb[9].mxu0  ;;  %v748_v1 = vsel %vm591_vm1, %v708_v57, 0.0  ;;  %v710_v3 = vmul.f32 %v1088_v22, %v1088_v22  ;;  %v1120_v4 = vpop.f32.mrb[9].mxu1  ;;  %v612_v6 = vadd.f32 %v611_v36, %v610_v18 }
  0xff   :  { %v834_v0 = vsel %vm832_vm2, %v605_v51, %v733_v47  ;;  %v331_v5 = vpop.f32.mrb[10].mxu0  ;;  %v743_v8 = vadd.f32 %v742_v60, %v741_v56  ;;  %v623_v9 = vrot.slane %v622_v61, 2  ;;  %v372_v10 = vpop.f32.mrb[10].mxu1  ;;  %v749_v12 = vrot.slane %v748_v1, 4 }
 0x100   :  { %v865_v7 = vcombine.low %v1103_v38, %v834_v0  ;;  %v332_v11 = vpop.f32.mrb[11].mxu0  ;;  %v635_v13 = vrot.slane %v634_v2, 4  ;;  %v762_v14 = vsel %vm591_vm1, %v710_v3, 0.0  ;;  %v976_v15 = vpack.c.bf16 %v1090_v23, %v1086_v17  ;;  %v373_v16 = vpop.f32.mrb[11].mxu1 }
 0x101   :  { %v835_v19 = vsel %vm832_vm2, %v612_v6, %v740_v52  ;;  %v744_v20 = vrot.slane %v743_v8, 2  ;;  %v624_v21 = vadd.f32 %v623_v9, %v622_v61  ;;  %v763_v24 = vrot.slane %v762_v14, 4 }
 0x102   :  { %v619_v18 = vadd.f32 %v618_v59, %v617_v54  ;;  %v750_v25 = vadd.f32 %v749_v12, %v748_v1  ;;  %v636_v26 = vadd.f32 %v635_v13, %v634_v2  ;;  %v627_v27 = vsel %vm591_vm1, %v1090_v23, 0.0 }
 0x103   :  { %v745_v29 = vadd.f32 %v744_v20, %v743_v8  ;;  %v764_v30 = vadd.f32 %v763_v24, %v762_v14  ;;  %v513_v31 = vrot.slane %v976_v15, %v1074_v42  ;;  %v628_v32 = vrot.slane %v627_v27, 4 }
 0x104   :  { %v751_v33 = vrot.slane %v750_v25, 2  ;;  %v637_v34 = vrot.slane %v636_v26, 2  ;;  %v709_v17 = vmul.f32 %v1090_v23, %v1090_v23  ;;  %v977_v35 = vpack.c.bf16 %v1092_v28, %v1088_v22 }
 0x105   :  { %v1134_v36 = vpop.f32.mrb[12].mxu0  ;;  %v746_v37 = vrot.slane %v745_v29, 1  ;;  %v625_v40 = vrot.slane %v624_v21, 1  ;;  %v765_v41 = vrot.slane %v764_v30, 2  ;;  %v629_v43 = vadd.f32 %v628_v32, %v627_v27  ;;  %v1136_v44 = vpop.f32.mrb[12].mxu1 }
 0x106   :  { %v1138_v45 = vpop.f32.mrb[13].mxu0  ;;  %v752_v46 = vadd.f32 %v751_v33, %v750_v25  ;;  %v638_v48 = vadd.f32 %v637_v34, %v636_v26  ;;  %v755_v49 = vsel %vm591_vm1, %v709_v17, 0.0  ;;  %v520_v50 = vrot.slane %v977_v35, %v1074_v42  ;;  %v1142_v23 = vpop.f32.mrb[13].mxu1 }
 0x107   :  { %v413_v51 = vpop.f32.mrb[14].mxu0  ;;  %v747_v22 = vadd.f32 %v746_v37, %v745_v29  ;;  %v766_v54 = vadd.f32 %v765_v41, %v764_v30  ;;  %v630_v55 = vrot.slane %v629_v43, 2  ;;  %v756_v38 = vrot.slane %v755_v49, 4  ;;  %v454_v47 = vpop.f32.mrb[14].mxu1 }
 0x108   :  { %v414_v56 = vpop.f32.mrb[15].mxu0  ;;  %v753_v57 = vrot.slane %v752_v46, 1  ;;  %v639_v52 = vrot.slane %v638_v48, 1  ;;  %v522_v59 = vcombine.low %v513_v31, %v520_v50  ;;  %v641_v60 = vsel %vm591_vm1, %v1092_v28, 0.0  ;;  %v455_v61 = vpop.f32.mrb[15].mxu1 }
 0x109   :  { %v873_v0 = vrot.slane %v865_v7, %v1095_v39  ;;  %v836_v1 = vsel %vm832_vm2, %v619_v18, %v747_v22  ;;  %v631_v2 = vadd.f32 %v630_v55, %v629_v43  ;;  %v757_v3 = vadd.f32 %v756_v38, %v755_v49 }
 0x10a   :  { %v866_v5 = vcombine.low %v835_v19, %v836_v1  ;;  %v626_v6 = vadd.f32 %v625_v40, %v624_v21  ;;  %v754_v8 = vadd.f32 %v753_v57, %v752_v46  ;;  %v536_v9 = vrot.slane %v522_v59, %v1074_v42 }
 0x10b   :  { %v767_v10 = vrot.slane %v766_v54, 1  ;;  %v632_v11 = vrot.slane %v631_v2, 1  ;;  %v758_v12 = vrot.slane %v757_v3, 2  ;;  %v642_v13 = vrot.slane %v641_v60, 4 }
 0x10c   :  { %v880_v14 = vrot.slane %v866_v5, %v1095_v39  ;;  %v640_v15 = vadd.f32 %v639_v52, %v638_v48  ;;  %v537_v16 = vcombine.low %v1100_v53, %v536_v9  ;;  %v711_v7 = vmul.f32 %v1092_v28, %v1092_v28 }
 0x10d   :  { %v837_v20 = vsel %vm832_vm2, %v626_v6, %v754_v8  ;;  %v633_v24 = vadd.f32 %v632_v11, %v631_v2  ;;  %v759_v19 = vadd.f32 %v758_v12, %v757_v3  ;;  %v643_v21 = vadd.f32 %v642_v13, %v641_v60 }
 0x10e   :  { %v881_v18 = vcombine.low %v873_v0, %v880_v14  ;;  %589 = vst [vmem:[%s1255_s2] sm:$0xff] %v537_v16  ;;  %v769_v25 = vsel %vm591_vm1, %v711_v7, 0.0  ;;  %v648_v26 = vsel %vm591_vm1, %v1108_v58, 0.0  ;;  %v712_v53 = vmul.f32 %v1108_v58, %v1108_v58 }
 0x10f   :  { %v760_v27 = vrot.slane %v759_v19, 1  ;;  %v644_v28 = vrot.slane %v643_v21, 2  ;;  %v770_v29 = vrot.slane %v769_v25, 4  ;;  %v649_v30 = vrot.slane %v648_v26, 4 }
 0x110   :  { %937 = vst [vmem:[%s1256_s3] sm:$0xff] %v881_v18  ;;  %v776_v31 = vsel %vm591_vm1, %v712_v53, 0.0  ;;  %v662_v32 = vsel %vm591_vm1, %v1110_v62, 0.0  ;;  %v714_v33 = vmul.f32 %v1110_v62, %v1110_v62  ;;  %v978_v34 = vpack.c.bf16 %v1112_v63, %v1108_v58 }
 0x111   :  { %v761_v17 = vadd.f32 %v760_v27, %v759_v19  ;;  %v645_v35 = vadd.f32 %v644_v28, %v643_v21  ;;  %v771_v37 = vadd.f32 %v770_v29, %v769_v25  ;;  %v650_v40 = vadd.f32 %v649_v30, %v648_v26 }
 0x112   :  { %v768_v41 = vadd.f32 %v767_v10, %v766_v54  ;;  %v777_v43 = vrot.slane %v776_v31, 4  ;;  %v663_v46 = vrot.slane %v662_v32, 4  ;;  %v790_v48 = vsel %vm591_vm1, %v714_v33, 0.0 }
 0x113   :  { %v838_v49 = vsel %vm832_vm2, %v633_v24, %v761_v17  ;;  %v646_v50 = vrot.slane %v645_v35, 1  ;;  %v772_v51 = vrot.slane %v771_v37, 2  ;;  %v651_v22 = vrot.slane %v650_v40, 2 }
 0x114   :  { %v882_v55 = vcombine.low %v837_v20, %v838_v49  ;;  %v778_v38 = vadd.f32 %v777_v43, %v776_v31  ;;  %v664_v47 = vadd.f32 %v663_v46, %v662_v32  ;;  %v791_v56 = vrot.slane %v790_v48, 4 }
 0x115   :  { %v773_v57 = vadd.f32 %v772_v51, %v771_v37  ;;  %v652_v58 = vadd.f32 %v651_v22, %v650_v40  ;;  %v655_v52 = vsel %vm591_vm1, %v1112_v63, 0.0  ;;  %v839_v54 = vsel %vm832_vm2, %v640_v15, %v768_v41 }
 0x116   :  { %v779_v59 = vrot.slane %v778_v38, 2  ;;  %v665_v60 = vrot.slane %v664_v47, 2  ;;  %v792_v61 = vadd.f32 %v791_v56, %v790_v48  ;;  %v1178_v1 = vrot.slane %v978_v34, %v1074_v42 }
 0x117   :  { %v774_v0 = vrot.slane %v773_v57, 1  ;;  %v656_v2 = vrot.slane %v655_v52, 4  ;;  %v713_v3 = vmul.f32 %v1112_v63, %v1112_v63  ;;  %v647_v5 = vadd.f32 %v646_v50, %v645_v35 }
 0x118   :  { %v780_v6 = vadd.f32 %v779_v59, %v778_v38  ;;  %v793_v8 = vrot.slane %v792_v61, 2  ;;  %v979_v9 = vpack.c.bf16 %v1120_v4, %v1110_v62  ;;  %v653_v11 = vrot.slane %v652_v58, 1 }
 0x119   :  { %v775_v10 = vadd.f32 %v774_v0, %v773_v57  ;;  %v657_v12 = vadd.f32 %v656_v2, %v655_v52  ;;  %v783_v13 = vsel %vm591_vm1, %v713_v3, 0.0  ;;  %v666_v15 = vadd.f32 %v665_v60, %v664_v47 }
 0x11a   :  { %v781_v14 = vrot.slane %v780_v6, 1  ;;  %v794_v16 = vadd.f32 %v793_v8, %v792_v61  ;;  %v784_v7 = vrot.slane %v783_v13, 4  ;;  %v1187_v63 = vrot.slane %v979_v9, %v1074_v42 }
 0x11b   :  { %v840_v20 = vsel %vm832_vm2, %v647_v5, %v775_v10  ;;  %v658_v24 = vrot.slane %v657_v12, 2  ;;  %v669_v19 = vsel %vm591_vm1, %v1120_v4, 0.0  ;;  %v890_v62 = vrot.slane %v882_v55, %v1095_v39 }
 0x11c   :  { %v883_v21 = vcombine.low %v839_v54, %v840_v20  ;;  %v782_v18 = vadd.f32 %v781_v14, %v780_v6  ;;  %v785_v26 = vadd.f32 %v784_v7, %v783_v13  ;;  %v570_v53 = vcombine.low %v1178_v1, %v1187_v63 }
 0x11d   :  { %v659_v25 = vadd.f32 %v658_v24, %v657_v12  ;;  %v670_v27 = vrot.slane %v669_v19, 4  ;;  %v654_v29 = vadd.f32 %v653_v11, %v652_v58  ;;  %v795_v30 = vrot.slane %v794_v16, 1 }
 0x11e   :  { %v897_v28 = vrot.slane %v883_v21, %v1095_v39  ;;  %v715_v31 = vmul.f32 %v1120_v4, %v1120_v4  ;;  %v667_v32 = vrot.slane %v666_v15, 1  ;;  %v786_v33 = vrot.slane %v785_v26, 2 }
 0x11f   :  { %v671_v34 = vadd.f32 %v670_v27, %v669_v19  ;;  %v841_v35 = vsel %vm832_vm2, %v654_v29, %v782_v18  ;;  %v676_v40 = vsel %vm591_vm1, %v1134_v36, 0.0  ;;  %v660_v41 = vrot.slane %v659_v25, 1 }
 0x120   :  { %v898_v17 = vcombine.low %v890_v62, %v897_v28  ;;  %v797_v37 = vsel %vm591_vm1, %v715_v31, 0.0  ;;  %v787_v43 = vadd.f32 %v786_v33, %v785_v26  ;;  %v796_v4 = vadd.f32 %v795_v30, %v794_v16 }
 0x121   :  { %v672_v46 = vrot.slane %v671_v34, 2  ;;  %v798_v48 = vrot.slane %v797_v37, 4  ;;  %v677_v49 = vrot.slane %v676_v40, 4  ;;  %v716_v50 = vmul.f32 %v1134_v36, %v1134_v36 }
 0x122   :  { %938 = vst [vmem:[%s1256_s3 + $0x8] sm:$0xff] %v898_v17  ;;  %v718_v51 = vmul.f32 %v1136_v44, %v1136_v44  ;;  %v788_v22 = vrot.slane %v787_v43, 1  ;;  %v690_v47 = vsel %vm591_vm1, %v1136_v44, 0.0  ;;  %v980_v52 = vpack.c.bf16 %v1138_v45, %v1134_v36 }
 0x123   :  { %v673_v55 = vadd.f32 %v672_v46, %v671_v34  ;;  %v799_v38 = vadd.f32 %v798_v48, %v797_v37  ;;  %v678_v56 = vadd.f32 %v677_v49, %v676_v40  ;;  %v804_v57 = vsel %vm591_vm1, %v716_v50, 0.0 }
 0x124   :  { %v818_v58 = vsel %vm591_vm1, %v718_v51, 0.0  ;;  %v661_v54 = vadd.f32 %v660_v41, %v659_v25  ;;  %v789_v59 = vadd.f32 %v788_v22, %v787_v43  ;;  %v805_v61 = vrot.slane %v804_v57, 4 }
 0x125   :  { %v800_v60 = vrot.slane %v799_v38, 2  ;;  %v674_v0 = vrot.slane %v673_v55, 1  ;;  %v679_v2 = vrot.slane %v678_v56, 2  ;;  %v691_v3 = vrot.slane %v690_v47, 4 }
 0x126   :  { %v819_v5 = vrot.slane %v818_v58, 4  ;;  %v842_v6 = vsel %vm832_vm2, %v661_v54, %v789_v59  ;;  %v806_v9 = vadd.f32 %v805_v61, %v804_v57  ;;  %v668_v10 = vadd.f32 %v667_v32, %v666_v15 }
 0x127   :  { %v801_v8 = vadd.f32 %v800_v60, %v799_v38  ;;  %v899_v11 = vcombine.low %v841_v35, %v842_v6  ;;  %v683_v36 = vsel %vm591_vm1, %v1138_v45, 0.0  ;;  %v717_v16 = vmul.f32 %v1138_v45, %v1138_v45 }
 0x128   :  { %v820_v12 = vadd.f32 %v819_v5, %v818_v58  ;;  %v807_v14 = vrot.slane %v806_v9, 2  ;;  %v843_v7 = vsel %vm832_vm2, %v668_v10, %v796_v4  ;;  %v675_v20 = vadd.f32 %v674_v0, %v673_v55 }
 0x129   :  { %v802_v13 = vrot.slane %v801_v8, 1  ;;  %v680_v24 = vadd.f32 %v679_v2, %v678_v56  ;;  %v692_v19 = vadd.f32 %v691_v3, %v690_v47  ;;  %v684_v18 = vrot.slane %v683_v36, 4 }
 0x12a   :  { %v808_v21 = vadd.f32 %v807_v14, %v806_v9  ;;  %v811_v15 = vsel %vm591_vm1, %v717_v16, 0.0  ;;  %v821_v25 = vrot.slane %v820_v12, 2  ;;  %v562_v26 = vrot.slane %v980_v52, %v1074_v42 }
 0x12b   :  { %v803_v62 = vadd.f32 %v802_v13, %v801_v8  ;;  %v812_v27 = vrot.slane %v811_v15, 4  ;;  %v685_v30 = vadd.f32 %v684_v18, %v683_v36  ;;  %v981_v45 = vpack.c.bf16 %v1142_v23, %v1136_v44 }
 0x12c   :  { %v809_v29 = vrot.slane %v808_v21, 1  ;;  %v907_v31 = vrot.slane %v899_v11, %v1095_v39  ;;  %v693_v33 = vrot.slane %v692_v19, 2  ;;  %v681_v17 = vrot.slane %v680_v24, 1 }
 0x12d   :  { %v844_v28 = vsel %vm832_vm2, %v675_v20, %v803_v62  ;;  %v813_v34 = vadd.f32 %v812_v27, %v811_v15  ;;  %v686_v35 = vrot.slane %v685_v30, 2  ;;  %v569_v37 = vrot.slane %v981_v45, %v1074_v42 }
 0x12e   :  { %v900_v32 = vcombine.low %v843_v7, %v844_v28  ;;  %v697_v40 = vsel %vm591_vm1, %v1142_v23, 0.0  ;;  %v822_v43 = vadd.f32 %v821_v25, %v820_v12  ;;  %v810_v4 = vadd.f32 %v809_v29, %v808_v21 }
 0x12f   :  { %v814_v46 = vrot.slane %v813_v34, 2  ;;  %v698_v48 = vrot.slane %v697_v40, 4  ;;  %v687_v49 = vadd.f32 %v686_v35, %v685_v30  ;;  %v571_v44 = vcombine.low %v562_v26, %v569_v37 }
 0x130   :  { %v914_v41 = vrot.slane %v900_v32, %v1095_v39  ;;  %v719_v50 = vmul.f32 %v1142_v23, %v1142_v23  ;;  %v578_v51 = vrot.slane %v570_v53, %v1074_v42  ;;  %v682_v47 = vadd.f32 %v681_v17, %v680_v24 }
 0x131   :  { %v815_v55 = vadd.f32 %v814_v46, %v813_v34  ;;  %v699_v38 = vadd.f32 %v698_v48, %v697_v40  ;;  %v688_v56 = vrot.slane %v687_v49, 1  ;;  %v585_v57 = vrot.slane %v571_v44, %v1074_v42 }
 0x132   :  { %v915_v22 = vcombine.low %v907_v31, %v914_v41  ;;  %v825_v58 = vsel %vm591_vm1, %v719_v50, 0.0  ;;  %v694_v52 = vadd.f32 %v693_v33, %v692_v19  ;;  %v845_v1 = vsel %vm832_vm2, %v682_v47, %v810_v4 }
 0x133   :  { %v816_v23 = vrot.slane %v815_v55, 1  ;;  %v700_v54 = vrot.slane %v699_v38, 2  ;;  %v826_v59 = vrot.slane %v825_v58, 4  ;;  %v823_v63 = vrot.slane %v822_v43, 1 }
 0x134   :  { %939 = vst [vmem:[%s1256_s3 + $0x10] sm:$0xff] %v915_v22  ;;  %v586_v53 = vcombine.low %v578_v51, %v585_v57  ;;  %v689_v60 = vadd.f32 %v688_v56, %v687_v49  ;;  %v695_v42 = vrot.slane %v694_v52, 1 }
 0x135   :  { %v817_v61 = vadd.f32 %v816_v23, %v815_v55  ;;  %v701_v0 = vadd.f32 %v700_v54, %v699_v38  ;;  %v827_v2 = vadd.f32 %v826_v59, %v825_v58  ;;  %v824_v8 = vadd.f32 %v823_v63, %v822_v43 }
 0x136   :  { %590 = vst [vmem:[%s1255_s2 + $0x8] sm:$0xff] %v586_v53  ;;  %v696_v11 = vadd.f32 %v695_v42, %v694_v52 }
 0x137   :  { %v846_v3 = vsel %vm832_vm2, %v689_v60, %v817_v61  ;;  %v828_v5 = vrot.slane %v827_v2, 2  ;;  %v702_v9 = vrot.slane %v701_v0, 1 }
 0x138   :  { %v916_v6 = vcombine.low %v845_v1, %v846_v3  ;;  %v847_v13 = vsel %vm832_vm2, %v696_v11, %v824_v8 }
 0x139   :  { %v829_v10 = vadd.f32 %v828_v5, %v827_v2  ;;  %v703_v14 = vadd.f32 %v702_v9, %v701_v0 }
 0x13a   :  { %v924_v7 = vrot.slane %v916_v6, %v1095_v39 }
 0x13b   :  { %v830_v12 = vrot.slane %v829_v10, 1 }
 0x13d   :  { %v831_v36 = vadd.f32 %v830_v12, %v829_v10 }
 0x13f   :  { %v848_v16 = vsel %vm832_vm2, %v703_v14, %v831_v36 }
 0x140   :  { %v917_v20 = vcombine.low %v847_v13, %v848_v16 }
 0x142   :  { %v931_v24 = vrot.slane %v917_v20, %v1095_v39 }
 0x144   :  { %v932_v19 = vcombine.low %v924_v7, %v931_v24 }
 0x146   :  { %940 = vst [vmem:[%s1256_s3 + $0x18] sm:$0xff] %v932_v19 }
 0x147   :  { %949 = vsyncpa [#allocation3], 1 }

// kernel: _forward_impl.10
= control target key start
LH: loop header
LB: loop body
LE: loop exit
PB: predicated region body
PF: predicated region fallthrough
CT: control target
= control target key end

     0   :  { %v24_v0 = vlaneseq  ;;  %v548_v3 = vmov 1983009808   ;;  %v549_v6 = vmov 1966171168   ;;  %s693_s0 = inlined_call_operand.vmem [shape: bf16[2,2048], index: 0, kind: input, shape index: {}]   ;;  %s694_s1 = inlined_call_operand.vmem [shape: f32[1,2048], index: 1, kind: input, shape index: {}]   ;;  %s695_s2 = inlined_call_operand.vmem [shape: f32[1,2048], index: 2, kind: input, shape index: {}]   ;;  %s696_s3 = inlined_call_operand.vmem [shape: bf16[2,2048], index: 3, kind: output, shape index: {}]  }
   0x1   :  { %v573_v1 = vld [vmem:[%s693_s0] sm:$0xff]  ;;  %v578_v2 = vld [vmem:[%s693_s0 + $0x8] sm:$0xff]  ;;  %v91_v4 = vunpack.c.l.s4 %v548_v3  ;;  %v582_v7 = vunpack.c.l.s4 %v549_v6 }
   0x2   :  { %v580_v5 = vshrl.u32 %v24_v0, 7  ;;  %v16_v8 = vunpack.c.l.bf16 %v573_v1  ;;  %v17_v9 = vunpack.c.h.bf16 %v573_v1  ;;  %v18_v10 = vunpack.c.l.bf16 %v578_v2  ;;  %v20_v11 = vld [vmem:[%s694_s1] sm:$0xff]  ;;  %v21_v17 = vld [vmem:[%s694_s1 + $0x8] sm:$0xff] }
   0x3   :  { %v92_v12 = vunpack.c.0.s8 %v91_v4  ;;  %v164_v46 = vld [vmem:[%s695_s2] sm:$0xff]  ;;  %v19_v55 = vunpack.c.h.bf16 %v578_v2  ;;  %v165_v61 = vld [vmem:[%s695_s2 + $0x8] sm:$0xff] }
   0x4   :  { %v591_v13 = vsub.s32 0, %v580_v5  ;;  %v594_v14 = vsub.s32 1, %v580_v5  ;;  %v597_v15 = vsub.s32 2, %v580_v5  ;;  %v600_v16 = vsub.s32 3, %v580_v5 }
   0x5   :  { %v606_v18 = vsub.s32 4, %v580_v5  ;;  %v609_v19 = vsub.s32 5, %v580_v5  ;;  %v612_v20 = vsub.s32 6, %v580_v5  ;;  %v615_v21 = vsub.s32 7, %v580_v5 }
   0x6   :  { %v27_v22 = vrot.slane %v20_v11, %v591_v13  ;;  %v31_v23 = vrot.slane %v20_v11, %v594_v14  ;;  %v35_v24 = vrot.slane %v20_v11, %v597_v15  ;;  %v39_v25 = vrot.slane %v20_v11, %v600_v16 }
   0x7   :  { %v43_v26 = vrot.slane %v20_v11, %v606_v18  ;;  %v47_v27 = vrot.slane %v20_v11, %v609_v19  ;;  %v51_v28 = vrot.slane %v20_v11, %v612_v20  ;;  %v55_v29 = vrot.slane %v20_v11, %v615_v21 }
   0x8   :  { %v59_v30 = vrot.slane %v21_v17, %v591_v13  ;;  %v63_v31 = vrot.slane %v21_v17, %v594_v14  ;;  %v67_v32 = vrot.slane %v21_v17, %v597_v15  ;;  %v71_v33 = vrot.slane %v21_v17, %v600_v16 }
   0x9   :  { %v75_v34 = vrot.slane %v21_v17, %v606_v18  ;;  %v79_v35 = vrot.slane %v21_v17, %v609_v19  ;;  %v83_v36 = vrot.slane %v21_v17, %v612_v20  ;;  %v87_v37 = vrot.slane %v21_v17, %v615_v21 }
   0xa   :  { %v88_v38 = vcombine.low %v27_v22, %v31_v23  ;;  %v89_v39 = vcombine.low %v35_v24, %v39_v25  ;;  %v634_v40 = vsub.s32 %v92_v12, %v580_v5  ;;  %v105_v41 = vcombine.low %v43_v26, %v47_v27 }
   0xb   :  { %v106_v42 = vcombine.low %v51_v28, %v55_v29  ;;  %v122_v43 = vcombine.low %v59_v30, %v63_v31  ;;  %v123_v44 = vcombine.low %v67_v32, %v71_v33  ;;  %v139_v45 = vcombine.low %v75_v34, %v79_v35 }
   0xc   :  { %v96_v47 = vrot.slane %v88_v38, %v634_v40  ;;  %v103_v48 = vrot.slane %v89_v39, %v634_v40  ;;  %v113_v49 = vrot.slane %v105_v41, %v634_v40  ;;  %v140_v50 = vcombine.low %v83_v36, %v87_v37 }
   0xd   :  { %v120_v51 = vrot.slane %v106_v42, %v634_v40  ;;  %v130_v52 = vrot.slane %v122_v43, %v634_v40  ;;  %v137_v53 = vrot.slane %v123_v44, %v634_v40  ;;  %v147_v54 = vrot.slane %v139_v45, %v634_v40 }
   0xe   :  { %v104_v56 = vcombine.low %v96_v47, %v103_v48  ;;  %v154_v57 = vrot.slane %v140_v50, %v634_v40  ;;  %v171_v58 = vrot.slane %v164_v46, %v591_v13  ;;  %v175_v62 = vrot.slane %v164_v46, %v594_v14 }
   0xf   :  { %v121_v59 = vcombine.low %v113_v49, %v120_v51  ;;  %v138_v60 = vcombine.low %v130_v52, %v137_v53  ;;  %v179_v63 = vrot.slane %v164_v46, %v597_v15  ;;  %v183_v1 = vrot.slane %v164_v46, %v600_v16 }
  0x10   :  { %v155_v0 = vcombine.low %v147_v54, %v154_v57  ;;  %v187_v3 = vrot.slane %v164_v46, %v606_v18  ;;  %v191_v4 = vrot.slane %v164_v46, %v609_v19  ;;  %v160_v6 = vmul.f32 %v104_v56, %v16_v8 }
  0x11   :  { %v161_v11 = vmul.f32 %v121_v59, %v17_v9  ;;  %v195_v12 = vrot.slane %v164_v46, %v612_v20  ;;  %v199_v17 = vrot.slane %v164_v46, %v615_v21  ;;  %v162_v22 = vmul.f32 %v138_v60, %v18_v10 }
  0x12   :  { %v203_v23 = vrot.slane %v165_v61, %v591_v13  ;;  %v207_v24 = vrot.slane %v165_v61, %v594_v14  ;;  %v211_v25 = vrot.slane %v165_v61, %v597_v15  ;;  %v215_v26 = vrot.slane %v165_v61, %v600_v16 }
  0x13   :  { %v219_v27 = vrot.slane %v165_v61, %v606_v18  ;;  %v223_v8 = vrot.slane %v165_v61, %v609_v19  ;;  %v227_v9 = vrot.slane %v165_v61, %v612_v20  ;;  %v231_v28 = vrot.slane %v165_v61, %v615_v21 }
  0x14   :  { %v232_v29 = vcombine.low %v171_v58, %v175_v62  ;;  %v233_v30 = vcombine.low %v179_v63, %v183_v1  ;;  %v249_v2 = vcombine.low %v187_v3, %v191_v4  ;;  %v250_v10 = vcombine.low %v195_v12, %v199_v17 }
  0x15   :  { %v266_v31 = vcombine.low %v203_v23, %v207_v24  ;;  %v267_v13 = vcombine.low %v211_v25, %v215_v26  ;;  %v283_v32 = vcombine.low %v219_v27, %v223_v8  ;;  %v284_v18 = vcombine.low %v227_v9, %v231_v28 }
  0x16   :  { %v240_v14 = vrot.slane %v232_v29, %v634_v40  ;;  %v247_v15 = vrot.slane %v233_v30, %v634_v40  ;;  %v257_v16 = vrot.slane %v249_v2, %v634_v40  ;;  %v264_v19 = vrot.slane %v250_v10, %v634_v40 }
  0x17   :  { %v274_v20 = vrot.slane %v266_v31, %v634_v40  ;;  %v281_v21 = vrot.slane %v267_v13, %v634_v40  ;;  %v291_v33 = vrot.slane %v283_v32, %v634_v40  ;;  %v163_v34 = vmul.f32 %v155_v0, %v19_v55 }
  0x18   :  { %v248_v35 = vcombine.low %v240_v14, %v247_v15  ;;  %v298_v36 = vrot.slane %v284_v18, %v634_v40  ;;  %v265_v37 = vcombine.low %v257_v16, %v264_v19  ;;  %v438_v42 = vunpack.c.0.s8 %v582_v7 }
  0x19   :  { %v282_v38 = vcombine.low %v274_v20, %v281_v21 }
  0x1a   :  { %v299_v39 = vcombine.low %v291_v33, %v298_v36  ;;  %v304_v41 = vadd.f32 %v248_v35, %v160_v6  ;;  %v305_v43 = vadd.f32 %v265_v37, %v161_v11  ;;  %v441_v52 = vsub.s32 %v438_v42, %v580_v5 }
  0x1b   :  { %v306_v44 = vadd.f32 %v282_v38, %v162_v22 }
  0x1c   :  { %v307_v45 = vadd.f32 %v299_v39, %v163_v34  ;;  %v308_v46 = vmax.f32 %v304_v41, 0.0  ;;  %v309_v47 = vmax.f32 %v305_v43, 0.0 }
  0x1d   :  { %v310_v48 = vmax.f32 %v306_v44, 0.0 }
  0x1e   :  { %v311_v49 = vmax.f32 %v307_v45, 0.0  ;;  %v316_v50 = vcombine.high %v308_v46, %v308_v46  ;;  %v323_v51 = vrot.slane %v308_v46, %v634_v40  ;;  %v333_v53 = vcombine.high %v309_v47, %v309_v47 }
  0x1f   :  { %v340_v54 = vrot.slane %v309_v47, %v634_v40  ;;  %v350_v55 = vcombine.high %v310_v48, %v310_v48  ;;  %v357_v56 = vrot.slane %v310_v48, %v634_v40 }
  0x20   :  { %v330_v7 = vrot.slane %v316_v50, %v634_v40  ;;  %v331_v57 = vcombine.high %v323_v51, %v323_v51  ;;  %v367_v58 = vcombine.high %v311_v49, %v311_v49  ;;  %v374_v59 = vrot.slane %v311_v49, %v634_v40 }
  0x21   :  { %v347_v60 = vrot.slane %v333_v53, %v634_v40  ;;  %v348_v61 = vcombine.high %v340_v54, %v340_v54  ;;  %v364_v62 = vrot.slane %v350_v55, %v634_v40  ;;  %v365_v63 = vcombine.high %v357_v56, %v357_v56 }
  0x22   :  { %v332_v0 = vcombine.high %v330_v7, %v330_v7  ;;  %v381_v5 = vrot.slane %v367_v58, %v634_v40  ;;  %v382_v1 = vcombine.high %v374_v59, %v374_v59  ;;  %v538_v3 = vpack.c.bf16 %v331_v57, %v323_v51 }
  0x23   :  { %v349_v4 = vcombine.high %v347_v60, %v347_v60  ;;  %v366_v6 = vcombine.high %v364_v62, %v364_v62  ;;  %v540_v11 = vpack.c.bf16 %v348_v61, %v340_v54  ;;  %v542_v12 = vpack.c.bf16 %v365_v63, %v357_v56 }
  0x24   :  { %v383_v17 = vcombine.high %v381_v5, %v381_v5  ;;  %v539_v22 = vpack.c.bf16 %v332_v0, %v330_v7  ;;  %v442_v23 = vrot.slane %v538_v3, %v441_v52  ;;  %v544_v24 = vpack.c.bf16 %v382_v1, %v374_v59 }
  0x25   :  { %v541_v25 = vpack.c.bf16 %v349_v4, %v347_v60  ;;  %v456_v26 = vrot.slane %v540_v11, %v441_v52  ;;  %v543_v27 = vpack.c.bf16 %v366_v6, %v364_v62  ;;  %v491_v8 = vrot.slane %v542_v12, %v441_v52 }
  0x26   :  { %v449_v9 = vrot.slane %v539_v22, %v441_v52  ;;  %v545_v28 = vpack.c.bf16 %v383_v17, %v381_v5  ;;  %v505_v29 = vrot.slane %v544_v24, %v441_v52 }
  0x27   :  { %v463_v30 = vrot.slane %v541_v25, %v441_v52  ;;  %v498_v2 = vrot.slane %v543_v27, %v441_v52 }
  0x28   :  { %v464_v40 = vcombine.low %v442_v23, %v449_v9  ;;  %v512_v10 = vrot.slane %v545_v28, %v441_v52 }
  0x29   :  { %v465_v31 = vcombine.low %v456_v26, %v463_v30  ;;  %v513_v13 = vcombine.low %v491_v8, %v498_v2 }
  0x2a   :  { %v472_v32 = vrot.slane %v464_v40, %v441_v52  ;;  %v514_v14 = vcombine.low %v505_v29, %v512_v10 }
  0x2b   :  { %v479_v15 = vrot.slane %v465_v31, %v441_v52  ;;  %v521_v16 = vrot.slane %v513_v13, %v441_v52 }
  0x2c   :  { %v528_v18 = vrot.slane %v514_v14, %v441_v52 }
  0x2d   :  { %v480_v19 = vcombine.low %v472_v32, %v479_v15 }
  0x2e   :  { %v529_v20 = vcombine.low %v521_v16, %v528_v18 }
  0x2f   :  { %532 = vst [vmem:[%s696_s3] sm:$0xff] %v480_v19 }
  0x30   :  { %533 = vst [vmem:[%s696_s3 + $0x8] sm:$0xff] %v529_v20 }

// kernel: tile.58
= control target key start
LH: loop header
LB: loop body
LE: loop exit
PB: predicated region body
PF: predicated region fallthrough
CT: control target
= control target key end

     0   :  { %s22_s0 = inlined_call_operand.vmem [shape: f32[64], index: 0, kind: input, shape index: {}]   ;;  %s23_s1 = inlined_call_operand.vmem [shape: f32[4,64], index: 1, kind: output, shape index: {}]  }
   0x1   :  { %v4_v0 = vld [vmem:[%s22_s0] ss:$0 sm:$0xff] }
   0x2   :  { %5 = vst [vmem:[%s23_s1] sm:$0xf] %v4_v0 }

// kernel: _forward_impl.12
= control target key start
LH: loop header
LB: loop body
LE: loop exit
PB: predicated region body
PF: predicated region fallthrough
CT: control target
= control target key end

     0   :  { %s348_s12 = smov 0   ;;  %s374_s0 = inlined_call_operand.vmem [shape: bf16[32,256], index: 0, kind: input, shape index: {}]   ;;  %s375_s1 = inlined_call_operand.vmem [shape: f32[1,256], index: 1, kind: input, shape index: {}]   ;;  %s376_s2 = inlined_call_operand.vmem [shape: f32[1,256], index: 2, kind: input, shape index: {}]   ;;  %s377_s3 = inlined_call_operand.vmem [shape: bf16[32,256], index: 3, kind: output, shape index: {}]  }
   0x1 LB: > { %s293_s13 = sadd.s32 4294967295, %s326_s12   ;;  %p297_p0 = scmp.ge.s32.totalorder %s326_s12, 1  ;;  %s326_s12 = sphi %s348_s12, %s13_s12  }
   0x2   : > { %p139_p1 = scmp.lt.s32.totalorder %s326_s12, 3 }
   0x4   : > { %p140_p2 = pnand %p297_p0, %p139_p1 }
   0x5   : > { %s298_s14 = sshll.u32 (!%p140_p2), %s293_s13, 1  ;;  %v187_v0 = vlaneseq (!%p140_p2)  ;;  %v185_v2 = vld [vmem:[%s375_s1] sm:$0x3] (!%p140_p2) }
   0x6   : > { %143 = sbr.rel (%p140_p2) target bundleno = 28 (0x1c), region = 32  ;;  %p166_p3 = scmp.lt.s32.totalorder (!%p140_p2), %s298_s14, 3  ;;  %v201_v5 = vld [vmem:[%s376_s2] sm:$0x3] (!%p140_p2) }
   0x7   : > { %v188_v1 = vshrl.u32 (!%p140_p2), %v187_v0, 7 }
   0x9   : > { %v189_v3 = vsub.s32 (!%p140_p2), 0, %v188_v1  ;;  %v193_v4 = vsub.s32 (!%p140_p2), 1, %v188_v1 }
   0xb   : > { %v190_v6 = vrot.slane (!%p140_p2), %v185_v2, %v189_v3  ;;  %v194_v7 = vrot.slane (!%p140_p2), %v185_v2, %v193_v4  ;;  %v206_v10 = vrot.slane (!%p140_p2), %v201_v5, %v189_v3  ;;  %v210_v11 = vrot.slane (!%p140_p2), %v201_v5, %v193_v4 }
   0xd   : > { %s379_s14 = smov (!%p166_p3, %s298_s14), 3 }
   0xe   : > { %s308_s19 = sshll.u32 %s379_s14, 3 }
   0xf   : > { %s170_s22 = scalar_lea.vmem %s374_s0, %s308_s19  ;;  %s177_s25 = scalar_lea.vmem %s377_s3, %s308_s19 }
  0x10   : > { %v179_v8 = vld [vmem:[%s170_s22] sm:$0xff]  ;;  %v180_v9 = vld [vmem:[%s170_s22 + $0x8] sm:$0xff] }
  0x11   : > { %v181_v12 = vunpack.c.l.bf16 %v179_v8  ;;  %v182_v13 = vunpack.c.h.bf16 %v179_v8  ;;  %v183_v14 = vunpack.c.l.bf16 %v180_v9  ;;  %v184_v15 = vunpack.c.h.bf16 %v180_v9 }
  0x13   : > { %v197_v16 = vmul.f32 %v190_v6, %v181_v12  ;;  %v198_v17 = vmul.f32 %v194_v7, %v182_v13  ;;  %v199_v18 = vmul.f32 %v190_v6, %v183_v14  ;;  %v200_v19 = vmul.f32 %v194_v7, %v184_v15 }
  0x15   : > { %v213_v20 = vadd.f32 %v206_v10, %v197_v16  ;;  %v214_v21 = vadd.f32 %v210_v11, %v198_v17  ;;  %v215_v22 = vadd.f32 %v206_v10, %v199_v18  ;;  %v216_v23 = vadd.f32 %v210_v11, %v200_v19 }
  0x17   : > { %v217_v24 = vmax.f32 %v213_v20, 0.0  ;;  %v218_v25 = vmax.f32 %v214_v21, 0.0  ;;  %v219_v26 = vmax.f32 %v215_v22, 0.0  ;;  %v220_v27 = vmax.f32 %v216_v23, 0.0 }
  0x19   : > { %v310_v28 = vpack.c.bf16 %v218_v25, %v217_v24  ;;  %v311_v29 = vpack.c.bf16 %v220_v27, %v219_v26 }
  0x1b   : > { %233 = vst [vmem:[%s177_s25] sm:$0xff] %v310_v28  ;;  %234 = vst [vmem:[%s177_s25 + $0x8] sm:$0xff] %v311_v29 }
  0x1c PF: > { %s13_s12 = sadd.s32 1, %s326_s12  }
  0x1d   : > { %p10_p4 = scmp.ge.s32.totalorder %s13_s12, 4  }
  0x1f   :  { %12 = sbr.rel (!%p10_p4) target bundleno = 1 (0x1), region = 62 }

// kernel: _forward_impl.11
= control target key start
LH: loop header
LB: loop body
LE: loop exit
PB: predicated region body
PF: predicated region fallthrough
CT: control target
= control target key end

     0   :  { %9 = vsyncpa [#allocation3], 0  ;;  %s2015_s12 = smov 0   ;;  %s2090_s0 = inlined_call_operand.vmem [shape: bf16[32,1152], index: 0, kind: input, shape index: {}]   ;;  %s2091_s1 = inlined_call_operand.hbm [shape: bf16[1152,256], index: 1, kind: input, shape index: {}]   ;;  %s2092_s2 = inlined_call_operand.vmem [shape: bf16[32,256], index: 2, kind: output, shape index: {0}]   ;;  %s2093_s3 = inlined_call_operand.vmem [shape: f32[2,2,256], index: 3, kind: output, shape index: {1}]  }
   0x1 LB: > { %s2021_s13 = sadd.s32 4294967295, %s1989_s12   ;;  %p1509_p0 = scmp.ge.s32.totalorder %s1989_s12, 1  ;;  %s1989_s12 = sphi %s2015_s12, %s15_s12  }
   0x2   : > { %p119_p1 = scmp.lt.s32.totalorder %s1989_s12, 3  ;;  %s1991_s14 = smov [#allocation2]  }
   0x3   : > { %s131_s15 = sshll.u32 %s1991_s14, 4  ;;  %p2094_p3 = scmp.eq.s32.totalorder %s2021_s13, 0  ;;  %s132_s15 = int_to_ptr.vmem [resolvable:$true] %s131_s15 }
   0x4   : > { %p2025_p2 = pnand %p1509_p0, %p119_p1  ;;  %s1951_s20 = scalar_lea.hbm %s2091_s1, 18432 }
   0x5   : > { %p1952_p6 = scmp.ne.s32.totalorder %s2091_s1, %s1951_s20  ;;  %p1958_p10 = scmp.lt.u32.totalorder %s1951_s20, %s2091_s1 }
   0x6   : > { %s2096_s16 = scalar_select %p2025_p2, 1, 0 }
   0x7   : > { %p1704_p4 = pneg %p2025_p2 }
   0x9   : > { %p2034_p5 = pnand %p2094_p3, %p1704_p4 }
   0xb   : > { %p1953_p7 = pneg %p2034_p5 }
   0xd   : > { %p1954_p8 = pnand %p1953_p7, %p1952_p6 }
   0xf   : > { %p1955_p9 = pneg %p1954_p8 }
  0x11   : > { %p1960_p11 = pnand %p1958_p10, %p1955_p9 }
  0x13   : > { %1963 = shalt.err (!%p1960_p11)
}
  0x14   : > { %s1964_s25 = scalar_lea.vmem %s132_s15, 18432  ;;  %p1972_p1 = scmp.lt.s32.totalorder %s132_s15, %s132_s15 }
  0x15   : > { %p1965_p12 = scmp.ne.s32.totalorder %s132_s15, %s1964_s25  ;;  %p1973_p4 = scmp.lt.s32.totalorder %s1964_s25, %s1964_s25 }
  0x17   : > { %p1967_p13 = pnand %p1965_p12, %p1953_p7  ;;  %p1974_p3 = por %p1973_p4, %p1972_p1 }
  0x19   : > { %p1968_p0 = pneg %p1967_p13 }
  0x1b   : > { %p1975_p2 = pnand %p1974_p3, %p1968_p0 }
  0x1d   : > { %1978 = shalt.err (!%p1975_p2)
}
  0x1e   : > { %s1992_s26 = smov 128   ;;  %s1993_s27 = smov 8  }
  0x1f   : > { %1707 = dma.hbm_to_vmem [thread:$0]  (!%p2034_p5), %s2091_s1, 18432, %s132_s15, [#allocation3], %s1992_s26, %s1992_s26, %s1993_s27  }
  0x20   : > { %p2098_p6 = scmp.ne.s32.totalorder %s2096_s16, 0 }
  0x21   : > { %p2099_p8 = scmp.eq.s32.totalorder (!%p2098_p6), %s2021_s13, 0 }
  0x22   : > { %157 = sbr.rel (%p2098_p6) target bundleno = 441 (0x1b9), region = 28 }
  0x29   : > { %1984 = dma.done.wait (%p2099_p8), [#allocation3], 18432   ;;  %p2100_p7 = pmov %p2099_p8 }
  0x2a   : > { %v1722_v0 = vld [vmem:[#allocation2 + $0x4] ss:$8 sps:$4 sm:$0xff]   ;;  %v1726_v2 = vld [vmem:[#allocation2] ss:$8 sps:$4 sm:$0xff]   ;;  %v1728_v4 = vld [vmem:[#allocation2 + $0x14] ss:$8 sps:$4 sm:$0xff]  }
  0x2b   : > { %1986 = vsyncadd (%p2100_p7), [#allocation3], 4294948864  ;;  %v1724_v1 = vld [vmem:[#allocation2 + $0x204] ss:$8 sps:$4 sm:$0xff]   ;;  %1128 = vmatprep.subr.bf16.mxu1 %v1722_v0  ;;  %v1727_v3 = vld [vmem:[#allocation2 + $0x200] ss:$8 sps:$4 sm:$0xff]  }
  0x2c   : > { %1214 = vmatprep.subr.bf16.mxu0 %v1724_v1  ;;  %1129 = vmatpush1.bf16.msra.mxu1 %v1726_v2  ;;  %v1730_v5 = vld [vmem:[#allocation2 + $0x214] ss:$8 sps:$4 sm:$0xff]   ;;  %v1732_v6 = vld [vmem:[#allocation2 + $0x10] ss:$8 sps:$4 sm:$0xff]   ;;  %v1734_v8 = vld [vmem:[#allocation2 + $0x24] ss:$8 sps:$4 sm:$0xff]  }
  0x2d   : > { %1215 = vmatpush1.bf16.msra.mxu0 %v1727_v3  ;;  %1130 = vmatprep.subr.bf16.mxu1 %v1728_v4  ;;  %v1733_v7 = vld [vmem:[#allocation2 + $0x210] ss:$8 sps:$4 sm:$0xff]   ;;  %v1736_v9 = vld [vmem:[#allocation2 + $0x224] ss:$8 sps:$4 sm:$0xff]   ;;  %v1738_v10 = vld [vmem:[#allocation2 + $0x20] ss:$8 sps:$4 sm:$0xff]  }
  0x2e   : > { %1216 = vmatprep.subr.bf16.mxu0 %v1730_v5  ;;  %v1739_v11 = vld [vmem:[#allocation2 + $0x220] ss:$8 sps:$4 sm:$0xff]   ;;  %v1740_v12 = vld [vmem:[#allocation2 + $0x34] ss:$8 sps:$4 sm:$0xff]   ;;  %v1744_v14 = vld [vmem:[#allocation2 + $0x30] ss:$8 sps:$4 sm:$0xff]  }
  0x2f   : > { %v1742_v13 = vld [vmem:[#allocation2 + $0x234] ss:$8 sps:$4 sm:$0xff]   ;;  %v1745_v15 = vld [vmem:[#allocation2 + $0x230] ss:$8 sps:$4 sm:$0xff]   ;;  %v1746_v16 = vld [vmem:[#allocation2 + $0x44] ss:$8 sps:$4 sm:$0xff]  }
  0x30   : > { %1131 = vmatpush1.bf16.msra.mxu1 %v1732_v6  ;;  %v1748_v17 = vld [vmem:[#allocation2 + $0x244] ss:$8 sps:$4 sm:$0xff]   ;;  %v1750_v18 = vld [vmem:[#allocation2 + $0x40] ss:$8 sps:$4 sm:$0xff]   ;;  %v1752_v20 = vld [vmem:[#allocation2 + $0x54] ss:$8 sps:$4 sm:$0xff]  }
  0x31   : > { %1217 = vmatpush1.bf16.msra.mxu0 %v1733_v7  ;;  %1132 = vmatprep.subr.bf16.mxu1 %v1734_v8  ;;  %v1751_v19 = vld [vmem:[#allocation2 + $0x240] ss:$8 sps:$4 sm:$0xff]   ;;  %v1754_v21 = vld [vmem:[#allocation2 + $0x254] ss:$8 sps:$4 sm:$0xff]   ;;  %v1756_v22 = vld [vmem:[#allocation2 + $0x50] ss:$8 sps:$4 sm:$0xff]  }
  0x32   : > { %1218 = vmatprep.subr.bf16.mxu0 %v1736_v9  ;;  %v1757_v23 = vld [vmem:[#allocation2 + $0x250] ss:$8 sps:$4 sm:$0xff]   ;;  %v1758_v24 = vld [vmem:[#allocation2 + $0x64] ss:$8 sps:$4 sm:$0xff]   ;;  %v1762_v26 = vld [vmem:[#allocation2 + $0x60] ss:$8 sps:$4 sm:$0xff]  }
  0x33   : > { %v1760_v25 = vld [vmem:[#allocation2 + $0x264] ss:$8 sps:$4 sm:$0xff]   ;;  %v1763_v27 = vld [vmem:[#allocation2 + $0x260] ss:$8 sps:$4 sm:$0xff]   ;;  %v1764_v28 = vld [vmem:[#allocation2 + $0x74] ss:$8 sps:$4 sm:$0xff]  }
  0x34   : > { %1133 = vmatpush1.bf16.msra.mxu1 %v1738_v10  ;;  %v1766_v29 = vld [vmem:[#allocation2 + $0x274] ss:$8 sps:$4 sm:$0xff]   ;;  %s1514_s30 = sshll.u32 %s2021_s13, 1  ;;  %v1768_v30 = vld [vmem:[#allocation2 + $0x70] ss:$8 sps:$4 sm:$0xff]   ;;  %p202_p3 = scmp.lt.s32.totalorder %s2021_s13, 1 }
  0x35   : > { %1219 = vmatpush1.bf16.msra.mxu0 %v1739_v11  ;;  %1134 = vmatprep.subr.bf16.mxu1 %v1740_v12  ;;  %v1769_v31 = vld [vmem:[#allocation2 + $0x270] ss:$8 sps:$4 sm:$0xff]   ;;  %v1770_v32 = vld [vmem:[#allocation2 + $0x84] ss:$8 sps:$4 sm:$0xff]   ;;  %p189_p2 = scmp.lt.s32.totalorder %s1514_s30, 3  ;;  %vm1389_vm0 = vcmask 1040384  }
  0x36   : > { %1220 = vmatprep.subr.bf16.mxu0 %v1742_v13  ;;  %v1772_v33 = vld [vmem:[#allocation2 + $0x284] ss:$8 sps:$4 sm:$0xff]   ;;  %v1774_v34 = vld [vmem:[#allocation2 + $0x80] ss:$8 sps:$4 sm:$0xff]   ;;  %v1776_v36 = vld [vmem:[#allocation2 + $0x94] ss:$8 sps:$4 sm:$0xff]  }
  0x37   : > { %v1775_v35 = vld [vmem:[#allocation2 + $0x280] ss:$8 sps:$4 sm:$0xff]   ;;  %s2102_s30 = smov (!%p189_p2, %s1514_s30), 3  ;;  %v1778_v37 = vld [vmem:[#allocation2 + $0x294] ss:$8 sps:$4 sm:$0xff]   ;;  %s2104_s13 = smov (!%p202_p3, %s2021_s13), 1 }
  0x38   : > { %1135 = vmatpush1.bf16.msra.mxu1 %v1744_v14  ;;  %v1780_v38 = vld [vmem:[#allocation2 + $0x90] ss:$8 sps:$4 sm:$0xff]   ;;  %v1782_v40 = vld [vmem:[#allocation2 + $0xa4] ss:$8 sps:$4 sm:$0xff]   ;;  %s1699_s4 = smul.u32 36, %s2102_s30  ;;  %s1679_s8 = sshll.u32 %s2102_s30, 3 }
  0x39   : > { %1221 = vmatpush1.bf16.msra.mxu0 %v1745_v15  ;;  %1136 = vmatprep.subr.bf16.mxu1 %v1746_v16  ;;  %v1781_v39 = vld [vmem:[#allocation2 + $0x290] ss:$8 sps:$4 sm:$0xff]   ;;  %v1784_v41 = vld [vmem:[#allocation2 + $0x2a4] ss:$8 sps:$4 sm:$0xff]   ;;  %v1786_v42 = vld [vmem:[#allocation2 + $0xa0] ss:$8 sps:$4 sm:$0xff]   ;;  %s200_s11 = scalar_lea.vmem %s2092_s2, %s1679_s8 }
  0x3a   : > { %1222 = vmatprep.subr.bf16.mxu0 %v1748_v17  ;;  %v1787_v43 = vld [vmem:[#allocation2 + $0x2a0] ss:$8 sps:$4 sm:$0xff]   ;;  %v1788_v44 = vld [vmem:[#allocation2 + $0xb4] ss:$8 sps:$4 sm:$0xff]   ;;  %s2067_s7 = scalar_lea.vmem %s2090_s0, %s1699_s4  ;;  %v1792_v46 = vld [vmem:[#allocation2 + $0xb0] ss:$8 sps:$4 sm:$0xff]  }
  0x3b   : > { %v1790_v45 = vld [vmem:[#allocation2 + $0x2b4] ss:$8 sps:$4 sm:$0xff]   ;;  %v1793_v47 = vld [vmem:[#allocation2 + $0x2b0] ss:$8 sps:$4 sm:$0xff]   ;;  %v1820_v48 = vld [vmem:[%s2067_s7 + $0x4] ss:$36 sps:$4 sm:$0xff]  }
  0x3c   : > { %1137 = vmatpush1.bf16.msra.mxu1 %v1750_v18  ;;  %v1794_v49 = vld [vmem:[#allocation2 + $0xc4] ss:$8 sps:$4 sm:$0xff]   ;;  %1160 = vmatprep.mubr.bf16.mxu1 %v1820_v48  ;;  %v1826_v51 = vld [vmem:[%s2067_s7 + $0x14] ss:$36 sps:$4 sm:$0xff]   ;;  %v1798_v52 = vld [vmem:[#allocation2 + $0xc0] ss:$8 sps:$4 sm:$0xff]  }
  0x3d   : > { %1223 = vmatpush1.bf16.msra.mxu0 %v1751_v19  ;;  %1138 = vmatprep.subr.bf16.mxu1 %v1752_v20  ;;  %v1796_v50 = vld [vmem:[#allocation2 + $0x2c4] ss:$8 sps:$4 sm:$0xff]   ;;  %v1799_v53 = vld [vmem:[#allocation2 + $0x2c0] ss:$8 sps:$4 sm:$0xff]   ;;  %v1800_v54 = vld [vmem:[#allocation2 + $0xd4] ss:$8 sps:$4 sm:$0xff]  }
  0x3e   : > { %1224 = vmatprep.subr.bf16.mxu0 %v1754_v21  ;;  %v1802_v55 = vld [vmem:[#allocation2 + $0x2d4] ss:$8 sps:$4 sm:$0xff]   ;;  %1246 = vmatprep.mubr.bf16.mxu0 %v1826_v51  ;;  %v1804_v56 = vld [vmem:[#allocation2 + $0xd0] ss:$8 sps:$4 sm:$0xff]   ;;  %v1806_v58 = vld [vmem:[#allocation2 + $0xe4] ss:$8 sps:$4 sm:$0xff]  }
  0x3f   : > { %v1805_v57 = vld [vmem:[#allocation2 + $0x2d0] ss:$8 sps:$4 sm:$0xff]   ;;  %v1808_v59 = vld [vmem:[#allocation2 + $0x2e4] ss:$8 sps:$4 sm:$0xff]   ;;  %v1810_v60 = vld [vmem:[#allocation2 + $0xe0] ss:$8 sps:$4 sm:$0xff]  }
  0x40   : > { %1139 = vmatpush1.bf16.msra.mxu1 %v1756_v22  ;;  %v1811_v61 = vld [vmem:[#allocation2 + $0x2e0] ss:$8 sps:$4 sm:$0xff]   ;;  %v1812_v62 = vld [vmem:[#allocation2 + $0xf4] ss:$8 sps:$4 sm:$0xff]   ;;  %v1816_v0 = vld [vmem:[#allocation2 + $0xf0] ss:$8 sps:$4 sm:$0xff]  }
  0x41   : > { %1225 = vmatpush1.bf16.msra.mxu0 %v1757_v23  ;;  %1140 = vmatprep.subr.bf16.mxu1 %v1758_v24  ;;  %v1814_v63 = vld [vmem:[#allocation2 + $0x2f4] ss:$8 sps:$4 sm:$0xff]   ;;  %v1817_v1 = vld [vmem:[#allocation2 + $0x2f0] ss:$8 sps:$4 sm:$0xff]   ;;  %v1823_v2 = vld [vmem:[#allocation2 + $0x104] ss:$8 sps:$4 sm:$0xff]  }
  0x42   : > { %1226 = vmatprep.subr.bf16.mxu0 %v1760_v25  ;;  %v1829_v3 = vld [vmem:[#allocation2 + $0x304] ss:$8 sps:$4 sm:$0xff]   ;;  %v1821_v5 = vld [vmem:[#allocation2 + $0x100] ss:$8 sps:$4 sm:$0xff]   ;;  %v1824_v6 = vld [vmem:[%s2067_s7 + $0x10] ss:$36 sps:$4 sm:$0xff]  }
  0x43   : > { %v1818_v4 = vld [vmem:[%s2067_s7] ss:$36 sps:$4 sm:$0xff]   ;;  %v1832_v8 = vld [vmem:[#allocation2 + $0x114] ss:$8 sps:$4 sm:$0xff]   ;;  %v1830_v10 = vld [vmem:[#allocation2 + $0x110] ss:$8 sps:$4 sm:$0xff]  }
  0x44   : > { %1141 = vmatpush1.bf16.msra.mxu1 %v1762_v26  ;;  %v1827_v7 = vld [vmem:[#allocation2 + $0x300] ss:$8 sps:$4 sm:$0xff]   ;;  %v1835_v9 = vld [vmem:[#allocation2 + $0x314] ss:$8 sps:$4 sm:$0xff]   ;;  %v1833_v11 = vld [vmem:[#allocation2 + $0x310] ss:$8 sps:$4 sm:$0xff]  }
  0x45   : > { %1227 = vmatpush1.bf16.msra.mxu0 %v1763_v27  ;;  %1142 = vmatprep.subr.bf16.mxu1 %v1764_v28  ;;  %v1838_v12 = vld [vmem:[#allocation2 + $0x124] ss:$8 sps:$4 sm:$0xff]   ;;  %v1836_v14 = vld [vmem:[#allocation2 + $0x120] ss:$8 sps:$4 sm:$0xff]   ;;  %v1844_v16 = vld [vmem:[#allocation2 + $0x134] ss:$8 sps:$4 sm:$0xff]  }
  0x46   : > { %1228 = vmatprep.subr.bf16.mxu0 %v1766_v29  ;;  %v1841_v13 = vld [vmem:[#allocation2 + $0x324] ss:$8 sps:$4 sm:$0xff]   ;;  %v1839_v15 = vld [vmem:[#allocation2 + $0x320] ss:$8 sps:$4 sm:$0xff]   ;;  %v1847_v17 = vld [vmem:[#allocation2 + $0x334] ss:$8 sps:$4 sm:$0xff]  }
  0x47   : > { %v1842_v18 = vld [vmem:[#allocation2 + $0x130] ss:$8 sps:$4 sm:$0xff]   ;;  %v1850_v20 = vld [vmem:[#allocation2 + $0x144] ss:$8 sps:$4 sm:$0xff]   ;;  %v1848_v22 = vld [vmem:[#allocation2 + $0x140] ss:$8 sps:$4 sm:$0xff]  }
  0x48   : > { %1143 = vmatpush1.bf16.msra.mxu1 %v1768_v30  ;;  %v1845_v19 = vld [vmem:[#allocation2 + $0x330] ss:$8 sps:$4 sm:$0xff]   ;;  %v1853_v21 = vld [vmem:[#allocation2 + $0x344] ss:$8 sps:$4 sm:$0xff]   ;;  %v1851_v23 = vld [vmem:[#allocation2 + $0x340] ss:$8 sps:$4 sm:$0xff]  }
  0x49   : > { %1229 = vmatpush1.bf16.msra.mxu0 %v1769_v31  ;;  %1144 = vmatprep.subr.bf16.mxu1 %v1770_v32  ;;  %v1856_v24 = vld [vmem:[#allocation2 + $0x154] ss:$8 sps:$4 sm:$0xff]   ;;  %v1854_v26 = vld [vmem:[#allocation2 + $0x150] ss:$8 sps:$4 sm:$0xff]   ;;  %v1862_v28 = vld [vmem:[#allocation2 + $0x164] ss:$8 sps:$4 sm:$0xff]  }
  0x4a   : > { %1230 = vmatprep.subr.bf16.mxu0 %v1772_v33  ;;  %v1859_v25 = vld [vmem:[#allocation2 + $0x354] ss:$8 sps:$4 sm:$0xff]   ;;  %v1857_v27 = vld [vmem:[#allocation2 + $0x350] ss:$8 sps:$4 sm:$0xff]   ;;  %v1865_v29 = vld [vmem:[#allocation2 + $0x364] ss:$8 sps:$4 sm:$0xff]  }
  0x4b   : > { %v1860_v30 = vld [vmem:[#allocation2 + $0x160] ss:$8 sps:$4 sm:$0xff]   ;;  %v1868_v32 = vld [vmem:[#allocation2 + $0x174] ss:$8 sps:$4 sm:$0xff]   ;;  %s1680_s14 = sshll.u32 %s2104_s13, 2 }
  0x4c   : > { %1145 = vmatpush1.bf16.msra.mxu1 %v1774_v34  ;;  %v1863_v31 = vld [vmem:[#allocation2 + $0x360] ss:$8 sps:$4 sm:$0xff]   ;;  %v1871_v33 = vld [vmem:[#allocation2 + $0x374] ss:$8 sps:$4 sm:$0xff]   ;;  %v1922_v34 = vld [vmem:[%s2067_s7 + $0xc] ss:$36 sps:$4 sm:$0xff]   ;;  %s206_s17 = scalar_lea.vmem %s2093_s3, %s1680_s14 }
  0x4d   : > { %1231 = vmatpush1.bf16.msra.mxu0 %v1775_v35  ;;  %1146 = vmatprep.subr.bf16.mxu1 %v1776_v36  ;;  %v1925_v35 = vld [vmem:[%s2067_s7 + $0x1c] ss:$36 sps:$4 sm:$0xff]   ;;  %v1866_v36 = vld [vmem:[#allocation2 + $0x170] ss:$8 sps:$4 sm:$0xff]  }
  0x4e   : > { %1232 = vmatprep.subr.bf16.mxu0 %v1778_v37  ;;  %v1869_v37 = vld [vmem:[#allocation2 + $0x370] ss:$8 sps:$4 sm:$0xff]   ;;  %v1884_v48 = vld [vmem:[#allocation2 + $0x1a0] ss:$8 sps:$4 sm:$0xff]   ;;  %v1895_v51 = vld [vmem:[#allocation2 + $0x3b4] ss:$8 sps:$4 sm:$0xff]  }
  0x50   : > { %1147 = vmatpush1.bf16.msra.mxu1 %v1780_v38  ;;  %v1874_v38 = vld [vmem:[#allocation2 + $0x184] ss:$8 sps:$4 sm:$0xff]  }
  0x51   : > { %1233 = vmatpush1.bf16.msra.mxu0 %v1781_v39  ;;  %1148 = vmatprep.subr.bf16.mxu1 %v1782_v40  ;;  %v1877_v39 = vld [vmem:[#allocation2 + $0x384] ss:$8 sps:$4 sm:$0xff]   ;;  %v1872_v40 = vld [vmem:[#allocation2 + $0x180] ss:$8 sps:$4 sm:$0xff]  }
  0x52   : > { %1234 = vmatprep.subr.bf16.mxu0 %v1784_v41  ;;  %v1875_v41 = vld [vmem:[#allocation2 + $0x380] ss:$8 sps:$4 sm:$0xff]  }
  0x54   : > { %1149 = vmatpush1.bf16.msra.mxu1 %v1786_v42  ;;  %v1880_v42 = vld [vmem:[#allocation2 + $0x194] ss:$8 sps:$4 sm:$0xff]  }
  0x55   : > { %1235 = vmatpush1.bf16.msra.mxu0 %v1787_v43  ;;  %1150 = vmatprep.subr.bf16.mxu1 %v1788_v44  ;;  %v1883_v43 = vld [vmem:[#allocation2 + $0x394] ss:$8 sps:$4 sm:$0xff]   ;;  %v1878_v44 = vld [vmem:[#allocation2 + $0x190] ss:$8 sps:$4 sm:$0xff]  }
  0x56   : > { %1236 = vmatprep.subr.bf16.mxu0 %v1790_v45  ;;  %v1881_v45 = vld [vmem:[#allocation2 + $0x390] ss:$8 sps:$4 sm:$0xff]  }
  0x58   : > { %1151 = vmatpush1.bf16.msra.mxu1 %v1792_v46  ;;  %v1886_v46 = vld [vmem:[#allocation2 + $0x1a4] ss:$8 sps:$4 sm:$0xff]  }
  0x59   : > { %1237 = vmatpush1.bf16.msra.mxu0 %v1793_v47  ;;  %1152 = vmatprep.subr.bf16.mxu1 %v1794_v49  ;;  %v1889_v47 = vld [vmem:[#allocation2 + $0x3a4] ss:$8 sps:$4 sm:$0xff]   ;;  %v1887_v49 = vld [vmem:[#allocation2 + $0x3a0] ss:$8 sps:$4 sm:$0xff]  }
  0x5a   : > { %1238 = vmatprep.subr.bf16.mxu0 %v1796_v50  ;;  %v1892_v50 = vld [vmem:[#allocation2 + $0x1b4] ss:$8 sps:$4 sm:$0xff]  }
  0x5c   : > { %1153 = vmatpush1.bf16.msra.mxu1 %v1798_v52  ;;  %v1890_v52 = vld [vmem:[#allocation2 + $0x1b0] ss:$8 sps:$4 sm:$0xff]  }
  0x5d   : > { %1239 = vmatpush1.bf16.msra.mxu0 %v1799_v53  ;;  %1154 = vmatprep.subr.bf16.mxu1 %v1800_v54  ;;  %v1893_v53 = vld [vmem:[#allocation2 + $0x3b0] ss:$8 sps:$4 sm:$0xff]   ;;  %v1898_v54 = vld [vmem:[#allocation2 + $0x1c4] ss:$8 sps:$4 sm:$0xff]  }
  0x5e   : > { %1240 = vmatprep.subr.bf16.mxu0 %v1802_v55  ;;  %v1901_v55 = vld [vmem:[#allocation2 + $0x3c4] ss:$8 sps:$4 sm:$0xff]  }
  0x60   : > { %1155 = vmatpush1.bf16.msra.mxu1 %v1804_v56  ;;  %v1896_v56 = vld [vmem:[#allocation2 + $0x1c0] ss:$8 sps:$4 sm:$0xff]  }
  0x61   : > { %1241 = vmatpush1.bf16.msra.mxu0 %v1805_v57  ;;  %1156 = vmatprep.subr.bf16.mxu1 %v1806_v58  ;;  %v1899_v57 = vld [vmem:[#allocation2 + $0x3c0] ss:$8 sps:$4 sm:$0xff]   ;;  %v1904_v58 = vld [vmem:[#allocation2 + $0x1d4] ss:$8 sps:$4 sm:$0xff]  }
  0x62   : > { %1242 = vmatprep.subr.bf16.mxu0 %v1808_v59  ;;  %v1907_v59 = vld [vmem:[#allocation2 + $0x3d4] ss:$8 sps:$4 sm:$0xff]  }
  0x64   : > { %1157 = vmatpush1.bf16.msra.mxu1 %v1810_v60  ;;  %v1902_v60 = vld [vmem:[#allocation2 + $0x1d0] ss:$8 sps:$4 sm:$0xff]  }
  0x65   : > { %1243 = vmatpush1.bf16.msra.mxu0 %v1811_v61  ;;  %1158 = vmatprep.subr.bf16.mxu1 %v1812_v62  ;;  %v1905_v61 = vld [vmem:[#allocation2 + $0x3d0] ss:$8 sps:$4 sm:$0xff]   ;;  %v1910_v62 = vld [vmem:[#allocation2 + $0x1e4] ss:$8 sps:$4 sm:$0xff]  }
  0x66   : > { %1244 = vmatprep.subr.bf16.mxu0 %v1814_v63  ;;  %v1913_v63 = vld [vmem:[#allocation2 + $0x3e4] ss:$8 sps:$4 sm:$0xff]  }
  0x68   : > { %1159 = vmatpush1.bf16.msra.mxu1 %v1816_v0  ;;  %v1908_v0 = vld [vmem:[#allocation2 + $0x1e0] ss:$8 sps:$4 sm:$0xff]  }
  0x69   : > { %1245 = vmatpush1.bf16.msra.mxu0 %v1817_v1  ;;  %1171 = vmatprep.subr.bf16.mxu1 %v1823_v2  ;;  %v1911_v1 = vld [vmem:[#allocation2 + $0x3e0] ss:$8 sps:$4 sm:$0xff]   ;;  %v1916_v2 = vld [vmem:[#allocation2 + $0x1f4] ss:$8 sps:$4 sm:$0xff]  }
  0x6a   : > { %1257 = vmatprep.subr.bf16.mxu0 %v1829_v3  ;;  %v1919_v3 = vld [vmem:[#allocation2 + $0x3f4] ss:$8 sps:$4 sm:$0xff]  }
  0x6b   : > { %1161 = vmatmul.mubr.bf16.vlgmr.msra.gmra.mrb[0].mxu1 %v1818_v4  ;;  %v1914_v4 = vld [vmem:[#allocation2 + $0x1f0] ss:$8 sps:$4 sm:$0xff]  }
  0x6c   : > { %1247 = vmatmul.mubr.bf16.vlgmr.msra.gmra.mrb[0].mxu0 %v1824_v6  ;;  %1172 = vmatpush1.bf16.msra.mxu1 %v1821_v5  ;;  %v1917_v5 = vld [vmem:[#allocation2 + $0x3f0] ss:$8 sps:$4 sm:$0xff]   ;;  %v1928_v6 = vld [vmem:[#allocation2 + $0x404] ss:$8 sps:$4 sm:$0xff]  }
  0x6d   : > { %1258 = vmatpush1.bf16.msra.mxu0 %v1827_v7  ;;  %1173 = vmatprep.subr.bf16.mxu1 %v1832_v8  ;;  %v1920_v7 = vld [vmem:[%s2067_s7 + $0x8] ss:$36 sps:$4 sm:$0xff]   ;;  %v1923_v8 = vld [vmem:[%s2067_s7 + $0x18] ss:$36 sps:$4 sm:$0xff]  }
  0x6e   : > { %1259 = vmatprep.subr.bf16.mxu0 %v1835_v9  ;;  %1203 = vmatprep.mubr.bf16.mxu1 %v1922_v34  ;;  %v1926_v9 = vld [vmem:[#allocation2 + $0x400] ss:$8 sps:$4 sm:$0xff]  }
  0x6f   : > { %1289 = vmatprep.mubr.bf16.mxu0 %v1925_v35 }
  0x70   : > { %1174 = vmatpush1.bf16.msra.mxu1 %v1830_v10  ;;  %v1931_v10 = vld [vmem:[#allocation2 + $0x414] ss:$8 sps:$4 sm:$0xff]  }
  0x71   : > { %1260 = vmatpush1.bf16.msra.mxu0 %v1833_v11  ;;  %1175 = vmatprep.subr.bf16.mxu1 %v1838_v12  ;;  %v1929_v11 = vld [vmem:[#allocation2 + $0x410] ss:$8 sps:$4 sm:$0xff]   ;;  %v1994_v12 = vmov 0  }
  0x72   : > { %1261 = vmatprep.subr.bf16.mxu0 %v1841_v13  ;;  %v1934_v13 = vld [vmem:[#allocation2 + $0x424] ss:$8 sps:$4 sm:$0xff]  }
  0x74   : > { %1176 = vmatpush1.bf16.msra.mxu1 %v1836_v14  ;;  %v1932_v14 = vld [vmem:[#allocation2 + $0x420] ss:$8 sps:$4 sm:$0xff]  }
  0x75   : > { %1262 = vmatpush1.bf16.msra.mxu0 %v1839_v15  ;;  %1177 = vmatprep.subr.bf16.mxu1 %v1844_v16  ;;  %v1937_v15 = vld [vmem:[#allocation2 + $0x434] ss:$8 sps:$4 sm:$0xff]   ;;  %v1935_v16 = vld [vmem:[#allocation2 + $0x430] ss:$8 sps:$4 sm:$0xff]  }
  0x76   : > { %1263 = vmatprep.subr.bf16.mxu0 %v1847_v17  ;;  %v1940_v17 = vld [vmem:[#allocation2 + $0x444] ss:$8 sps:$4 sm:$0xff]  }
  0x78   : > { %1178 = vmatpush1.bf16.msra.mxu1 %v1842_v18  ;;  %v1938_v18 = vld [vmem:[#allocation2 + $0x440] ss:$8 sps:$4 sm:$0xff]  }
  0x79   : > { %1264 = vmatpush1.bf16.msra.mxu0 %v1845_v19  ;;  %1179 = vmatprep.subr.bf16.mxu1 %v1850_v20  ;;  %v1943_v19 = vld [vmem:[#allocation2 + $0x454] ss:$8 sps:$4 sm:$0xff]   ;;  %v1941_v20 = vld [vmem:[#allocation2 + $0x450] ss:$8 sps:$4 sm:$0xff]  }
  0x7a   : > { %1265 = vmatprep.subr.bf16.mxu0 %v1853_v21  ;;  %v1946_v21 = vld [vmem:[#allocation2 + $0x464] ss:$8 sps:$4 sm:$0xff]  }
  0x7c   : > { %1180 = vmatpush1.bf16.msra.mxu1 %v1848_v22  ;;  %v1944_v22 = vld [vmem:[#allocation2 + $0x460] ss:$8 sps:$4 sm:$0xff]  }
  0x7d   : > { %1266 = vmatpush1.bf16.msra.mxu0 %v1851_v23  ;;  %1181 = vmatprep.subr.bf16.mxu1 %v1856_v24  ;;  %v1949_v23 = vld [vmem:[#allocation2 + $0x474] ss:$8 sps:$4 sm:$0xff]   ;;  %v1947_v24 = vld [vmem:[#allocation2 + $0x470] ss:$8 sps:$4 sm:$0xff]  }
  0x7e   : > { %1267 = vmatprep.subr.bf16.mxu0 %v1859_v25  ;;  %v1950_v25 = vld [vmem:[%s2067_s7 + $0x20] ss:$36 sps:$4 sm:$0xff]  }
  0x80   : > { %1182 = vmatpush1.bf16.msra.mxu1 %v1854_v26 }
  0x81   : > { %1268 = vmatpush1.bf16.msra.mxu0 %v1857_v27  ;;  %1183 = vmatprep.subr.bf16.mxu1 %v1862_v28 }
  0x82   : > { %1269 = vmatprep.subr.bf16.mxu0 %v1865_v29 }
  0x84   : > { %1184 = vmatpush1.bf16.msra.mxu1 %v1860_v30 }
  0x85   : > { %1270 = vmatpush1.bf16.msra.mxu0 %v1863_v31  ;;  %1185 = vmatprep.subr.bf16.mxu1 %v1868_v32 }
  0x86   : > { %1271 = vmatprep.subr.bf16.mxu0 %v1871_v33 }
  0x88   : > { %1186 = vmatpush1.bf16.msra.mxu1 %v1866_v36 }
  0x89   : > { %1272 = vmatpush1.bf16.msra.mxu0 %v1869_v37  ;;  %1187 = vmatprep.subr.bf16.mxu1 %v1874_v38 }
  0x8a   : > { %1273 = vmatprep.subr.bf16.mxu0 %v1877_v39 }
  0x8c   : > { %1188 = vmatpush1.bf16.msra.mxu1 %v1872_v40 }
  0x8d   : > { %1274 = vmatpush1.bf16.msra.mxu0 %v1875_v41  ;;  %1189 = vmatprep.subr.bf16.mxu1 %v1880_v42 }
  0x8e   : > { %1275 = vmatprep.subr.bf16.mxu0 %v1883_v43 }
  0x90   : > { %1190 = vmatpush1.bf16.msra.mxu1 %v1878_v44 }
  0x91   : > { %1276 = vmatpush1.bf16.msra.mxu0 %v1881_v45  ;;  %1191 = vmatprep.subr.bf16.mxu1 %v1886_v46 }
  0x92   : > { %1277 = vmatprep.subr.bf16.mxu0 %v1889_v47 }
  0x94   : > { %1192 = vmatpush1.bf16.msra.mxu1 %v1884_v48 }
  0x95   : > { %1278 = vmatpush1.bf16.msra.mxu0 %v1887_v49  ;;  %1193 = vmatprep.subr.bf16.mxu1 %v1892_v50 }
  0x96   : > { %1279 = vmatprep.subr.bf16.mxu0 %v1895_v51 }
  0x98   : > { %1194 = vmatpush1.bf16.msra.mxu1 %v1890_v52 }
  0x99   : > { %1280 = vmatpush1.bf16.msra.mxu0 %v1893_v53  ;;  %1195 = vmatprep.subr.bf16.mxu1 %v1898_v54 }
  0x9a   : > { %1281 = vmatprep.subr.bf16.mxu0 %v1901_v55 }
  0x9c   : > { %1196 = vmatpush1.bf16.msra.mxu1 %v1896_v56 }
  0x9d   : > { %1282 = vmatpush1.bf16.msra.mxu0 %v1899_v57  ;;  %1197 = vmatprep.subr.bf16.mxu1 %v1904_v58 }
  0x9e   : > { %1283 = vmatprep.subr.bf16.mxu0 %v1907_v59 }
  0xa0   : > { %1198 = vmatpush1.bf16.msra.mxu1 %v1902_v60 }
  0xa1   : > { %1284 = vmatpush1.bf16.msra.mxu0 %v1905_v61  ;;  %1199 = vmatprep.subr.bf16.mxu1 %v1910_v62 }
  0xa2   : > { %1285 = vmatprep.subr.bf16.mxu0 %v1913_v63 }
  0xa4   : > { %1200 = vmatpush1.bf16.msra.mxu1 %v1908_v0 }
  0xa5   : > { %1286 = vmatpush1.bf16.msra.mxu0 %v1911_v1  ;;  %1201 = vmatprep.subr.bf16.mxu1 %v1916_v2 }
  0xa6   : > { %1287 = vmatprep.subr.bf16.mxu0 %v1919_v3 }
  0xa8   : > { %1202 = vmatpush1.bf16.msra.mxu1 %v1914_v4 }
  0xa9   : > { %1288 = vmatpush1.bf16.msra.mxu0 %v1917_v5 }
  0xaa   : > { %1300 = vmatprep.subr.bf16.mxu0 %v1928_v6 }
  0xab   : > { %1204 = vmatmul.mubr.bf16.vlgmr.msra.gmra.mrb[0].mxu1 %v1920_v7 }
  0xac   : > { %1290 = vmatmul.mubr.bf16.vlgmr.msra.gmra.mrb[0].mxu0 %v1923_v8 }
  0xad   : > { %1301 = vmatpush1.bf16.msra.mxu0 %v1926_v9  ;;  %1332 = vmatprep.mubr.bf16.mxu0 %v1994_v12 }
  0xae   : > { %1302 = vmatprep.subr.bf16.mxu0 %v1931_v10 }
  0xb1   : > { %1303 = vmatpush1.bf16.msra.mxu0 %v1929_v11 }
  0xb2   : > { %1304 = vmatprep.subr.bf16.mxu0 %v1934_v13 }
  0xb5   : > { %1305 = vmatpush1.bf16.msra.mxu0 %v1932_v14 }
  0xb6   : > { %1306 = vmatprep.subr.bf16.mxu0 %v1937_v15 }
  0xb9   : > { %1307 = vmatpush1.bf16.msra.mxu0 %v1935_v16 }
  0xba   : > { %1308 = vmatprep.subr.bf16.mxu0 %v1940_v17 }
  0xbd   : > { %1309 = vmatpush1.bf16.msra.mxu0 %v1938_v18 }
  0xbe   : > { %1310 = vmatprep.subr.bf16.mxu0 %v1943_v19 }
  0xc1   : > { %1311 = vmatpush1.bf16.msra.mxu0 %v1941_v20 }
  0xc2   : > { %1312 = vmatprep.subr.bf16.mxu0 %v1946_v21 }
  0xc5   : > { %1313 = vmatpush1.bf16.msra.mxu0 %v1944_v22 }
  0xc6   : > { %1314 = vmatprep.subr.bf16.mxu0 %v1949_v23 }
  0xc9   : > { %1315 = vmatpush1.bf16.msra.mxu0 %v1947_v24 }
  0xcc   : > { %1333 = vmatmul.mubr.bf16.vlgmr.msra.gmra.mrb[0].mxu0 %v1950_v25 }
 0x17e   : > { %v1205_v26 = vpop.f32.mrb[0].mxu1 }
 0x17f   : > { %v1207_v27 = vpop.f32.mrb[1].mxu1 }
 0x180   : > { %v1209_v28 = vpop.f32.mrb[2].mxu1 }
 0x181   : > { %v1211_v29 = vpop.f32.mrb[3].mxu1 }
 0x19f   : > { %v1334_v30 = vpop.f32.mrb[0].mxu0 }
 0x1a0   : > { %v1683_v31 = vadd.f32 %v1334_v30, %v1205_v26  ;;  %v1336_v32 = vpop.f32.mrb[1].mxu0 }
 0x1a1   : > { %v1684_v33 = vadd.f32 %v1336_v32, %v1207_v27  ;;  %v1338_v34 = vpop.f32.mrb[2].mxu0 }
 0x1a2   : > { %v1685_v35 = vadd.f32 %v1338_v34, %v1209_v28  ;;  %v1340_v36 = vpop.f32.mrb[3].mxu0  ;;  %v1371_v39 = vmul.f32 %v1683_v31, %v1683_v31 }
 0x1a3   : > { %v1681_v37 = vpack.c.bf16 %v1684_v33, %v1683_v31  ;;  %v1686_v38 = vadd.f32 %v1340_v36, %v1211_v29  ;;  %v1372_v42 = vmul.f32 %v1684_v33, %v1684_v33 }
 0x1a4   : > { %v1357_v40 = vadd.f32 %v1685_v35, %v1683_v31  ;;  %v1373_v41 = vmul.f32 %v1685_v35, %v1685_v35 }
 0x1a5   : > { %1355 = vst [vmem:[%s200_s11] sm:$0xff] %v1681_v37  ;;  %v1682_v43 = vpack.c.bf16 %v1686_v38, %v1685_v35  ;;  %v1364_v44 = vadd.f32 %v1686_v38, %v1684_v33  ;;  %v1374_v45 = vmul.f32 %v1686_v38, %v1686_v38 }
 0x1a6   : > { %v1358_v46 = vrot.slane %v1357_v40, 4  ;;  %v1375_v47 = vadd.f32 %v1373_v41, %v1371_v39 }
 0x1a7   : > { %1356 = vst [vmem:[%s200_s11 + $0x8] sm:$0xff] %v1682_v43  ;;  %v1365_v48 = vrot.slane %v1364_v44, 4  ;;  %v1382_v49 = vadd.f32 %v1374_v45, %v1372_v42 }
 0x1a8   : > { %v1359_v50 = vadd.f32 %v1358_v46, %v1357_v40  ;;  %v1376_v51 = vrot.slane %v1375_v47, 4 }
 0x1a9   : > { %v1366_v52 = vadd.f32 %v1365_v48, %v1364_v44  ;;  %v1383_v53 = vrot.slane %v1382_v49, 4 }
 0x1aa   : > { %v1360_v54 = vrot.slane %v1359_v50, 2  ;;  %v1377_v55 = vadd.f32 %v1376_v51, %v1375_v47 }
 0x1ab   : > { %v1367_v56 = vrot.slane %v1366_v52, 2  ;;  %v1384_v57 = vadd.f32 %v1383_v53, %v1382_v49 }
 0x1ac   : > { %v1361_v58 = vadd.f32 %v1360_v54, %v1359_v50  ;;  %v1378_v59 = vrot.slane %v1377_v55, 2 }
 0x1ad   : > { %v1368_v60 = vadd.f32 %v1367_v56, %v1366_v52  ;;  %v1385_v61 = vrot.slane %v1384_v57, 2 }
 0x1ae   : > { %v1362_v62 = vrot.slane %v1361_v58, 1  ;;  %v1379_v63 = vadd.f32 %v1378_v59, %v1377_v55 }
 0x1af   : > { %v1369_v0 = vrot.slane %v1368_v60, 1  ;;  %v1386_v1 = vadd.f32 %v1385_v61, %v1384_v57 }
 0x1b0   : > { %v1380_v2 = vrot.slane %v1379_v63, 1  ;;  %v1363_v4 = vadd.f32 %v1362_v62, %v1361_v58 }
 0x1b1   : > { %v1387_v3 = vrot.slane %v1386_v1, 1  ;;  %v1370_v6 = vadd.f32 %v1369_v0, %v1368_v60 }
 0x1b2   : > { %v1381_v5 = vadd.f32 %v1380_v2, %v1379_v63 }
 0x1b3   : > { %v1388_v7 = vadd.f32 %v1387_v3, %v1386_v1 }
 0x1b4   : > { %v1390_v8 = vsel %vm1389_vm0, %v1363_v4, %v1381_v5 }
 0x1b5   : > { %v1391_v9 = vsel %vm1389_vm0, %v1370_v6, %v1388_v7 }
 0x1b6   : > { %v1394_v10 = vcombine.low %v1390_v8, %v1391_v9 }
 0x1b8   : > { %1676 = vst.sshfl [vmem:[%s206_s17] sm:$0x33 pattern:$0x76325410] %v1394_v10 }
 0x1b9 PF: > { %s15_s12 = sadd.s32 1, %s1989_s12  }
 0x1ba   : > { %p12_p5 = scmp.ge.s32.totalorder %s15_s12, 4  }
 0x1bc   :  { %14 = sbr.rel (!%p12_p5) target bundleno = 1 (0x1), region = 75 }
 0x1c3   :  { %1444 = vsyncpa [#allocation3], 1 }
 0x1c4   :  { %1446 = vsyncpa [#allocation3 + $0x1], 1 }

// kernel: tile.68
= control target key start
LH: loop header
LB: loop body
LE: loop exit
PB: predicated region body
PF: predicated region fallthrough
CT: control target
= control target key end

     0   :  { %s22_s0 = inlined_call_operand.vmem [shape: f32[32], index: 0, kind: input, shape index: {}]   ;;  %s23_s1 = inlined_call_operand.vmem [shape: f32[4,32], index: 1, kind: output, shape index: {}]  }
   0x1   :  { %v4_v0 = vld [vmem:[%s22_s0] ss:$0 sm:$0xff] }
   0x2   :  { %5 = vst [vmem:[%s23_s1] sm:$0xf] %v4_v0 }

// kernel: _forward_impl.13
= control target key start
LH: loop header
LB: loop body
LE: loop exit
PB: predicated region body
PF: predicated region fallthrough
CT: control target
= control target key end

     0   :  { %s1297_s12 = smov 0   ;;  %s1456_s0 = inlined_call_operand.vmem [shape: bf16[128,576], index: 0, kind: input, shape index: {}]   ;;  %s1457_s1 = inlined_call_operand.vmem [shape: bf16[576,128], index: 1, kind: input, shape index: {}]   ;;  %s1458_s2 = inlined_call_operand.vmem [shape: bf16[128,128], index: 2, kind: output, shape index: {0}]   ;;  %s1459_s3 = inlined_call_operand.vmem [shape: f32[2,2,128], index: 3, kind: output, shape index: {1}]  }
   0x1 LB: > { %s1303_s13 = sadd.s32 4294967295, %s1275_s12   ;;  %p977_p0 = scmp.ge.s32.totalorder %s1275_s12, 1  ;;  %s1275_s12 = sphi %s1297_s12, %s14_s12  }
   0x2   : > { %p142_p1 = scmp.lt.s32.totalorder %s1275_s12, 3 }
   0x4   : > { %p143_p2 = pnand %p977_p0, %p142_p1 }
   0x5   : > { %v1205_v0 = vld [vmem:[%s1457_s1 + $0x40] sm:$0xff] (!%p143_p2)   ;;  %v1209_v4 = vld [vmem:[%s1457_s1 + $0x48] sm:$0xff] (!%p143_p2)   ;;  %v1213_v8 = vld [vmem:[%s1457_s1 + $0x50] sm:$0xff] (!%p143_p2)   ;;  %s978_s19 = sshll.u32 (!%p143_p2), %s1303_s13, 3  ;;  %vm601_vm0 = vcmask (!%p143_p2), 523264   ;;  %p184_p4 = scmp.lt.s32.totalorder (!%p143_p2), %s1303_s13, 1 }
   0x6   : > { %146 = sbr.rel (%p143_p2) target bundleno = 318 (0x13e), region = 28  ;;  %v1206_v1 = vld [vmem:[%s1457_s1 + $0xc0] sm:$0xff] (!%p143_p2)   ;;  %1084 = vmatprep.subr.bf16.mxu0 (!%p143_p2), %v1205_v0  ;;  %v1210_v5 = vld [vmem:[%s1457_s1 + $0xc8] sm:$0xff] (!%p143_p2)   ;;  %v1214_v9 = vld [vmem:[%s1457_s1 + $0xd0] sm:$0xff] (!%p143_p2)   ;;  %p172_p3 = scmp.lt.s32.totalorder (!%p143_p2), %s978_s19, 15  ;;  %vm883_vm1 = vcmask (!%p143_p2), 1040384  }
   0x7   : > { %v1207_v2 = vld [vmem:[%s1457_s1] sm:$0xff] (!%p143_p2)   ;;  %1124 = vmatprep.subr.bf16.mxu1 (!%p143_p2), %v1206_v1  ;;  %v1211_v6 = vld [vmem:[%s1457_s1 + $0x8] sm:$0xff] (!%p143_p2)   ;;  %v1215_v10 = vld [vmem:[%s1457_s1 + $0x10] sm:$0xff] (!%p143_p2)  }
   0x8   : > { %v1208_v3 = vld [vmem:[%s1457_s1 + $0x80] sm:$0xff] (!%p143_p2)   ;;  %1085 = vmatpush3.bf16.msra.mxu0 (!%p143_p2), %v1207_v2  ;;  %v1212_v7 = vld [vmem:[%s1457_s1 + $0x88] sm:$0xff] (!%p143_p2)   ;;  %v1216_v11 = vld [vmem:[%s1457_s1 + $0x90] sm:$0xff] (!%p143_p2)  }
   0x9   : > { %1125 = vmatpush3.bf16.msra.mxu1 (!%p143_p2), %v1208_v3  ;;  %1086 = vmatprep.subr.bf16.mxu0 (!%p143_p2), %v1209_v4  ;;  %v1217_v12 = vld [vmem:[%s1457_s1 + $0x58] sm:$0xff] (!%p143_p2)   ;;  %v1221_v16 = vld [vmem:[%s1457_s1 + $0x60] sm:$0xff] (!%p143_p2)   ;;  %v1225_v20 = vld [vmem:[%s1457_s1 + $0x68] sm:$0xff] (!%p143_p2)  }
   0xa   : > { %1126 = vmatprep.subr.bf16.mxu1 (!%p143_p2), %v1210_v5  ;;  %v1218_v13 = vld [vmem:[%s1457_s1 + $0xd8] sm:$0xff] (!%p143_p2)   ;;  %v1222_v17 = vld [vmem:[%s1457_s1 + $0xe0] sm:$0xff] (!%p143_p2)   ;;  %v1226_v21 = vld [vmem:[%s1457_s1 + $0xe8] sm:$0xff] (!%p143_p2)  }
   0xb   : > { %v1219_v14 = vld [vmem:[%s1457_s1 + $0x18] sm:$0xff] (!%p143_p2)   ;;  %v1223_v18 = vld [vmem:[%s1457_s1 + $0x20] sm:$0xff] (!%p143_p2)   ;;  %v1227_v22 = vld [vmem:[%s1457_s1 + $0x28] sm:$0xff] (!%p143_p2)  }
   0xc   : > { %1087 = vmatpush3.bf16.msra.mxu0 (!%p143_p2), %v1211_v6  ;;  %v1220_v15 = vld [vmem:[%s1457_s1 + $0x98] sm:$0xff] (!%p143_p2)   ;;  %v1224_v19 = vld [vmem:[%s1457_s1 + $0xa0] sm:$0xff] (!%p143_p2)   ;;  %v1228_v23 = vld [vmem:[%s1457_s1 + $0xa8] sm:$0xff] (!%p143_p2)  }
   0xd   : > { %1127 = vmatpush3.bf16.msra.mxu1 %v1212_v7  ;;  %1088 = vmatprep.subr.bf16.mxu0 %v1213_v8  ;;  %s1461_s19 = smov (!%p172_p3, %s978_s19), 15  ;;  %v1229_v24 = vld [vmem:[%s1457_s1 + $0x70] sm:$0xff]   ;;  %v1233_v28 = vld [vmem:[%s1457_s1 + $0x78] sm:$0xff]   ;;  %v1243_v36 = vld [vmem:[%s1457_s1 + $0x100] sm:$0xff]   ;;  %s1463_s13 = smov (!%p184_p4, %s1303_s13), 1 }
   0xe   : > { %1128 = vmatprep.subr.bf16.mxu1 %v1214_v9  ;;  %v1230_v25 = vld [vmem:[%s1457_s1 + $0xf0] sm:$0xff]   ;;  %s1196_s17 = smul.u32 20, %s1461_s19  ;;  %v1234_v29 = vld [vmem:[%s1457_s1 + $0xf8] sm:$0xff]   ;;  %v1250_v39 = vld [vmem:[%s1457_s1 + $0x108] sm:$0xff]  }
   0xf   : > { %v1231_v26 = vld [vmem:[%s1457_s1 + $0x30] sm:$0xff]   ;;  %v1235_v30 = vld [vmem:[%s1457_s1 + $0x38] sm:$0xff]  }
  0x10   : > { %1089 = vmatpush3.bf16.msra.mxu0 %v1215_v10  ;;  %v1232_v27 = vld [vmem:[%s1457_s1 + $0xb0] sm:$0xff]   ;;  %s1404_s29 = scalar_lea.vmem %s1456_s0, %s1196_s17  ;;  %v1236_v31 = vld [vmem:[%s1457_s1 + $0xb8] sm:$0xff]   ;;  %s981_s17 = sshll.u32 %s1461_s19, 2 }
  0x11   : > { %1129 = vmatpush3.bf16.msra.mxu1 %v1216_v11  ;;  %1090 = vmatprep.subr.bf16.mxu0 %v1217_v12  ;;  %v1237_v32 = vld [vmem:[%s1404_s29] ss:$20 sps:$4 sm:$0xff]   ;;  %v1239_v33 = vld [vmem:[%s1404_s29 + $0x4] ss:$20 sps:$4 sm:$0xff]   ;;  %v1240_v34 = vld [vmem:[%s1404_s29 + $0x8] ss:$20 sps:$4 sm:$0xff]   ;;  %s182_s21 = scalar_lea.vmem %s1458_s2, %s981_s17 }
  0x12   : > { %1130 = vmatprep.subr.bf16.mxu1 %v1218_v13  ;;  %v1242_v35 = vld [vmem:[%s1404_s29 + $0xc] ss:$20 sps:$4 sm:$0xff]   ;;  %646 = vmatprep.mubr.bf16.mxu0 %v1239_v33  ;;  %v1246_v38 = vld [vmem:[%s1404_s29 + $0x34] ss:$20 sps:$4 sm:$0xff]   ;;  %v1249_v41 = vld [vmem:[%s1404_s29 + $0x30] ss:$20 sps:$4 sm:$0xff]  }
  0x13   : > { %711 = vmatprep.mubr.bf16.mxu1 %v1242_v35  ;;  %v1244_v37 = vld [vmem:[%s1404_s29 + $0x2c] ss:$20 sps:$4 sm:$0xff]   ;;  %v1248_v40 = vld [vmem:[%s1404_s29 + $0x28] ss:$20 sps:$4 sm:$0xff]   ;;  %v1257_v44 = vld [vmem:[%s1457_s1 + $0x110] sm:$0xff]   ;;  %s982_s19 = sshll.u32 %s1463_s13, 1 }
  0x14   : > { %1091 = vmatpush3.bf16.msra.mxu0 %v1219_v14  ;;  %v1251_v42 = vld [vmem:[%s1404_s29 + $0x54] ss:$20 sps:$4 sm:$0xff]   ;;  %v1253_v43 = vld [vmem:[%s1404_s29 + $0x5c] ss:$20 sps:$4 sm:$0xff]   ;;  %v1256_v47 = vld [vmem:[%s1404_s29 + $0x58] ss:$20 sps:$4 sm:$0xff]   ;;  %s187_s24 = scalar_lea.vmem %s1459_s3, %s982_s19 }
  0x15   : > { %1131 = vmatpush3.bf16.msra.mxu1 %v1220_v15  ;;  %1092 = vmatprep.subr.bf16.mxu0 %v1221_v16  ;;  %v1264_v45 = vld [vmem:[%s1457_s1 + $0x118] sm:$0xff]   ;;  %v1255_v46 = vld [vmem:[%s1404_s29 + $0x50] ss:$20 sps:$4 sm:$0xff]   ;;  %v1263_v51 = vld [vmem:[%s1404_s29 + $0x80] ss:$20 sps:$4 sm:$0xff]  }
  0x16   : > { %1132 = vmatprep.subr.bf16.mxu1 %v1222_v17  ;;  %v1258_v48 = vld [vmem:[%s1404_s29 + $0x7c] ss:$20 sps:$4 sm:$0xff]   ;;  %v1260_v49 = vld [vmem:[%s1404_s29 + $0x84] ss:$20 sps:$4 sm:$0xff]   ;;  %v1266_v53 = vld [vmem:[%s1404_s29 + $0x60] ss:$20 sps:$4 sm:$0xff]  }
  0x17   : > { %v1262_v50 = vld [vmem:[%s1404_s29 + $0x78] ss:$20 sps:$4 sm:$0xff]   ;;  %v1265_v52 = vld [vmem:[%s1404_s29 + $0x10] ss:$20 sps:$4 sm:$0xff]   ;;  %v1268_v55 = vld [vmem:[%s1404_s29 + $0x88] ss:$20 sps:$4 sm:$0xff]  }
  0x18   : > { %1093 = vmatpush3.bf16.msra.mxu0 %v1223_v18  ;;  %v1267_v54 = vld [vmem:[%s1404_s29 + $0x38] ss:$20 sps:$4 sm:$0xff]  }
  0x19   : > { %1133 = vmatpush3.bf16.msra.mxu1 %v1224_v19  ;;  %1094 = vmatprep.subr.bf16.mxu0 %v1225_v20 }
  0x1a   : > { %1134 = vmatprep.subr.bf16.mxu1 %v1226_v21 }
  0x1c   : > { %1095 = vmatpush3.bf16.msra.mxu0 %v1227_v22 }
  0x1d   : > { %1135 = vmatpush3.bf16.msra.mxu1 %v1228_v23  ;;  %1096 = vmatprep.subr.bf16.mxu0 %v1229_v24 }
  0x1e   : > { %1136 = vmatprep.subr.bf16.mxu1 %v1230_v25 }
  0x20   : > { %1097 = vmatpush3.bf16.msra.mxu0 %v1231_v26 }
  0x21   : > { %1137 = vmatpush3.bf16.msra.mxu1 %v1232_v27  ;;  %1098 = vmatprep.subr.bf16.mxu0 %v1233_v28 }
  0x22   : > { %1138 = vmatprep.subr.bf16.mxu1 %v1234_v29 }
  0x24   : > { %1099 = vmatpush3.bf16.msra.mxu0 %v1235_v30 }
  0x25   : > { %1139 = vmatpush3.bf16.msra.mxu1 %v1236_v31  ;;  %1172 = vmatprep.subr.bf16.mxu0 %v1243_v36 }
  0x26   : > { %1188 = vmatprep.subr.bf16.mxu1 %v1243_v36 }
  0x27   : > { %647 = vmatmul.mubr.bf16.vlgmr.msra.gmra.mrb[0].mxu0 %v1237_v32 }
  0x28   : > { %712 = vmatmul.mubr.bf16.vlgmr.msra.gmra.mrb[0].mxu1 %v1240_v34  ;;  %1173 = vmatpush3.bf16.msra.mxu0 %v1243_v36 }
  0x29   : > { %654 = vmatprep.mubr.bf16.mxu0 %v1244_v37  ;;  %719 = vmatprep.mubr.bf16.mxu1 %v1246_v38 }
  0x2a   : > { %1192 = vmatpush3.bf16.msra.mxu1 %v1243_v36  ;;  %1174 = vmatprep.subr.bf16.mxu0 %v1250_v39 }
  0x2b   : > { %1189 = vmatprep.subr.bf16.mxu1 %v1250_v39 }
  0x2c   : > { %1175 = vmatpush3.bf16.msra.mxu0 %v1250_v39 }
  0x2d   : > { %1176 = vmatprep.subr.bf16.mxu0 %v1257_v44 }
  0x2e   : > { %1193 = vmatpush3.bf16.msra.mxu1 %v1250_v39 }
  0x2f   : > { %655 = vmatmul.mubr.bf16.gmra.mrb[4].mxu0 %v1248_v40  ;;  %1190 = vmatprep.subr.bf16.mxu1 %v1257_v44 }
  0x30   : > { %720 = vmatmul.mubr.bf16.gmra.mrb[4].mxu1 %v1249_v41  ;;  %662 = vmatprep.mubr.bf16.mxu0 %v1251_v42 }
  0x31   : > { %727 = vmatprep.mubr.bf16.mxu1 %v1253_v43  ;;  %1177 = vmatpush3.bf16.msra.mxu0 %v1257_v44 }
  0x32   : > { %1178 = vmatprep.subr.bf16.mxu0 %v1264_v45  ;;  %1194 = vmatpush3.bf16.msra.mxu1 %v1257_v44 }
  0x33   : > { %1191 = vmatprep.subr.bf16.mxu1 %v1264_v45 }
  0x35   : > { %1179 = vmatpush3.bf16.msra.mxu0 %v1264_v45 }
  0x36   : > { %1195 = vmatpush3.bf16.msra.mxu1 %v1264_v45 }
  0x37   : > { %663 = vmatmul.mubr.bf16.gmra.mrb[8].mxu0 %v1255_v46 }
  0x38   : > { %728 = vmatmul.mubr.bf16.gmra.mrb[8].mxu1 %v1256_v47  ;;  %670 = vmatprep.mubr.bf16.mxu0 %v1258_v48 }
  0x39   : > { %735 = vmatprep.mubr.bf16.mxu1 %v1260_v49 }
  0x3f   : > { %671 = vmatmul.mubr.bf16.gmra.mrb[12].mxu0 %v1262_v50 }
  0x40   : > { %736 = vmatmul.mubr.bf16.gmra.mrb[12].mxu1 %v1263_v51  ;;  %1180 = vmatprep.mubr.msk.bf16.mxu0 %vm601_vm0, %v1265_v52 }
  0x41   : > { %1184 = vmatprep.mubr.msk.bf16.mxu1 %vm601_vm0, %v1266_v53 }
  0x47   : > { %1181 = vmatmul.mubr.msk.bf16.vlgmr.msra.gmra.mrb[16].mxu0 %vm601_vm0, %v1267_v54 }
  0x48   : > { %1185 = vmatmul.mubr.msk.bf16.vlgmr.msra.gmra.mrb[16].mxu1 %vm601_vm0, %v1268_v55 }
  0xfa   : > { %v1100_v56 = vpop.f32.mrb[0].mxu0 }
  0xfb   : > { %v1140_v57 = vpop.f32.mrb[0].mxu1  ;;  %v1101_v58 = vpop.f32.mrb[1].mxu0 }
  0xfc   : > { %v1102_v59 = vadd.f32 %v1101_v58, %v1100_v56  ;;  %v1141_v60 = vpop.f32.mrb[1].mxu1  ;;  %v1103_v61 = vpop.f32.mrb[2].mxu0 }
  0xfd   : > { %v1142_v62 = vadd.f32 %v1141_v60, %v1140_v57  ;;  %v1143_v63 = vpop.f32.mrb[2].mxu1  ;;  %v1104_v0 = vpop.f32.mrb[3].mxu0 }
  0xfe   : > { %v1105_v1 = vadd.f32 %v1104_v0, %v1103_v61  ;;  %v1144_v2 = vpop.f32.mrb[3].mxu1 }
  0xff   : > { %v1145_v3 = vadd.f32 %v1144_v2, %v1143_v63  ;;  %v714_v4 = vadd.f32 %v1142_v62, %v1102_v59 }
 0x101   : > { %v717_v5 = vadd.f32 %v1145_v3, %v1105_v1 }
 0x102   : > { %v1106_v6 = vpop.f32.mrb[4].mxu0 }
 0x103   : > { %v1146_v7 = vpop.f32.mrb[4].mxu1  ;;  %v1107_v8 = vpop.f32.mrb[5].mxu0 }
 0x104   : > { %v1108_v9 = vadd.f32 %v1107_v8, %v1106_v6  ;;  %v1147_v10 = vpop.f32.mrb[5].mxu1  ;;  %v1109_v11 = vpop.f32.mrb[6].mxu0 }
 0x105   : > { %v1148_v12 = vadd.f32 %v1147_v10, %v1146_v7  ;;  %v1149_v13 = vpop.f32.mrb[6].mxu1  ;;  %v1110_v14 = vpop.f32.mrb[7].mxu0 }
 0x106   : > { %v1111_v15 = vadd.f32 %v1110_v14, %v1109_v11  ;;  %v1150_v16 = vpop.f32.mrb[7].mxu1 }
 0x107   : > { %v1151_v17 = vadd.f32 %v1150_v16, %v1149_v13  ;;  %v722_v18 = vadd.f32 %v1148_v12, %v1108_v9 }
 0x109   : > { %v725_v19 = vadd.f32 %v1151_v17, %v1111_v15 }
 0x10a   : > { %v1112_v20 = vpop.f32.mrb[8].mxu0 }
 0x10b   : > { %v1152_v21 = vpop.f32.mrb[8].mxu1  ;;  %v1113_v22 = vpop.f32.mrb[9].mxu0 }
 0x10c   : > { %v1114_v23 = vadd.f32 %v1113_v22, %v1112_v20  ;;  %v1153_v24 = vpop.f32.mrb[9].mxu1  ;;  %v1115_v25 = vpop.f32.mrb[10].mxu0 }
 0x10d   : > { %v1154_v26 = vadd.f32 %v1153_v24, %v1152_v21  ;;  %v1155_v27 = vpop.f32.mrb[10].mxu1  ;;  %v1116_v28 = vpop.f32.mrb[11].mxu0 }
 0x10e   : > { %v1117_v29 = vadd.f32 %v1116_v28, %v1115_v25  ;;  %v1156_v30 = vpop.f32.mrb[11].mxu1 }
 0x10f   : > { %v1157_v31 = vadd.f32 %v1156_v30, %v1155_v27  ;;  %v730_v32 = vadd.f32 %v1154_v26, %v1114_v23 }
 0x111   : > { %v733_v33 = vadd.f32 %v1157_v31, %v1117_v29 }
 0x112   : > { %v1118_v34 = vpop.f32.mrb[12].mxu0 }
 0x113   : > { %v1158_v35 = vpop.f32.mrb[12].mxu1  ;;  %v1119_v36 = vpop.f32.mrb[13].mxu0 }
 0x114   : > { %v1120_v37 = vadd.f32 %v1119_v36, %v1118_v34  ;;  %v1159_v38 = vpop.f32.mrb[13].mxu1  ;;  %v1121_v39 = vpop.f32.mrb[14].mxu0 }
 0x115   : > { %v1160_v40 = vadd.f32 %v1159_v38, %v1158_v35  ;;  %v1161_v41 = vpop.f32.mrb[14].mxu1  ;;  %v1122_v42 = vpop.f32.mrb[15].mxu0 }
 0x116   : > { %v1123_v43 = vadd.f32 %v1122_v42, %v1121_v39  ;;  %v1162_v44 = vpop.f32.mrb[15].mxu1 }
 0x117   : > { %v1163_v45 = vadd.f32 %v1162_v44, %v1161_v41  ;;  %v738_v46 = vadd.f32 %v1160_v40, %v1120_v37 }
 0x119   : > { %v741_v47 = vadd.f32 %v1163_v45, %v1123_v43 }
 0x11a   : > { %v1182_v48 = vpop.f32.mrb[16].mxu0 }
 0x11b   : > { %v787_v49 = vadd.f32 %v1182_v48, %v722_v18  ;;  %v1186_v50 = vpop.f32.mrb[16].mxu1  ;;  %v778_v51 = vpop.f32.mrb[17].mxu0 }
 0x11c   : > { %v803_v52 = vadd.f32 %v1186_v50, %v738_v46  ;;  %v779_v53 = vadd.f32 %v778_v51, %v714_v4  ;;  %v794_v54 = vpop.f32.mrb[17].mxu1  ;;  %v1183_v55 = vpop.f32.mrb[18].mxu0 }
 0x11d   : > { %v795_v56 = vadd.f32 %v794_v54, %v730_v32  ;;  %v790_v57 = vadd.f32 %v1183_v55, %v725_v19  ;;  %v1187_v58 = vpop.f32.mrb[18].mxu1  ;;  %v781_v59 = vpop.f32.mrb[19].mxu0  ;;  %v864_v9 = vmul.f32 %v787_v49, %v787_v49 }
 0x11e   : > { %v806_v60 = vadd.f32 %v1187_v58, %v741_v47  ;;  %v782_v61 = vadd.f32 %v781_v59, %v717_v5  ;;  %v797_v62 = vpop.f32.mrb[19].mxu1  ;;  %v862_v6 = vmul.f32 %v779_v53, %v779_v53  ;;  %v868_v20 = vmul.f32 %v803_v52, %v803_v52 }
 0x11f   : > { %v1069_v63 = vpack.c.bf16 %v790_v57, %v787_v49  ;;  %v798_v0 = vadd.f32 %v797_v62, %v733_v33  ;;  %v865_v12 = vmul.f32 %v790_v57, %v790_v57  ;;  %v866_v14 = vmul.f32 %v795_v56, %v795_v56 }
 0x120   : > { %v1079_v1 = vpack.c.bf16 %v806_v60, %v803_v52  ;;  %v1064_v2 = vpack.c.bf16 %v782_v61, %v779_v53  ;;  %v849_v3 = vadd.f32 %v782_v61, %v779_v53  ;;  %v863_v4 = vmul.f32 %v782_v61, %v782_v61 }
 0x121   : > { %1081 = vst [vmem:[%s182_s21 + $0x8] sm:$0xff] %v1069_v63   ;;  %v1074_v7 = vpack.c.bf16 %v798_v0, %v795_v56  ;;  %v867_v17 = vmul.f32 %v798_v0, %v798_v0  ;;  %v869_v23 = vmul.f32 %v806_v60, %v806_v60 }
 0x122   : > { %1083 = vst [vmem:[%s182_s21 + $0x18] sm:$0xff] %v1079_v1   ;;  %1065 = vst [vmem:[%s182_s21] sm:$0xff] %v1064_v2   ;;  %v850_v8 = vadd.f32 %v849_v3, %v787_v49  ;;  %v870_v10 = vadd.f32 %v863_v4, %v862_v6 }
 0x123   : > { %1082 = vst [vmem:[%s182_s21 + $0x10] sm:$0xff] %v1074_v7  }
 0x124   : > { %v851_v11 = vadd.f32 %v850_v8, %v790_v57  ;;  %v871_v5 = vadd.f32 %v870_v10, %v864_v9 }
 0x126   : > { %v852_v13 = vadd.f32 %v851_v11, %v795_v56  ;;  %v872_v15 = vadd.f32 %v871_v5, %v865_v12 }
 0x128   : > { %v853_v16 = vadd.f32 %v852_v13, %v798_v0  ;;  %v873_v18 = vadd.f32 %v872_v15, %v866_v14 }
 0x12a   : > { %v854_v19 = vadd.f32 %v853_v16, %v803_v52  ;;  %v874_v21 = vadd.f32 %v873_v18, %v867_v17 }
 0x12c   : > { %v855_v22 = vadd.f32 %v854_v19, %v806_v60  ;;  %v875_v24 = vadd.f32 %v874_v21, %v868_v20 }
 0x12e   : > { %v856_v25 = vrot.slane %v855_v22, 4  ;;  %v876_v26 = vadd.f32 %v875_v24, %v869_v23 }
 0x130   : > { %v857_v27 = vadd.f32 %v856_v25, %v855_v22  ;;  %v877_v28 = vrot.slane %v876_v26, 4 }
 0x132   : > { %v858_v29 = vrot.slane %v857_v27, 2  ;;  %v878_v30 = vadd.f32 %v877_v28, %v876_v26 }
 0x134   : > { %v859_v31 = vadd.f32 %v858_v29, %v857_v27  ;;  %v879_v32 = vrot.slane %v878_v30, 2 }
 0x136   : > { %v860_v33 = vrot.slane %v859_v31, 1  ;;  %v880_v34 = vadd.f32 %v879_v32, %v878_v30 }
 0x138   : > { %v881_v35 = vrot.slane %v880_v34, 1  ;;  %v861_v36 = vadd.f32 %v860_v33, %v859_v31 }
 0x13a   : > { %v882_v37 = vadd.f32 %v881_v35, %v880_v34 }
 0x13c   : > { %v884_v38 = vsel %vm883_vm1, %v861_v36, %v882_v37 }
 0x13d   : > { %885 = vst [vmem:[%s187_s24] sm:$0x3] %v884_v38 }
 0x13e PF: > { %s14_s12 = sadd.s32 1, %s1275_s12  }
 0x13f   : > { %p11_p5 = scmp.ge.s32.totalorder %s14_s12, 4  }
 0x141   :  { %13 = sbr.rel (!%p11_p5) target bundleno = 1 (0x1), region = 70 }

// kernel: _forward_impl.14
= control target key start
LH: loop header
LB: loop body
LE: loop exit
PB: predicated region body
PF: predicated region fallthrough
CT: control target
= control target key end

     0   :  { %s431_s12 = smov 0   ;;  %s461_s0 = inlined_call_operand.vmem [shape: bf16[128,128], index: 0, kind: input, shape index: {}]   ;;  %s462_s1 = inlined_call_operand.vmem [shape: f32[1,128], index: 1, kind: input, shape index: {}]   ;;  %s463_s2 = inlined_call_operand.vmem [shape: f32[1,128], index: 2, kind: input, shape index: {}]   ;;  %s464_s3 = inlined_call_operand.vmem [shape: bf16[128,128], index: 3, kind: output, shape index: {}]  }
   0x1 LB: > { %s324_s13 = sadd.s32 4294967295, %s409_s12   ;;  %p328_p0 = scmp.ge.s32.totalorder %s409_s12, 1  ;;  %s409_s12 = sphi %s431_s12, %s13_s12  }
   0x2   : > { %p138_p1 = scmp.lt.s32.totalorder %s409_s12, 3 }
   0x4   : > { %p139_p2 = pnand %p328_p0, %p138_p1 }
   0x5   : > { %s329_s14 = sshll.u32 (!%p139_p2), %s324_s13, 3  ;;  %v333_v0 = vld [vmem:[%s462_s1] ss:$0 sm:$0xff] (!%p139_p2) }
   0x6   : > { %142 = sbr.rel (%p139_p2) target bundleno = 29 (0x1d), region = 32  ;;  %p163_p3 = scmp.lt.s32.totalorder (!%p139_p2), %s329_s14, 15  ;;  %v334_v9 = vld [vmem:[%s463_s2] ss:$0 sm:$0xff] (!%p139_p2) }
   0xd   : > { %s466_s14 = smov (!%p163_p3, %s329_s14), 15 }
   0xe   : > { %s330_s15 = sshll.u32 %s466_s14, 2 }
   0xf   : > { %s166_s18 = scalar_lea.vmem %s461_s0, %s330_s15  ;;  %s172_s25 = scalar_lea.vmem %s464_s3, %s330_s15 }
  0x10   : > { %v354_v1 = vld [vmem:[%s166_s18] sm:$0xff]   ;;  %v389_v2 = vld [vmem:[%s166_s18 + $0x8] sm:$0xff]   ;;  %v390_v3 = vld [vmem:[%s166_s18 + $0x10] sm:$0xff]  }
  0x11   : > { %v355_v4 = vunpack.c.l.bf16 %v354_v1  ;;  %v356_v5 = vunpack.c.h.bf16 %v354_v1  ;;  %v359_v6 = vunpack.c.l.bf16 %v389_v2  ;;  %v360_v7 = vunpack.c.h.bf16 %v389_v2  ;;  %v391_v8 = vld [vmem:[%s166_s18 + $0x18] sm:$0xff]  }
  0x12   : > { %v363_v10 = vunpack.c.l.bf16 %v390_v3  ;;  %v364_v11 = vunpack.c.h.bf16 %v390_v3  ;;  %v367_v12 = vunpack.c.l.bf16 %v391_v8  ;;  %v368_v13 = vunpack.c.h.bf16 %v391_v8 }
  0x13   : > { %v197_v14 = vmul.f32 %v355_v4, %v333_v0  ;;  %v198_v15 = vmul.f32 %v356_v5, %v333_v0  ;;  %v199_v16 = vmul.f32 %v359_v6, %v333_v0  ;;  %v200_v17 = vmul.f32 %v360_v7, %v333_v0 }
  0x14   : > { %v201_v18 = vmul.f32 %v363_v10, %v333_v0  ;;  %v202_v19 = vmul.f32 %v364_v11, %v333_v0  ;;  %v203_v20 = vmul.f32 %v367_v12, %v333_v0  ;;  %v204_v21 = vmul.f32 %v368_v13, %v333_v0 }
  0x15   : > { %v212_v22 = vadd.f32 %v334_v9, %v197_v14  ;;  %v213_v23 = vadd.f32 %v334_v9, %v198_v15  ;;  %v214_v24 = vadd.f32 %v334_v9, %v199_v16  ;;  %v215_v25 = vadd.f32 %v334_v9, %v200_v17 }
  0x16   : > { %v216_v26 = vadd.f32 %v334_v9, %v201_v18  ;;  %v217_v27 = vadd.f32 %v334_v9, %v202_v19  ;;  %v218_v28 = vadd.f32 %v334_v9, %v203_v20  ;;  %v219_v29 = vadd.f32 %v334_v9, %v204_v21 }
  0x17   : > { %v220_v30 = vmax.f32 %v212_v22, 0.0  ;;  %v221_v31 = vmax.f32 %v213_v23, 0.0  ;;  %v222_v32 = vmax.f32 %v214_v24, 0.0  ;;  %v223_v33 = vmax.f32 %v215_v25, 0.0 }
  0x18   : > { %v224_v34 = vmax.f32 %v216_v26, 0.0  ;;  %v225_v35 = vmax.f32 %v217_v27, 0.0  ;;  %v226_v36 = vmax.f32 %v218_v28, 0.0  ;;  %v227_v37 = vmax.f32 %v219_v29, 0.0 }
  0x19   : > { %v372_v38 = vpack.c.bf16 %v221_v31, %v220_v30  ;;  %v377_v39 = vpack.c.bf16 %v223_v33, %v222_v32 }
  0x1a   : > { %v382_v40 = vpack.c.bf16 %v225_v35, %v224_v34  ;;  %v387_v41 = vpack.c.bf16 %v227_v37, %v226_v36 }
  0x1b   : > { %373 = vst [vmem:[%s172_s25] sm:$0xff] %v372_v38   ;;  %392 = vst [vmem:[%s172_s25 + $0x8] sm:$0xff] %v377_v39  }
  0x1c   : > { %393 = vst [vmem:[%s172_s25 + $0x10] sm:$0xff] %v382_v40   ;;  %394 = vst [vmem:[%s172_s25 + $0x18] sm:$0xff] %v387_v41  }
  0x1d PF: > { %s13_s12 = sadd.s32 1, %s409_s12  }
  0x1e   : > { %p10_p4 = scmp.ge.s32.totalorder %s13_s12, 4  }
  0x20   :  { %12 = sbr.rel (!%p10_p4) target bundleno = 1 (0x1), region = 62 }

// kernel: tile.78
= control target key start
LH: loop header
LB: loop body
LE: loop exit
PB: predicated region body
PF: predicated region fallthrough
CT: control target
= control target key end

     0   :  { %s22_s0 = inlined_call_operand.vmem [shape: f32[16], index: 0, kind: input, shape index: {}]   ;;  %s23_s1 = inlined_call_operand.vmem [shape: f32[4,16], index: 1, kind: output, shape index: {}]  }
   0x1   :  { %v4_v0 = vld [vmem:[%s22_s0] ss:$0 sm:$0xff] }
   0x2   :  { %5 = vst [vmem:[%s23_s1] sm:$0xf] %v4_v0 }

// kernel: tile.79
= control target key start
LH: loop header
LB: loop body
LE: loop exit
PB: predicated region body
PF: predicated region fallthrough
CT: control target
= control target key end

     0   :  { %vm7_vm0 = vcmask 130048   ;;  %s37_s8 = smov 16   ;;  %s38_s9 = smov 32   ;;  %vm13_vm1 = vcmask 523648   ;;  %vm19_vm2 = vcmask 392448   ;;  %vm25_vm3 = vcmask 261248   ;;  %s55_s0 = inlined_call_operand.vmem [shape: f32[4,16], index: 0, kind: input, shape index: {}]   ;;  %s56_s1 = inlined_call_operand.vmem [shape: f32[64], index: 1, kind: output, shape index: {}]  }
   0x1   :  { %v4_v0 = vld [vmem:[%s55_s0] sm:$0xf]  ;;  %s36_s0 = smov 48  }
   0x2   :  { %5 = vst [vmem:[#allocation1] sm:$0xf] %v4_v0 }
   0x9   :  { %v10_v1 = vld [vmem:[#allocation1 + $0x3] sm:$0x1]   ;;  %v22_v2 = vld [vmem:[#allocation1 + $0x1] sm:$0x1]   ;;  %v6_v3 = vld [vmem:[#allocation1] sm:$0x1]  }
   0xa   :  { %11 = vrot.lane.b32.xlu0 %v10_v1, %s36_s0  ;;  %23 = vrot.lane.b32.xlu1 %v22_v2, %s37_s8  ;;  %v16_v4 = vld [vmem:[#allocation1 + $0x2] sm:$0x1]   ;;  %8 = vst.msk [vmem:[#allocation0] sm:$0x1] %vm7_vm0, %v6_v3  }
   0xe   :  { %17 = vrot.lane.b32.xlu0 %v16_v4, %s38_s9 }
  0x7c   :  { %v12_v5 = vpop.permute.xlu0 %11   ;;  %v24_v6 = vpop.permute.xlu1 %23  }
  0x7d   :  { %14 = vst.msk [vmem:[#allocation0] sm:$0x1] %vm13_vm1, %v12_v5  }
  0x80   :  { %v18_v7 = vpop.permute.xlu0 %17  }
  0x81   :  { %20 = vst.msk [vmem:[#allocation0] sm:$0x1] %vm19_vm2, %v18_v7  }
  0x82   :  { %26 = vst.msk [vmem:[#allocation0] sm:$0x1] %vm25_vm3, %v24_v6  }
  0x89   :  { %v30_v8 = vld [vmem:[#allocation0] sm:$0x1] }
  0x8a   :  { %32 = vst [vmem:[%s56_s1] sm:$0x1] %v30_v8 }

// kernel: _forward_impl.15
= control target key start
LH: loop header
LB: loop body
LE: loop exit
PB: predicated region body
PF: predicated region fallthrough
CT: control target
= control target key end

     0   :  { %s1918_s12 = smov 0   ;;  %s2115_s0 = inlined_call_operand.vmem [shape: bf16[512,288], index: 0, kind: input, shape index: {}]   ;;  %s2116_s1 = inlined_call_operand.vmem [shape: bf16[288,128], index: 1, kind: input, shape index: {}]   ;;  %s2117_s2 = inlined_call_operand.vmem [shape: bf16[512,128], index: 2, kind: output, shape index: {0}]   ;;  %s2118_s3 = inlined_call_operand.vmem [shape: f32[2,2,128], index: 3, kind: output, shape index: {1}]  }
   0x1 LB: > { %s1924_s13 = sadd.s32 4294967295, %s1896_s12   ;;  %p1368_p0 = scmp.ge.s32.totalorder %s1896_s12, 1  ;;  %s1896_s12 = sphi %s1918_s12, %s14_s12  }
   0x2   : > { %p142_p1 = scmp.lt.s32.totalorder %s1896_s12, 3 }
   0x4   : > { %p143_p2 = pnand %p1368_p0, %p142_p1 }
   0x5   : > { %v1808_v0 = vld [vmem:[%s2116_s1 + $0x40] sm:$0xff] (!%p143_p2)   ;;  %s1369_s16 = sshll.u32 (!%p143_p2), %s1924_s13, 5  ;;  %v1810_v2 = vld [vmem:[%s2116_s1 + $0x48] sm:$0xff] (!%p143_p2)   ;;  %v1812_v4 = vld [vmem:[%s2116_s1 + $0x50] sm:$0xff] (!%p143_p2)   ;;  %vm637_vm0 = vcmask (!%p143_p2), 261120   ;;  %p184_p4 = scmp.lt.s32.totalorder (!%p143_p2), %s1924_s13, 1 }
   0x6   : > { %146 = sbr.rel (%p143_p2) target bundleno = 379 (0x17b), region = 28  ;;  %v1809_v1 = vld [vmem:[%s2116_s1] sm:$0xff] (!%p143_p2)   ;;  %1617 = vmatprep.subr.bf16.mxu0 (!%p143_p2), %v1808_v0  ;;  %1783 = vmatprep.subr.bf16.mxu1 (!%p143_p2), %v1808_v0  ;;  %p172_p3 = scmp.lt.s32.totalorder (!%p143_p2), %s1369_s16, 63  ;;  %v1811_v3 = vld [vmem:[%s2116_s1 + $0x8] sm:$0xff] (!%p143_p2)   ;;  %v1813_v5 = vld [vmem:[%s2116_s1 + $0x10] sm:$0xff] (!%p143_p2)   ;;  %vm1274_vm1 = vcmask (!%p143_p2), 1040384  }
   0x7   : > { %1618 = vmatpush3.bf16.msra.mxu0 (!%p143_p2), %v1809_v1  ;;  %1791 = vmatpush3.bf16.msra.mxu1 (!%p143_p2), %v1809_v1  ;;  %v1814_v6 = vld [vmem:[%s2116_s1 + $0x58] sm:$0xff] (!%p143_p2)   ;;  %v1816_v8 = vld [vmem:[%s2116_s1 + $0x60] sm:$0xff] (!%p143_p2)   ;;  %v1818_v10 = vld [vmem:[%s2116_s1 + $0x68] sm:$0xff] (!%p143_p2)  }
   0x8   : > { %1619 = vmatprep.subr.bf16.mxu0 (!%p143_p2), %v1810_v2  ;;  %1784 = vmatprep.subr.bf16.mxu1 (!%p143_p2), %v1810_v2  ;;  %v1815_v7 = vld [vmem:[%s2116_s1 + $0x18] sm:$0xff] (!%p143_p2)   ;;  %v1817_v9 = vld [vmem:[%s2116_s1 + $0x20] sm:$0xff] (!%p143_p2)   ;;  %v1819_v13 = vld [vmem:[%s2116_s1 + $0x28] sm:$0xff] (!%p143_p2)  }
   0x9   : > { %v1820_v14 = vld [vmem:[%s2116_s1 + $0x70] sm:$0xff] (!%p143_p2)   ;;  %v1822_v16 = vld [vmem:[%s2116_s1 + $0x78] sm:$0xff] (!%p143_p2)   ;;  %v1836_v18 = vld [vmem:[%s2116_s1 + $0x80] sm:$0xff] (!%p143_p2)  }
   0xa   : > { %v1821_v15 = vld [vmem:[%s2116_s1 + $0x30] sm:$0xff] (!%p143_p2)   ;;  %v1823_v17 = vld [vmem:[%s2116_s1 + $0x38] sm:$0xff] (!%p143_p2)   ;;  %v1849_v23 = vld [vmem:[%s2116_s1 + $0x88] sm:$0xff] (!%p143_p2)  }
   0xb   : > { %1620 = vmatpush3.bf16.msra.mxu0 (!%p143_p2), %v1811_v3  ;;  %1792 = vmatpush3.bf16.msra.mxu1 (!%p143_p2), %v1811_v3 }
   0xc   : > { %1621 = vmatprep.subr.bf16.mxu0 (!%p143_p2), %v1812_v4  ;;  %1785 = vmatprep.subr.bf16.mxu1 (!%p143_p2), %v1812_v4 }
   0xd   : > { %s2120_s16 = smov (!%p172_p3, %s1369_s16), 63  ;;  %s2122_s13 = smov (!%p184_p4, %s1924_s13), 1 }
   0xe   : > { %s1799_s29 = smul.u32 12, %s2120_s16  ;;  %s1372_s4 = sshll.u32 %s2120_s16, 2 }
   0xf   : > { %1622 = vmatpush3.bf16.msra.mxu0 %v1813_v5  ;;  %1793 = vmatpush3.bf16.msra.mxu1 %v1813_v5  ;;  %s2075_s7 = scalar_lea.vmem %s2117_s2, %s1372_s4  ;;  %s1373_s16 = sshll.u32 %s2122_s13, 1 }
  0x10   : > { %1623 = vmatprep.subr.bf16.mxu0 %v1814_v6  ;;  %1786 = vmatprep.subr.bf16.mxu1 %v1814_v6  ;;  %s1962_s9 = scalar_lea.vmem %s2115_s0, %s1799_s29  ;;  %s187_s10 = scalar_lea.vmem %s2118_s3, %s1373_s16 }
  0x11   : > { %v1826_v11 = vld [vmem:[%s1962_s9 + $0x4] ss:$12 sps:$4 sm:$0xff]   ;;  %v1824_v19 = vld [vmem:[%s1962_s9] ss:$12 sps:$4 sm:$0xff]   ;;  %v1830_v21 = vld [vmem:[%s1962_s9 + $0x1c] ss:$12 sps:$4 sm:$0xff]  }
  0x12   : > { %v1829_v12 = vld [vmem:[%s1962_s9 + $0x124] ss:$12 sps:$4 sm:$0xff]   ;;  %718 = vmatprep.mubr.bf16.mxu0 %v1826_v11  ;;  %v1827_v20 = vld [vmem:[%s1962_s9 + $0x120] ss:$12 sps:$4 sm:$0xff]   ;;  %v1832_v22 = vld [vmem:[%s1962_s9 + $0x13c] ss:$12 sps:$4 sm:$0xff]  }
  0x13   : > { %1624 = vmatpush3.bf16.msra.mxu0 %v1815_v7  ;;  %1794 = vmatpush3.bf16.msra.mxu1 %v1815_v7  ;;  %v1834_v24 = vld [vmem:[%s1962_s9 + $0x18] ss:$12 sps:$4 sm:$0xff]   ;;  %v1837_v26 = vld [vmem:[%s1962_s9 + $0x34] ss:$12 sps:$4 sm:$0xff]   ;;  %v1841_v28 = vld [vmem:[%s1962_s9 + $0x30] ss:$12 sps:$4 sm:$0xff]  }
  0x14   : > { %1625 = vmatprep.subr.bf16.mxu0 %v1816_v8  ;;  %1787 = vmatprep.subr.bf16.mxu1 %v1816_v8  ;;  %v1835_v25 = vld [vmem:[%s1962_s9 + $0x138] ss:$12 sps:$4 sm:$0xff]   ;;  %v1839_v27 = vld [vmem:[%s1962_s9 + $0x154] ss:$12 sps:$4 sm:$0xff]   ;;  %v1842_v29 = vld [vmem:[%s1962_s9 + $0x150] ss:$12 sps:$4 sm:$0xff]  }
  0x15   : > { %814 = vmatprep.mubr.bf16.mxu1 %v1829_v12  ;;  %v1843_v30 = vld [vmem:[%s1962_s9 + $0x4c] ss:$12 sps:$4 sm:$0xff]   ;;  %v1847_v32 = vld [vmem:[%s1962_s9 + $0x48] ss:$12 sps:$4 sm:$0xff]   ;;  %v1850_v34 = vld [vmem:[%s1962_s9 + $0x64] ss:$12 sps:$4 sm:$0xff]  }
  0x16   : > { %v1845_v31 = vld [vmem:[%s1962_s9 + $0x16c] ss:$12 sps:$4 sm:$0xff]   ;;  %v1848_v33 = vld [vmem:[%s1962_s9 + $0x168] ss:$12 sps:$4 sm:$0xff]   ;;  %v1859_v41 = vld [vmem:[%s1962_s9 + $0x50] ss:$12 sps:$4 sm:$0xff]  }
  0x17   : > { %1626 = vmatpush3.bf16.msra.mxu0 %v1817_v9  ;;  %1795 = vmatpush3.bf16.msra.mxu1 %v1817_v9  ;;  %v1852_v35 = vld [vmem:[%s1962_s9 + $0x8] ss:$12 sps:$4 sm:$0xff]   ;;  %v1853_v36 = vld [vmem:[%s1962_s9 + $0x60] ss:$12 sps:$4 sm:$0xff]   ;;  %v1857_v39 = vld [vmem:[%s1962_s9 + $0x38] ss:$12 sps:$4 sm:$0xff]  }
  0x18   : > { %1627 = vmatprep.subr.bf16.mxu0 %v1818_v10  ;;  %1788 = vmatprep.subr.bf16.mxu1 %v1818_v10  ;;  %v1854_v37 = vld [vmem:[%s1962_s9 + $0x20] ss:$12 sps:$4 sm:$0xff]   ;;  %v1855_v38 = vld [vmem:[%s1962_s9 + $0x7c] ss:$12 sps:$4 sm:$0xff]   ;;  %v1858_v40 = vld [vmem:[%s1962_s9 + $0x78] ss:$12 sps:$4 sm:$0xff]  }
  0x19   : > { %v1860_v42 = vld [vmem:[%s1962_s9 + $0x94] ss:$12 sps:$4 sm:$0xff]   ;;  %v1863_v44 = vld [vmem:[%s1962_s9 + $0x90] ss:$12 sps:$4 sm:$0xff]   ;;  %v1865_v46 = vld [vmem:[%s1962_s9 + $0xac] ss:$12 sps:$4 sm:$0xff]  }
  0x1a   : > { %v1862_v43 = vld [vmem:[%s1962_s9 + $0x68] ss:$12 sps:$4 sm:$0xff]   ;;  %v1864_v45 = vld [vmem:[%s1962_s9 + $0x80] ss:$12 sps:$4 sm:$0xff]   ;;  %v1867_v47 = vld [vmem:[%s1962_s9 + $0x98] ss:$12 sps:$4 sm:$0xff]  }
  0x1b   : > { %1628 = vmatpush3.bf16.msra.mxu0 %v1819_v13  ;;  %1796 = vmatpush3.bf16.msra.mxu1 %v1819_v13  ;;  %v1868_v48 = vld [vmem:[%s1962_s9 + $0xa8] ss:$12 sps:$4 sm:$0xff]   ;;  %v1869_v49 = vld [vmem:[%s1962_s9 + $0xb0] ss:$12 sps:$4 sm:$0xff]   ;;  %v1873_v52 = vld [vmem:[%s1962_s9 + $0xc0] ss:$12 sps:$4 sm:$0xff]  }
  0x1c   : > { %1629 = vmatprep.subr.bf16.mxu0 %v1820_v14  ;;  %1789 = vmatprep.subr.bf16.mxu1 %v1820_v14  ;;  %v1870_v50 = vld [vmem:[%s1962_s9 + $0xc4] ss:$12 sps:$4 sm:$0xff]   ;;  %v1872_v51 = vld [vmem:[%s1962_s9 + $0xc8] ss:$12 sps:$4 sm:$0xff]   ;;  %v1874_v53 = vld [vmem:[%s1962_s9 + $0xe0] ss:$12 sps:$4 sm:$0xff]  }
  0x1d   : > { %v1875_v54 = vld [vmem:[%s1962_s9 + $0xdc] ss:$12 sps:$4 sm:$0xff]   ;;  %v1877_v55 = vld [vmem:[%s1962_s9 + $0xf8] ss:$12 sps:$4 sm:$0xff]   ;;  %v1880_v58 = vld [vmem:[%s1962_s9 + $0xf4] ss:$12 sps:$4 sm:$0xff]  }
  0x1e   : > { %v1878_v56 = vld [vmem:[%s1962_s9 + $0xd8] ss:$12 sps:$4 sm:$0xff]   ;;  %v1879_v57 = vld [vmem:[%s1962_s9 + $0x110] ss:$12 sps:$4 sm:$0xff]   ;;  %v1882_v59 = vld [vmem:[%s1962_s9 + $0x128] ss:$12 sps:$4 sm:$0xff]  }
  0x1f   : > { %1630 = vmatpush3.bf16.msra.mxu0 %v1821_v15  ;;  %1797 = vmatpush3.bf16.msra.mxu1 %v1821_v15  ;;  %v1883_v60 = vld [vmem:[%s1962_s9 + $0xf0] ss:$12 sps:$4 sm:$0xff]   ;;  %v1884_v61 = vld [vmem:[%s1962_s9 + $0x140] ss:$12 sps:$4 sm:$0xff]   ;;  %v1887_v63 = vld [vmem:[%s1962_s9 + $0x158] ss:$12 sps:$4 sm:$0xff]  }
  0x20   : > { %1631 = vmatprep.subr.bf16.mxu0 %v1822_v16  ;;  %1790 = vmatprep.subr.bf16.mxu1 %v1822_v16  ;;  %v1885_v62 = vld [vmem:[%s1962_s9 + $0x10c] ss:$12 sps:$4 sm:$0xff]   ;;  %v1888_v0 = vld [vmem:[%s1962_s9 + $0x108] ss:$12 sps:$4 sm:$0xff]   ;;  %v1889_v1 = vld [vmem:[%s1962_s9 + $0x170] ss:$12 sps:$4 sm:$0xff]  }
  0x23   : > { %1632 = vmatpush3.bf16.msra.mxu0 %v1823_v17  ;;  %1798 = vmatpush3.bf16.msra.mxu1 %v1823_v17 }
  0x24   : > { %1747 = vmatprep.subr.bf16.mxu1 %v1836_v18 }
  0x26   : > { %719 = vmatmul.mubr.bf16.vlgmr.msra.gmra.mrb[0].mxu0 %v1824_v19  ;;  %815 = vmatmul.mubr.bf16.vlgmr.msra.gmra.mrb[0].mxu1 %v1827_v20 }
  0x27   : > { %726 = vmatprep.mubr.bf16.mxu0 %v1830_v21  ;;  %822 = vmatprep.mubr.bf16.mxu1 %v1832_v22 }
  0x28   : > { %1748 = vmatpush3.bf16.msra.mxu1 %v1836_v18 }
  0x29   : > { %1749 = vmatprep.subr.bf16.mxu1 %v1849_v23 }
  0x2c   : > { %1750 = vmatpush3.bf16.msra.mxu1 %v1849_v23 }
  0x2e   : > { %727 = vmatmul.mubr.bf16.gmra.mrb[4].mxu0 %v1834_v24  ;;  %823 = vmatmul.mubr.bf16.gmra.mrb[4].mxu1 %v1835_v25 }
  0x2f   : > { %734 = vmatprep.mubr.bf16.mxu0 %v1837_v26  ;;  %830 = vmatprep.mubr.bf16.mxu1 %v1839_v27 }
  0x36   : > { %735 = vmatmul.mubr.bf16.gmra.mrb[8].mxu0 %v1841_v28  ;;  %831 = vmatmul.mubr.bf16.gmra.mrb[8].mxu1 %v1842_v29 }
  0x37   : > { %742 = vmatprep.mubr.bf16.mxu0 %v1843_v30  ;;  %838 = vmatprep.mubr.bf16.mxu1 %v1845_v31 }
  0x3e   : > { %743 = vmatmul.mubr.bf16.gmra.mrb[12].mxu0 %v1847_v32  ;;  %839 = vmatmul.mubr.bf16.gmra.mrb[12].mxu1 %v1848_v33 }
  0x3f   : > { %750 = vmatprep.mubr.bf16.mxu0 %v1850_v34  ;;  %1751 = vmatprep.mubr.msk.bf16.mxu1 %vm637_vm0, %v1852_v35 }
  0x46   : > { %751 = vmatmul.mubr.bf16.gmra.mrb[16].mxu0 %v1853_v36  ;;  %1752 = vmatmul.mubr.msk.bf16.vlgmr.msra.gmra.mrb[16].mxu1 %vm637_vm0, %v1854_v37 }
  0x47   : > { %758 = vmatprep.mubr.bf16.mxu0 %v1855_v38  ;;  %1755 = vmatprep.mubr.msk.bf16.mxu1 %vm637_vm0, %v1857_v39 }
  0x4e   : > { %759 = vmatmul.mubr.bf16.gmra.mrb[20].mxu0 %v1858_v40  ;;  %1756 = vmatmul.mubr.msk.bf16.gmra.mrb[20].mxu1 %vm637_vm0, %v1859_v41 }
  0x4f   : > { %766 = vmatprep.mubr.bf16.mxu0 %v1860_v42  ;;  %1759 = vmatprep.mubr.msk.bf16.mxu1 %vm637_vm0, %v1862_v43 }
  0x56   : > { %767 = vmatmul.mubr.bf16.gmra.mrb[24].mxu0 %v1863_v44  ;;  %1760 = vmatmul.mubr.msk.bf16.gmra.mrb[24].mxu1 %vm637_vm0, %v1864_v45 }
  0x57   : > { %774 = vmatprep.mubr.bf16.mxu0 %v1865_v46  ;;  %1763 = vmatprep.mubr.msk.bf16.mxu1 %vm637_vm0, %v1867_v47 }
  0x5e   : > { %775 = vmatmul.mubr.bf16.gmra.mrb[28].mxu0 %v1868_v48  ;;  %1764 = vmatmul.mubr.msk.bf16.gmra.mrb[28].mxu1 %vm637_vm0, %v1869_v49 }
  0x5f   : > { %782 = vmatprep.mubr.bf16.mxu0 %v1870_v50  ;;  %1767 = vmatprep.mubr.msk.bf16.mxu1 %vm637_vm0, %v1872_v51 }
  0x66   : > { %783 = vmatmul.mubr.bf16.gmra.mrb[32].mxu0 %v1873_v52  ;;  %1768 = vmatmul.mubr.msk.bf16.gmra.mrb[32].mxu1 %vm637_vm0, %v1874_v53 }
  0x67   : > { %790 = vmatprep.mubr.bf16.mxu0 %v1875_v54  ;;  %1771 = vmatprep.mubr.msk.bf16.mxu1 %vm637_vm0, %v1877_v55 }
  0x6e   : > { %791 = vmatmul.mubr.bf16.gmra.mrb[36].mxu0 %v1878_v56  ;;  %1772 = vmatmul.mubr.msk.bf16.gmra.mrb[36].mxu1 %vm637_vm0, %v1879_v57 }
  0x6f   : > { %798 = vmatprep.mubr.bf16.mxu0 %v1880_v58  ;;  %1775 = vmatprep.mubr.msk.bf16.mxu1 %vm637_vm0, %v1882_v59 }
  0x76   : > { %799 = vmatmul.mubr.bf16.gmra.mrb[40].mxu0 %v1883_v60  ;;  %1776 = vmatmul.mubr.msk.bf16.gmra.mrb[40].mxu1 %vm637_vm0, %v1884_v61 }
  0x77   : > { %806 = vmatprep.mubr.bf16.mxu0 %v1885_v62  ;;  %1779 = vmatprep.mubr.msk.bf16.mxu1 %vm637_vm0, %v1887_v63 }
  0x7e   : > { %807 = vmatmul.mubr.bf16.gmra.mrb[44].mxu0 %v1888_v0  ;;  %1780 = vmatmul.mubr.msk.bf16.gmra.mrb[44].mxu1 %vm637_vm0, %v1889_v1 }
  0xf9   : > { %v1633_v2 = vpop.f32.mrb[0].mxu0  ;;  %v1705_v3 = vpop.f32.mrb[0].mxu1 }
  0xfa   : > { %v1634_v4 = vpop.f32.mrb[1].mxu0  ;;  %v1706_v5 = vpop.f32.mrb[1].mxu1 }
  0xfb   : > { %v1635_v6 = vadd.f32 %v1634_v4, %v1633_v2  ;;  %v1636_v7 = vpop.f32.mrb[2].mxu0  ;;  %v2055_v8 = vadd.f32 %v1706_v5, %v1705_v3  ;;  %v1708_v9 = vpop.f32.mrb[2].mxu1 }
  0xfc   : > { %v1637_v10 = vpop.f32.mrb[3].mxu0  ;;  %v1709_v11 = vpop.f32.mrb[3].mxu1 }
  0xfd   : > { %v1638_v12 = vadd.f32 %v1637_v10, %v1636_v7  ;;  %v2057_v13 = vadd.f32 %v1709_v11, %v1708_v9 }
 0x101   : > { %v1639_v14 = vpop.f32.mrb[4].mxu0  ;;  %v1711_v15 = vpop.f32.mrb[4].mxu1 }
 0x102   : > { %v1640_v16 = vpop.f32.mrb[5].mxu0  ;;  %v1712_v17 = vpop.f32.mrb[5].mxu1 }
 0x103   : > { %v1641_v18 = vadd.f32 %v1640_v16, %v1639_v14  ;;  %v1642_v19 = vpop.f32.mrb[6].mxu0  ;;  %v2059_v20 = vadd.f32 %v1712_v17, %v1711_v15  ;;  %v1714_v21 = vpop.f32.mrb[6].mxu1 }
 0x104   : > { %v1643_v22 = vpop.f32.mrb[7].mxu0  ;;  %v1715_v23 = vpop.f32.mrb[7].mxu1 }
 0x105   : > { %v1644_v24 = vadd.f32 %v1643_v22, %v1642_v19  ;;  %v2061_v25 = vadd.f32 %v1715_v23, %v1714_v21 }
 0x109   : > { %v1645_v26 = vpop.f32.mrb[8].mxu0  ;;  %v1717_v27 = vpop.f32.mrb[8].mxu1 }
 0x10a   : > { %v1646_v28 = vpop.f32.mrb[9].mxu0  ;;  %v1718_v29 = vpop.f32.mrb[9].mxu1 }
 0x10b   : > { %v1647_v30 = vadd.f32 %v1646_v28, %v1645_v26  ;;  %v1648_v31 = vpop.f32.mrb[10].mxu0  ;;  %v2063_v32 = vadd.f32 %v1718_v29, %v1717_v27  ;;  %v1720_v33 = vpop.f32.mrb[10].mxu1 }
 0x10c   : > { %v1649_v34 = vpop.f32.mrb[11].mxu0  ;;  %v1721_v35 = vpop.f32.mrb[11].mxu1 }
 0x10d   : > { %v1650_v36 = vadd.f32 %v1649_v34, %v1648_v31  ;;  %v2065_v37 = vadd.f32 %v1721_v35, %v1720_v33 }
 0x111   : > { %v1651_v38 = vpop.f32.mrb[12].mxu0  ;;  %v1723_v39 = vpop.f32.mrb[12].mxu1 }
 0x112   : > { %v1652_v40 = vpop.f32.mrb[13].mxu0  ;;  %v1724_v41 = vpop.f32.mrb[13].mxu1 }
 0x113   : > { %v1653_v42 = vadd.f32 %v1652_v40, %v1651_v38  ;;  %v1654_v43 = vpop.f32.mrb[14].mxu0  ;;  %v2067_v44 = vadd.f32 %v1724_v41, %v1723_v39  ;;  %v1726_v45 = vpop.f32.mrb[14].mxu1 }
 0x114   : > { %v1655_v46 = vpop.f32.mrb[15].mxu0  ;;  %v1727_v47 = vpop.f32.mrb[15].mxu1 }
 0x115   : > { %v1656_v48 = vadd.f32 %v1655_v46, %v1654_v43  ;;  %v2069_v49 = vadd.f32 %v1727_v47, %v1726_v45 }
 0x119   : > { %v1657_v50 = vpop.f32.mrb[16].mxu0  ;;  %v1753_v51 = vpop.f32.mrb[16].mxu1 }
 0x11a   : > { %v890_v52 = vadd.f32 %v1753_v51, %v1641_v18  ;;  %v1658_v53 = vpop.f32.mrb[17].mxu0  ;;  %v881_v54 = vpop.f32.mrb[17].mxu1 }
 0x11b   : > { %v1659_v55 = vadd.f32 %v1658_v53, %v1657_v50  ;;  %v882_v56 = vadd.f32 %v1635_v6, %v881_v54  ;;  %v1660_v57 = vpop.f32.mrb[18].mxu0  ;;  %v1754_v58 = vpop.f32.mrb[18].mxu1 }
 0x11c   : > { %v893_v59 = vadd.f32 %v1754_v58, %v1644_v24  ;;  %v1661_v60 = vpop.f32.mrb[19].mxu0  ;;  %v884_v61 = vpop.f32.mrb[19].mxu1  ;;  %v1207_v5 = vmul.f32 %v890_v52, %v890_v52 }
 0x11d   : > { %v1662_v62 = vadd.f32 %v1661_v60, %v1660_v57  ;;  %v885_v63 = vadd.f32 %v1638_v12, %v884_v61  ;;  %v1205_v1 = vmul.f32 %v882_v56, %v882_v56 }
 0x11e   : > { %v1530_v0 = vpack.c.bf16 %v893_v59, %v890_v52  ;;  %v1208_v11 = vmul.f32 %v893_v59, %v893_v59 }
 0x11f   : > { %v1525_v2 = vpack.c.bf16 %v885_v63, %v882_v56  ;;  %v1168_v3 = vadd.f32 %v885_v63, %v882_v56  ;;  %v1206_v4 = vmul.f32 %v885_v63, %v885_v63 }
 0x120   : > { %1602 = vst [vmem:[%s2075_s7 + $0x8] sm:$0xff] %v1530_v0  }
 0x121   : > { %1526 = vst [vmem:[%s2075_s7] sm:$0xff] %v1525_v2   ;;  %v1169_v6 = vadd.f32 %v1168_v3, %v890_v52  ;;  %v1237_v7 = vadd.f32 %v1206_v4, %v1205_v1  ;;  %v1663_v9 = vpop.f32.mrb[20].mxu0  ;;  %v1757_v10 = vpop.f32.mrb[20].mxu1 }
 0x122   : > { %v906_v14 = vadd.f32 %v1757_v10, %v1653_v42  ;;  %v1664_v15 = vpop.f32.mrb[21].mxu0  ;;  %v897_v16 = vpop.f32.mrb[21].mxu1 }
 0x123   : > { %v1238_v17 = vadd.f32 %v1237_v7, %v1207_v5  ;;  %v1665_v18 = vadd.f32 %v1664_v15, %v1663_v9  ;;  %v898_v12 = vadd.f32 %v1647_v30, %v897_v16  ;;  %v1170_v19 = vadd.f32 %v1169_v6, %v893_v59  ;;  %v1666_v21 = vpop.f32.mrb[22].mxu0  ;;  %v1758_v22 = vpop.f32.mrb[22].mxu1 }
 0x124   : > { %v909_v23 = vadd.f32 %v1758_v22, %v1656_v48  ;;  %v1667_v24 = vpop.f32.mrb[23].mxu0  ;;  %v900_v26 = vpop.f32.mrb[23].mxu1  ;;  %v1211_v42 = vmul.f32 %v906_v14, %v906_v14 }
 0x125   : > { %v1171_v27 = vadd.f32 %v1170_v19, %v898_v12  ;;  %v1209_v28 = vmul.f32 %v898_v12, %v898_v12  ;;  %v1239_v29 = vadd.f32 %v1238_v17, %v1208_v11  ;;  %v1668_v31 = vadd.f32 %v1667_v24, %v1666_v21 }
 0x126   : > { %v1540_v33 = vpack.c.bf16 %v909_v23, %v906_v14  ;;  %v901_v34 = vadd.f32 %v1650_v36, %v900_v26  ;;  %v1212_v36 = vmul.f32 %v909_v23, %v909_v23 }
 0x127   : > { %v1240_v35 = vadd.f32 %v1239_v29, %v1209_v28 }
 0x128   : > { %1604 = vst [vmem:[%s2075_s7 + $0x18] sm:$0xff] %v1540_v33   ;;  %v1535_v38 = vpack.c.bf16 %v901_v34, %v898_v12  ;;  %v1172_v39 = vadd.f32 %v1171_v27, %v901_v34  ;;  %v1210_v40 = vmul.f32 %v901_v34, %v901_v34 }
 0x129   : > { %v1669_v41 = vpop.f32.mrb[24].mxu0  ;;  %v1761_v30 = vpop.f32.mrb[24].mxu1 }
 0x12a   : > { %1603 = vst [vmem:[%s2075_s7 + $0x10] sm:$0xff] %v1535_v38   ;;  %v1173_v43 = vadd.f32 %v1172_v39, %v906_v14  ;;  %v1241_v45 = vadd.f32 %v1240_v35, %v1210_v40  ;;  %v922_v46 = vadd.f32 %v1761_v30, %v1665_v18  ;;  %v1670_v47 = vpop.f32.mrb[25].mxu0  ;;  %v913_v48 = vpop.f32.mrb[25].mxu1 }
 0x12b   : > { %v1671_v50 = vadd.f32 %v1670_v47, %v1669_v41  ;;  %v914_v51 = vadd.f32 %v1659_v55, %v913_v48  ;;  %v1672_v52 = vpop.f32.mrb[26].mxu0  ;;  %v1762_v53 = vpop.f32.mrb[26].mxu1 }
 0x12c   : > { %v1242_v54 = vadd.f32 %v1241_v45, %v1211_v42  ;;  %v1174_v56 = vadd.f32 %v1173_v43, %v909_v23  ;;  %v925_v57 = vadd.f32 %v1762_v53, %v1668_v31  ;;  %v1673_v58 = vpop.f32.mrb[27].mxu0  ;;  %v916_v59 = vpop.f32.mrb[27].mxu1  ;;  %v1215_v9 = vmul.f32 %v922_v46, %v922_v46 }
 0x12d   : > { %v1213_v60 = vmul.f32 %v914_v51, %v914_v51  ;;  %v1674_v61 = vadd.f32 %v1673_v58, %v1672_v52  ;;  %v917_v63 = vadd.f32 %v1662_v62, %v916_v59 }
 0x12e   : > { %v1175_v0 = vadd.f32 %v1174_v56, %v914_v51  ;;  %v1243_v1 = vadd.f32 %v1242_v54, %v1212_v36  ;;  %v1550_v2 = vpack.c.bf16 %v925_v57, %v922_v46  ;;  %v1216_v12 = vmul.f32 %v925_v57, %v925_v57 }
 0x12f   : > { %v1545_v3 = vpack.c.bf16 %v917_v63, %v914_v51  ;;  %v1214_v4 = vmul.f32 %v917_v63, %v917_v63 }
 0x130   : > { %v1244_v5 = vadd.f32 %v1243_v1, %v1213_v60  ;;  %1606 = vst [vmem:[%s2075_s7 + $0x28] sm:$0xff] %v1550_v2   ;;  %v1176_v55 = vadd.f32 %v1175_v0, %v917_v63 }
 0x131   : > { %1605 = vst [vmem:[%s2075_s7 + $0x20] sm:$0xff] %v1545_v3   ;;  %v1675_v6 = vpop.f32.mrb[28].mxu0  ;;  %v1765_v7 = vpop.f32.mrb[28].mxu1 }
 0x132   : > { %v1177_v10 = vadd.f32 %v1176_v55, %v922_v46  ;;  %v1245_v11 = vadd.f32 %v1244_v5, %v1214_v4  ;;  %v1676_v14 = vpop.f32.mrb[29].mxu0  ;;  %v929_v15 = vpop.f32.mrb[29].mxu1 }
 0x133   : > { %v1677_v16 = vadd.f32 %v1676_v14, %v1675_v6  ;;  %v930_v17 = vadd.f32 %v1671_v50, %v929_v15  ;;  %v1678_v18 = vpop.f32.mrb[30].mxu0  ;;  %v1766_v62 = vpop.f32.mrb[30].mxu1 }
 0x134   : > { %v1246_v19 = vadd.f32 %v1245_v11, %v1215_v9  ;;  %v1178_v21 = vadd.f32 %v1177_v10, %v925_v57  ;;  %v1679_v22 = vpop.f32.mrb[31].mxu0  ;;  %v932_v23 = vpop.f32.mrb[31].mxu1 }
 0x135   : > { %v938_v24 = vadd.f32 %v1765_v7, %v1677_v16  ;;  %v1217_v26 = vmul.f32 %v930_v17, %v930_v17  ;;  %v1680_v27 = vadd.f32 %v1679_v22, %v1678_v18  ;;  %v933_v28 = vadd.f32 %v1674_v61, %v932_v23 }
 0x136   : > { %v1179_v29 = vadd.f32 %v1178_v21, %v930_v17  ;;  %v1247_v31 = vadd.f32 %v1246_v19, %v1216_v12 }
 0x137   : > { %v941_v33 = vadd.f32 %v1766_v62, %v1680_v27  ;;  %v1555_v34 = vpack.c.bf16 %v933_v28, %v930_v17  ;;  %v1218_v35 = vmul.f32 %v933_v28, %v933_v28  ;;  %v1219_v42 = vmul.f32 %v938_v24, %v938_v24 }
 0x138   : > { %v1248_v38 = vadd.f32 %v1247_v31, %v1217_v26  ;;  %v1180_v39 = vadd.f32 %v1179_v29, %v933_v28 }
 0x139   : > { %v1560_v40 = vpack.c.bf16 %v941_v33, %v938_v24  ;;  %1607 = vst [vmem:[%s2075_s7 + $0x30] sm:$0xff] %v1555_v34   ;;  %v1681_v41 = vpop.f32.mrb[32].mxu0  ;;  %v1769_v30 = vpop.f32.mrb[32].mxu1  ;;  %v1220_v52 = vmul.f32 %v941_v33, %v941_v33 }
 0x13a   : > { %v1181_v43 = vadd.f32 %v1180_v39, %v938_v24  ;;  %v1249_v45 = vadd.f32 %v1248_v38, %v1218_v35  ;;  %v1682_v46 = vpop.f32.mrb[33].mxu0  ;;  %v945_v47 = vpop.f32.mrb[33].mxu1 }
 0x13b   : > { %1608 = vst [vmem:[%s2075_s7 + $0x38] sm:$0xff] %v1560_v40   ;;  %v1683_v48 = vadd.f32 %v1682_v46, %v1681_v41  ;;  %v1684_v50 = vpop.f32.mrb[34].mxu0  ;;  %v1770_v51 = vpop.f32.mrb[34].mxu1 }
 0x13c   : > { %v1250_v53 = vadd.f32 %v1249_v45, %v1219_v42  ;;  %v1685_v36 = vpop.f32.mrb[35].mxu0  ;;  %v1182_v54 = vadd.f32 %v1181_v43, %v941_v33  ;;  %v948_v56 = vpop.f32.mrb[35].mxu1 }
 0x13d   : > { %v1686_v57 = vadd.f32 %v1685_v36, %v1684_v50  ;;  %v946_v58 = vadd.f32 %v1683_v48, %v945_v47 }
 0x13e   : > { %v1251_v59 = vadd.f32 %v1250_v53, %v1220_v52 }
 0x13f   : > { %v1183_v60 = vadd.f32 %v1182_v54, %v946_v58  ;;  %v1221_v61 = vmul.f32 %v946_v58, %v946_v58  ;;  %v949_v63 = vadd.f32 %v1686_v57, %v948_v56 }
 0x141   : > { %v1252_v0 = vadd.f32 %v1251_v59, %v1221_v61  ;;  %v1565_v1 = vpack.c.bf16 %v949_v63, %v946_v58  ;;  %v1184_v2 = vadd.f32 %v1183_v60, %v949_v63  ;;  %v1222_v3 = vmul.f32 %v949_v63, %v949_v63  ;;  %v1687_v4 = vpop.f32.mrb[36].mxu0  ;;  %v1773_v5 = vpop.f32.mrb[36].mxu1 }
 0x142   : > { %v1688_v55 = vpop.f32.mrb[37].mxu0  ;;  %v961_v6 = vpop.f32.mrb[37].mxu1 }
 0x143   : > { %1609 = vst [vmem:[%s2075_s7 + $0x40] sm:$0xff] %v1565_v1   ;;  %v1253_v7 = vadd.f32 %v1252_v0, %v1222_v3  ;;  %v1689_v9 = vadd.f32 %v1688_v55, %v1687_v4  ;;  %v1690_v10 = vpop.f32.mrb[38].mxu0  ;;  %v1774_v11 = vpop.f32.mrb[38].mxu1 }
 0x144   : > { %v1691_v14 = vpop.f32.mrb[39].mxu0  ;;  %v964_v15 = vpop.f32.mrb[39].mxu1 }
 0x145   : > { %v954_v16 = vadd.f32 %v1769_v30, %v1689_v9  ;;  %v1692_v17 = vadd.f32 %v1691_v14, %v1690_v10 }
 0x147   : > { %v1185_v18 = vadd.f32 %v1184_v2, %v954_v16  ;;  %v1223_v62 = vmul.f32 %v954_v16, %v954_v16  ;;  %v957_v12 = vadd.f32 %v1770_v51, %v1692_v17 }
 0x149   : > { %v1254_v19 = vadd.f32 %v1253_v7, %v1223_v62  ;;  %v1570_v21 = vpack.c.bf16 %v957_v12, %v954_v16  ;;  %v1186_v22 = vadd.f32 %v1185_v18, %v957_v12  ;;  %v1224_v23 = vmul.f32 %v957_v12, %v957_v12  ;;  %v1693_v24 = vpop.f32.mrb[40].mxu0  ;;  %v1777_v26 = vpop.f32.mrb[40].mxu1 }
 0x14a   : > { %v2087_v27 = vadd.f32 %v1777_v26, %v2059_v20  ;;  %v1694_v28 = vpop.f32.mrb[41].mxu0  ;;  %v977_v29 = vpop.f32.mrb[41].mxu1 }
 0x14b   : > { %1610 = vst [vmem:[%s2075_s7 + $0x48] sm:$0xff] %v1570_v21   ;;  %v1255_v31 = vadd.f32 %v1254_v19, %v1224_v23  ;;  %v1695_v33 = vadd.f32 %v1694_v28, %v1693_v24  ;;  %v978_v34 = vadd.f32 %v2055_v8, %v977_v29  ;;  %v1696_v35 = vpop.f32.mrb[42].mxu0  ;;  %v1778_v38 = vpop.f32.mrb[42].mxu1 }
 0x14c   : > { %v989_v39 = vadd.f32 %v1778_v38, %v2061_v25  ;;  %v1697_v40 = vpop.f32.mrb[43].mxu0  ;;  %v980_v41 = vpop.f32.mrb[43].mxu1 }
 0x14d   : > { %v962_v30 = vadd.f32 %v1695_v33, %v961_v6  ;;  %v1698_v42 = vadd.f32 %v1697_v40, %v1696_v35  ;;  %v981_v20 = vadd.f32 %v2057_v13, %v980_v41 }
 0x14e   : > { %v1590_v43 = vpack.c.bf16 %v989_v39, %v2087_v27  ;;  %v1232_v12 = vmul.f32 %v989_v39, %v989_v39 }
 0x14f   : > { %v1187_v45 = vadd.f32 %v1186_v22, %v962_v30  ;;  %v1225_v46 = vmul.f32 %v962_v30, %v962_v30  ;;  %v965_v47 = vadd.f32 %v1698_v42, %v964_v15  ;;  %v1585_v48 = vpack.c.bf16 %v981_v20, %v978_v34 }
 0x150   : > { %1614 = vst [vmem:[%s2075_s7 + $0x68] sm:$0xff] %v1590_v43   ;;  %v1230_v17 = vmul.f32 %v981_v20, %v981_v20 }
 0x151   : > { %v1256_v8 = vadd.f32 %v1255_v31, %v1225_v46  ;;  %v1575_v50 = vpack.c.bf16 %v965_v47, %v962_v30  ;;  %v1188_v51 = vadd.f32 %v1187_v45, %v965_v47  ;;  %v1226_v52 = vmul.f32 %v965_v47, %v965_v47  ;;  %1613 = vst [vmem:[%s2075_s7 + $0x60] sm:$0xff] %v1585_v48   ;;  %v1699_v25 = vpop.f32.mrb[44].mxu0  ;;  %v1781_v53 = vpop.f32.mrb[44].mxu1 }
 0x152   : > { %v1002_v36 = vadd.f32 %v1781_v53, %v2067_v44  ;;  %v1700_v54 = vpop.f32.mrb[45].mxu0  ;;  %v993_v56 = vpop.f32.mrb[45].mxu1 }
 0x153   : > { %1611 = vst [vmem:[%s2075_s7 + $0x50] sm:$0xff] %v1575_v50   ;;  %v1257_v13 = vadd.f32 %v1256_v8, %v1226_v52  ;;  %v1701_v57 = vadd.f32 %v1700_v54, %v1699_v25  ;;  %v994_v58 = vadd.f32 %v2063_v32, %v993_v56  ;;  %v1702_v59 = vpop.f32.mrb[46].mxu0  ;;  %v1782_v60 = vpop.f32.mrb[46].mxu1 }
 0x154   : > { %v1005_v61 = vadd.f32 %v1782_v60, %v2069_v49  ;;  %v1703_v63 = vpop.f32.mrb[47].mxu0  ;;  %v996_v0 = vpop.f32.mrb[47].mxu1  ;;  %v1229_v49 = vmul.f32 %v978_v34, %v978_v34  ;;  %v1235_v31 = vmul.f32 %v1002_v36, %v1002_v36 }
 0x155   : > { %v970_v1 = vadd.f32 %v1773_v5, %v1701_v57  ;;  %v1704_v2 = vadd.f32 %v1703_v63, %v1702_v59  ;;  %v997_v44 = vadd.f32 %v2065_v37, %v996_v0  ;;  %v1231_v37 = vmul.f32 %v2087_v27, %v2087_v27 }
 0x156   : > { %v1600_v3 = vpack.c.bf16 %v1005_v61, %v1002_v36  ;;  %v1233_v22 = vmul.f32 %v994_v58, %v994_v58  ;;  %v1236_v35 = vmul.f32 %v1005_v61, %v1005_v61 }
 0x157   : > { %v1189_v4 = vadd.f32 %v1188_v51, %v970_v1  ;;  %v1227_v55 = vmul.f32 %v970_v1, %v970_v1  ;;  %v973_v6 = vadd.f32 %v1774_v11, %v1704_v2  ;;  %v1595_v7 = vpack.c.bf16 %v997_v44, %v994_v58 }
 0x158   : > { %1616 = vst [vmem:[%s2075_s7 + $0x78] sm:$0xff] %v1600_v3   ;;  %v1234_v28 = vmul.f32 %v997_v44, %v997_v44 }
 0x159   : > { %v1258_v9 = vadd.f32 %v1257_v13, %v1227_v55  ;;  %v1580_v32 = vpack.c.bf16 %v973_v6, %v970_v1  ;;  %v1190_v10 = vadd.f32 %v1189_v4, %v973_v6  ;;  %v1228_v14 = vmul.f32 %v973_v6, %v973_v6  ;;  %1615 = vst [vmem:[%s2075_s7 + $0x70] sm:$0xff] %v1595_v7  }
 0x15b   : > { %1612 = vst [vmem:[%s2075_s7 + $0x58] sm:$0xff] %v1580_v32   ;;  %v1191_v15 = vadd.f32 %v1190_v10, %v978_v34  ;;  %v1259_v16 = vadd.f32 %v1258_v9, %v1228_v14 }
 0x15d   : > { %v1192_v5 = vadd.f32 %v1191_v15, %v981_v20  ;;  %v1260_v18 = vadd.f32 %v1259_v16, %v1229_v49 }
 0x15f   : > { %v1261_v62 = vadd.f32 %v1260_v18, %v1230_v17  ;;  %v1193_v11 = vadd.f32 %v1192_v5, %v2087_v27 }
 0x161   : > { %v1194_v19 = vadd.f32 %v1193_v11, %v989_v39  ;;  %v1262_v21 = vadd.f32 %v1261_v62, %v1231_v37 }
 0x163   : > { %v1195_v23 = vadd.f32 %v1194_v19, %v994_v58  ;;  %v1263_v24 = vadd.f32 %v1262_v21, %v1232_v12 }
 0x165   : > { %v1196_v26 = vadd.f32 %v1195_v23, %v997_v44  ;;  %v1264_v29 = vadd.f32 %v1263_v24, %v1233_v22 }
 0x167   : > { %v1197_v33 = vadd.f32 %v1196_v26, %v1002_v36  ;;  %v1265_v34 = vadd.f32 %v1264_v29, %v1234_v28 }
 0x169   : > { %v1198_v38 = vadd.f32 %v1197_v33, %v1005_v61  ;;  %v1266_v40 = vadd.f32 %v1265_v34, %v1235_v31 }
 0x16b   : > { %v1199_v41 = vrot.slane %v1198_v38, 4  ;;  %v1267_v30 = vadd.f32 %v1266_v40, %v1236_v35 }
 0x16d   : > { %v1200_v27 = vadd.f32 %v1199_v41, %v1198_v38  ;;  %v1268_v39 = vrot.slane %v1267_v30, 4 }
 0x16f   : > { %v1201_v42 = vrot.slane %v1200_v27, 2  ;;  %v1269_v20 = vadd.f32 %v1268_v39, %v1267_v30 }
 0x171   : > { %v1202_v43 = vadd.f32 %v1201_v42, %v1200_v27  ;;  %v1270_v45 = vrot.slane %v1269_v20, 2 }
 0x173   : > { %v1203_v46 = vrot.slane %v1202_v43, 1  ;;  %v1271_v47 = vadd.f32 %v1270_v45, %v1269_v20 }
 0x175   : > { %v1272_v48 = vrot.slane %v1271_v47, 1  ;;  %v1204_v8 = vadd.f32 %v1203_v46, %v1202_v43 }
 0x177   : > { %v1273_v50 = vadd.f32 %v1272_v48, %v1271_v47 }
 0x179   : > { %v1275_v51 = vsel %vm1274_vm1, %v1204_v8, %v1273_v50 }
 0x17a   : > { %1276 = vst [vmem:[%s187_s10] sm:$0x3] %v1275_v51 }
 0x17b PF: > { %s14_s12 = sadd.s32 1, %s1896_s12  }
 0x17c   : > { %p11_p5 = scmp.ge.s32.totalorder %s14_s12, 4  }
 0x17e   :  { %13 = sbr.rel (!%p11_p5) target bundleno = 1 (0x1), region = 70 }

// kernel: _forward_impl.16
= control target key start
LH: loop header
LB: loop body
LE: loop exit
PB: predicated region body
PF: predicated region fallthrough
CT: control target
= control target key end

     0   :  { %s851_s12 = smov 0   ;;  %s985_s0 = inlined_call_operand.vmem [shape: bf16[512,128], index: 0, kind: input, shape index: {}]   ;;  %s986_s1 = inlined_call_operand.vmem [shape: f32[1,128], index: 1, kind: input, shape index: {}]   ;;  %s987_s2 = inlined_call_operand.vmem [shape: f32[1,128], index: 2, kind: input, shape index: {}]   ;;  %s988_s3 = inlined_call_operand.vmem [shape: bf16[512,128], index: 3, kind: output, shape index: {}]  }
   0x1 LB: > { %s564_s13 = sadd.s32 4294967295, %s829_s12   ;;  %p568_p0 = scmp.ge.s32.totalorder %s829_s12, 1  ;;  %s829_s12 = sphi %s851_s12, %s13_s12  }
   0x2   : > { %p138_p1 = scmp.lt.s32.totalorder %s829_s12, 3 }
   0x4   : > { %p139_p2 = pnand %p568_p0, %p138_p1 }
   0x5   : > { %s569_s14 = sshll.u32 (!%p139_p2), %s564_s13, 5  ;;  %v872_v0 = vld [vmem:[%s986_s1] ss:$0 sm:$0xff] (!%p139_p2) }
   0x6   : > { %142 = sbr.rel (%p139_p2) target bundleno = 59 (0x3b), region = 32  ;;  %p163_p3 = scmp.lt.s32.totalorder (!%p139_p2), %s569_s14, 63  ;;  %v881_v9 = vld [vmem:[%s987_s2] ss:$0 sm:$0xff] (!%p139_p2) }
   0xd   : > { %s990_s14 = smov (!%p163_p3, %s569_s14), 63 }
   0xe   : > { %s570_s15 = sshll.u32 %s990_s14, 2 }
   0xf   : > { %s867_s18 = scalar_lea.vmem %s985_s0, %s570_s15  ;;  %s906_s25 = scalar_lea.vmem %s988_s3, %s570_s15 }
  0x10   : > { %v642_v1 = vld [vmem:[%s867_s18] sm:$0xff]   ;;  %v785_v2 = vld [vmem:[%s867_s18 + $0x8] sm:$0xff]   ;;  %v786_v3 = vld [vmem:[%s867_s18 + $0x10] sm:$0xff]  }
  0x11   : > { %v643_v4 = vunpack.c.l.bf16 %v642_v1  ;;  %v644_v5 = vunpack.c.h.bf16 %v642_v1  ;;  %v647_v6 = vunpack.c.l.bf16 %v785_v2  ;;  %v648_v7 = vunpack.c.h.bf16 %v785_v2  ;;  %v787_v8 = vld [vmem:[%s867_s18 + $0x18] sm:$0xff]   ;;  %v788_v30 = vld [vmem:[%s867_s18 + $0x20] sm:$0xff]   ;;  %v789_v35 = vld [vmem:[%s867_s18 + $0x28] sm:$0xff]  }
  0x12   : > { %v651_v10 = vunpack.c.l.bf16 %v786_v3  ;;  %v652_v11 = vunpack.c.h.bf16 %v786_v3  ;;  %v655_v12 = vunpack.c.l.bf16 %v787_v8  ;;  %v656_v13 = vunpack.c.h.bf16 %v787_v8  ;;  %v790_v40 = vld [vmem:[%s867_s18 + $0x30] sm:$0xff]   ;;  %v791_v45 = vld [vmem:[%s867_s18 + $0x38] sm:$0xff]   ;;  %v792_v3 = vld [vmem:[%s867_s18 + $0x40] sm:$0xff]  }
  0x13   : > { %v245_v14 = vmul.f32 %v643_v4, %v872_v0  ;;  %v246_v15 = vmul.f32 %v644_v5, %v872_v0  ;;  %v247_v16 = vmul.f32 %v647_v6, %v872_v0  ;;  %v248_v17 = vmul.f32 %v648_v7, %v872_v0 }
  0x14   : > { %v249_v18 = vmul.f32 %v651_v10, %v872_v0  ;;  %v250_v19 = vmul.f32 %v652_v11, %v872_v0  ;;  %v251_v20 = vmul.f32 %v655_v12, %v872_v0  ;;  %v252_v21 = vmul.f32 %v656_v13, %v872_v0  ;;  %v793_v13 = vld [vmem:[%s867_s18 + $0x48] sm:$0xff]  }
  0x15   : > { %v284_v22 = vadd.f32 %v881_v9, %v245_v14  ;;  %v285_v23 = vadd.f32 %v881_v9, %v246_v15  ;;  %v286_v24 = vadd.f32 %v881_v9, %v247_v16  ;;  %v287_v25 = vadd.f32 %v881_v9, %v248_v17 }
  0x16   : > { %v288_v26 = vadd.f32 %v881_v9, %v249_v18  ;;  %v289_v27 = vadd.f32 %v881_v9, %v250_v19  ;;  %v290_v28 = vadd.f32 %v881_v9, %v251_v20  ;;  %v291_v29 = vadd.f32 %v881_v9, %v252_v21  ;;  %v794_v18 = vld [vmem:[%s867_s18 + $0x50] sm:$0xff]  }
  0x17   : > { %v316_v31 = vmax.f32 %v284_v22, 0.0  ;;  %v317_v32 = vmax.f32 %v285_v23, 0.0  ;;  %v318_v33 = vmax.f32 %v286_v24, 0.0  ;;  %v319_v34 = vmax.f32 %v287_v25, 0.0  ;;  %v795_v23 = vld [vmem:[%s867_s18 + $0x58] sm:$0xff]  }
  0x18   : > { %v320_v36 = vmax.f32 %v288_v26, 0.0  ;;  %v321_v37 = vmax.f32 %v289_v27, 0.0  ;;  %v322_v38 = vmax.f32 %v290_v28, 0.0  ;;  %v323_v39 = vmax.f32 %v291_v29, 0.0 }
  0x19   : > { %v708_v41 = vpack.c.bf16 %v317_v32, %v316_v31  ;;  %v713_v42 = vpack.c.bf16 %v319_v34, %v318_v33  ;;  %v659_v43 = vunpack.c.l.bf16 %v788_v30  ;;  %v660_v44 = vunpack.c.h.bf16 %v788_v30 }
  0x1a   : > { %v718_v46 = vpack.c.bf16 %v321_v37, %v320_v36  ;;  %v723_v47 = vpack.c.bf16 %v323_v39, %v322_v38  ;;  %v663_v48 = vunpack.c.l.bf16 %v789_v35  ;;  %v664_v49 = vunpack.c.h.bf16 %v789_v35 }
  0x1b   : > { %709 = vst [vmem:[%s906_s25] sm:$0xff] %v708_v41   ;;  %800 = vst [vmem:[%s906_s25 + $0x8] sm:$0xff] %v713_v42   ;;  %v253_v50 = vmul.f32 %v659_v43, %v872_v0  ;;  %v254_v51 = vmul.f32 %v660_v44, %v872_v0  ;;  %v667_v52 = vunpack.c.l.bf16 %v790_v40  ;;  %v668_v53 = vunpack.c.h.bf16 %v790_v40  ;;  %v796_v40 = vld [vmem:[%s867_s18 + $0x60] sm:$0xff]  }
  0x1c   : > { %801 = vst [vmem:[%s906_s25 + $0x10] sm:$0xff] %v718_v46   ;;  %802 = vst [vmem:[%s906_s25 + $0x18] sm:$0xff] %v723_v47   ;;  %v255_v54 = vmul.f32 %v663_v48, %v872_v0  ;;  %v256_v55 = vmul.f32 %v664_v49, %v872_v0  ;;  %v671_v56 = vunpack.c.l.bf16 %v791_v45  ;;  %v672_v57 = vunpack.c.h.bf16 %v791_v45 }
  0x1d   : > { %v292_v58 = vadd.f32 %v881_v9, %v253_v50  ;;  %v293_v59 = vadd.f32 %v881_v9, %v254_v51  ;;  %v257_v60 = vmul.f32 %v667_v52, %v872_v0  ;;  %v258_v61 = vmul.f32 %v668_v53, %v872_v0  ;;  %v797_v53 = vld [vmem:[%s867_s18 + $0x68] sm:$0xff]  }
  0x1e   : > { %v294_v62 = vadd.f32 %v881_v9, %v255_v54  ;;  %v295_v63 = vadd.f32 %v881_v9, %v256_v55  ;;  %v259_v1 = vmul.f32 %v671_v56, %v872_v0  ;;  %v260_v2 = vmul.f32 %v672_v57, %v872_v0 }
  0x1f   : > { %v324_v4 = vmax.f32 %v292_v58, 0.0  ;;  %v325_v5 = vmax.f32 %v293_v59, 0.0  ;;  %v296_v6 = vadd.f32 %v881_v9, %v257_v60  ;;  %v297_v7 = vadd.f32 %v881_v9, %v258_v61  ;;  %v798_v58 = vld [vmem:[%s867_s18 + $0x70] sm:$0xff]  }
  0x20   : > { %v326_v8 = vmax.f32 %v294_v62, 0.0  ;;  %v327_v10 = vmax.f32 %v295_v63, 0.0  ;;  %v298_v11 = vadd.f32 %v881_v9, %v259_v1  ;;  %v299_v12 = vadd.f32 %v881_v9, %v260_v2  ;;  %v799_v63 = vld [vmem:[%s867_s18 + $0x78] sm:$0xff]  }
  0x21   : > { %v728_v14 = vpack.c.bf16 %v325_v5, %v324_v4  ;;  %v328_v15 = vmax.f32 %v296_v6, 0.0  ;;  %v329_v16 = vmax.f32 %v297_v7, 0.0  ;;  %v675_v17 = vunpack.c.l.bf16 %v792_v3 }
  0x22   : > { %v733_v19 = vpack.c.bf16 %v327_v10, %v326_v8  ;;  %v330_v20 = vmax.f32 %v298_v11, 0.0  ;;  %v331_v21 = vmax.f32 %v299_v12, 0.0  ;;  %v676_v22 = vunpack.c.h.bf16 %v792_v3 }
  0x23   : > { %803 = vst [vmem:[%s906_s25 + $0x20] sm:$0xff] %v728_v14   ;;  %v738_v24 = vpack.c.bf16 %v329_v16, %v328_v15  ;;  %v261_v25 = vmul.f32 %v675_v17, %v872_v0  ;;  %v679_v26 = vunpack.c.l.bf16 %v793_v13  ;;  %v680_v27 = vunpack.c.h.bf16 %v793_v13 }
  0x24   : > { %804 = vst [vmem:[%s906_s25 + $0x28] sm:$0xff] %v733_v19   ;;  %v743_v28 = vpack.c.bf16 %v331_v21, %v330_v20  ;;  %v262_v29 = vmul.f32 %v676_v22, %v872_v0  ;;  %v683_v30 = vunpack.c.l.bf16 %v794_v18  ;;  %v684_v31 = vunpack.c.h.bf16 %v794_v18 }
  0x25   : > { %805 = vst [vmem:[%s906_s25 + $0x30] sm:$0xff] %v738_v24   ;;  %v300_v32 = vadd.f32 %v881_v9, %v261_v25  ;;  %v263_v33 = vmul.f32 %v679_v26, %v872_v0  ;;  %v264_v34 = vmul.f32 %v680_v27, %v872_v0  ;;  %v687_v35 = vunpack.c.l.bf16 %v795_v23 }
  0x26   : > { %806 = vst [vmem:[%s906_s25 + $0x38] sm:$0xff] %v743_v28   ;;  %v301_v36 = vadd.f32 %v881_v9, %v262_v29  ;;  %v265_v37 = vmul.f32 %v683_v30, %v872_v0  ;;  %v266_v38 = vmul.f32 %v684_v31, %v872_v0  ;;  %v688_v39 = vunpack.c.h.bf16 %v795_v23 }
  0x27   : > { %v332_v41 = vmax.f32 %v300_v32, 0.0  ;;  %v302_v42 = vadd.f32 %v881_v9, %v263_v33  ;;  %v303_v43 = vadd.f32 %v881_v9, %v264_v34  ;;  %v267_v44 = vmul.f32 %v687_v35, %v872_v0 }
  0x28   : > { %v333_v45 = vmax.f32 %v301_v36, 0.0  ;;  %v304_v46 = vadd.f32 %v881_v9, %v265_v37  ;;  %v305_v47 = vadd.f32 %v881_v9, %v266_v38  ;;  %v268_v48 = vmul.f32 %v688_v39, %v872_v0 }
  0x29   : > { %v334_v49 = vmax.f32 %v302_v42, 0.0  ;;  %v335_v50 = vmax.f32 %v303_v43, 0.0  ;;  %v306_v51 = vadd.f32 %v881_v9, %v267_v44  ;;  %v691_v52 = vunpack.c.l.bf16 %v796_v40 }
  0x2a   : > { %v748_v54 = vpack.c.bf16 %v333_v45, %v332_v41  ;;  %v336_v55 = vmax.f32 %v304_v46, 0.0  ;;  %v337_v56 = vmax.f32 %v305_v47, 0.0  ;;  %v307_v57 = vadd.f32 %v881_v9, %v268_v48 }
  0x2b   : > { %v753_v59 = vpack.c.bf16 %v335_v50, %v334_v49  ;;  %v338_v60 = vmax.f32 %v306_v51, 0.0  ;;  %v692_v61 = vunpack.c.h.bf16 %v796_v40  ;;  %v269_v62 = vmul.f32 %v691_v52, %v872_v0 }
  0x2c   : > { %807 = vst [vmem:[%s906_s25 + $0x40] sm:$0xff] %v748_v54   ;;  %v758_v1 = vpack.c.bf16 %v337_v56, %v336_v55  ;;  %v339_v2 = vmax.f32 %v307_v57, 0.0  ;;  %v695_v3 = vunpack.c.l.bf16 %v797_v53  ;;  %v696_v4 = vunpack.c.h.bf16 %v797_v53 }
  0x2d   : > { %808 = vst [vmem:[%s906_s25 + $0x48] sm:$0xff] %v753_v59   ;;  %v270_v5 = vmul.f32 %v692_v61, %v872_v0  ;;  %v308_v6 = vadd.f32 %v881_v9, %v269_v62  ;;  %v699_v7 = vunpack.c.l.bf16 %v798_v58  ;;  %v700_v8 = vunpack.c.h.bf16 %v798_v58 }
  0x2e   : > { %809 = vst [vmem:[%s906_s25 + $0x50] sm:$0xff] %v758_v1   ;;  %v763_v10 = vpack.c.bf16 %v339_v2, %v338_v60  ;;  %v271_v11 = vmul.f32 %v695_v3, %v872_v0  ;;  %v272_v12 = vmul.f32 %v696_v4, %v872_v0  ;;  %v703_v13 = vunpack.c.l.bf16 %v799_v63 }
  0x2f   : > { %v309_v14 = vadd.f32 %v881_v9, %v270_v5  ;;  %v340_v15 = vmax.f32 %v308_v6, 0.0  ;;  %v273_v16 = vmul.f32 %v699_v7, %v872_v0  ;;  %v274_v17 = vmul.f32 %v700_v8, %v872_v0 }
  0x30   : > { %810 = vst [vmem:[%s906_s25 + $0x58] sm:$0xff] %v763_v10   ;;  %v310_v18 = vadd.f32 %v881_v9, %v271_v11  ;;  %v311_v19 = vadd.f32 %v881_v9, %v272_v12  ;;  %v704_v20 = vunpack.c.h.bf16 %v799_v63  ;;  %v275_v21 = vmul.f32 %v703_v13, %v872_v0 }
  0x31   : > { %v341_v22 = vmax.f32 %v309_v14, 0.0  ;;  %v312_v23 = vadd.f32 %v881_v9, %v273_v16  ;;  %v313_v24 = vadd.f32 %v881_v9, %v274_v17 }
  0x32   : > { %v342_v25 = vmax.f32 %v310_v18, 0.0  ;;  %v343_v26 = vmax.f32 %v311_v19, 0.0  ;;  %v276_v27 = vmul.f32 %v704_v20, %v872_v0  ;;  %v314_v28 = vadd.f32 %v881_v9, %v275_v21 }
  0x33   : > { %v768_v29 = vpack.c.bf16 %v341_v22, %v340_v15  ;;  %v344_v30 = vmax.f32 %v312_v23, 0.0  ;;  %v345_v31 = vmax.f32 %v313_v24, 0.0 }
  0x34   : > { %v773_v32 = vpack.c.bf16 %v343_v26, %v342_v25  ;;  %v315_v33 = vadd.f32 %v881_v9, %v276_v27  ;;  %v346_v34 = vmax.f32 %v314_v28, 0.0 }
  0x35   : > { %811 = vst [vmem:[%s906_s25 + $0x60] sm:$0xff] %v768_v29   ;;  %v778_v35 = vpack.c.bf16 %v345_v31, %v344_v30 }
  0x36   : > { %812 = vst [vmem:[%s906_s25 + $0x68] sm:$0xff] %v773_v32   ;;  %v347_v36 = vmax.f32 %v315_v33, 0.0 }
  0x37   : > { %813 = vst [vmem:[%s906_s25 + $0x70] sm:$0xff] %v778_v35  }
  0x38   : > { %v783_v37 = vpack.c.bf16 %v347_v36, %v346_v34 }
  0x3a   : > { %814 = vst [vmem:[%s906_s25 + $0x78] sm:$0xff] %v783_v37  }
  0x3b PF: > { %s13_s12 = sadd.s32 1, %s829_s12  }
  0x3c   : > { %p10_p4 = scmp.ge.s32.totalorder %s13_s12, 4  }
  0x3e   :  { %12 = sbr.rel (!%p10_p4) target bundleno = 1 (0x1), region = 62 }

// kernel: _forward_impl.17
= control target key start
LH: loop header
LB: loop body
LE: loop exit
PB: predicated region body
PF: predicated region fallthrough
CT: control target
= control target key end

     0   :  { %s3891_s12 = smov 0   ;;  %s4337_s0 = inlined_call_operand.vmem [shape: bf16[2048,144], index: 0, kind: input, shape index: {}]   ;;  %s4338_s1 = inlined_call_operand.vmem [shape: bf16[144,128], index: 1, kind: input, shape index: {}]   ;;  %s4339_s2 = inlined_call_operand.vmem [shape: f32[1,128], index: 2, kind: input, shape index: {}]   ;;  %s4340_s3 = inlined_call_operand.vmem [shape: bf16[2048,128], index: 3, kind: output, shape index: {}]  }
   0x1 LB: > { %s2523_s13 = sadd.s32 4294967295, %s3868_s12   ;;  %p2527_p0 = scmp.ge.s32.totalorder %s3868_s12, 1  ;;  %s3868_s12 = sphi %s3891_s12, %s13_s12  }
   0x2   : > { %p139_p1 = scmp.lt.s32.totalorder %s3868_s12, 3 }
   0x4   : > { %p140_p2 = pnand %p2527_p0, %p139_p1 }
   0x5   : > { %v3404_v0 = vld [vmem:[%s4338_s1] sm:$0xff] (!%p140_p2)   ;;  %v3870_v1 = vmov (!%p140_p2), 0   ;;  %s2528_s16 = sshll.u32 (!%p140_p2), %s2523_s13, 7  ;;  %v3405_v2 = vld [vmem:[%s4338_s1 + $0x8] sm:$0xff] (!%p140_p2)   ;;  %v3406_v3 = vld [vmem:[%s4338_s1 + $0x10] sm:$0xff] (!%p140_p2)   ;;  %vm961_vm0 = vcmask (!%p140_p2), 130048  }
   0x6   : > { %143 = sbr.rel (%p140_p2) target bundleno = 521 (0x209), region = 32  ;;  %1154 = vmatprep.subr.bf16.mxu0 (!%p140_p2), %v3870_v1  ;;  %3377 = vmatprep.subr.bf16.mxu1 (!%p140_p2), %v3870_v1  ;;  %p165_p3 = scmp.lt.s32.totalorder (!%p140_p2), %s2528_s16, 255  ;;  %v3407_v4 = vld [vmem:[%s4338_s1 + $0x18] sm:$0xff] (!%p140_p2)   ;;  %v3408_v7 = vld [vmem:[%s4338_s1 + $0x20] sm:$0xff] (!%p140_p2)   ;;  %v3409_v8 = vld [vmem:[%s4338_s1 + $0x28] sm:$0xff] (!%p140_p2)  }
   0x7   : > { %1155 = vmatpush1.bf16.msra.mxu0 (!%p140_p2), %v3404_v0  ;;  %3386 = vmatpush1.bf16.msra.mxu1 (!%p140_p2), %v3404_v0  ;;  %v3410_v9 = vld [vmem:[%s4338_s1 + $0x30] sm:$0xff] (!%p140_p2)   ;;  %v3411_v10 = vld [vmem:[%s4338_s1 + $0x38] sm:$0xff] (!%p140_p2)   ;;  %v3412_v11 = vld [vmem:[%s4338_s1 + $0x40] sm:$0xff] (!%p140_p2)  }
   0x8   : > { %1156 = vmatprep.subr.bf16.mxu0 (!%p140_p2), %v3870_v1  ;;  %3378 = vmatprep.subr.bf16.mxu1 (!%p140_p2), %v3870_v1 }
   0xb   : > { %1157 = vmatpush1.bf16.msra.mxu0 (!%p140_p2), %v3405_v2  ;;  %3387 = vmatpush1.bf16.msra.mxu1 (!%p140_p2), %v3405_v2 }
   0xc   : > { %1158 = vmatprep.subr.bf16.mxu0 (!%p140_p2), %v3870_v1  ;;  %3379 = vmatprep.subr.bf16.mxu1 (!%p140_p2), %v3870_v1 }
   0xd   : > { %s4342_s16 = smov (!%p165_p3, %s2528_s16), 255 }
   0xe   : > { %s2865_s21 = sshll.u32 %s4342_s16, 3  ;;  %s2532_s13 = sshll.u32 %s4342_s16, 2 }
   0xf   : > { %s3914_s24 = scalar_lea.vmem %s4337_s0, %s2865_s21  ;;  %1159 = vmatpush1.bf16.msra.mxu0 %v3406_v3  ;;  %3388 = vmatpush1.bf16.msra.mxu1 %v3406_v3  ;;  %s4129_s17 = scalar_lea.vmem %s4340_s3, %s2532_s13 }
  0x10   : > { %v3415_v5 = vld [vmem:[%s3914_s24 + $0x4] ss:$8 sps:$4 sm:$0xff]   ;;  %1160 = vmatprep.subr.bf16.mxu0 %v3870_v1  ;;  %3380 = vmatprep.subr.bf16.mxu1 %v3870_v1  ;;  %v3413_v12 = vld [vmem:[%s3914_s24] ss:$8 sps:$4 sm:$0xff]   ;;  %v3419_v14 = vld [vmem:[%s3914_s24 + $0x14] ss:$8 sps:$4 sm:$0xff]  }
  0x11   : > { %v3418_v6 = vld [vmem:[%s3914_s24 + $0x204] ss:$8 sps:$4 sm:$0xff]   ;;  %2671 = vmatprep.mubr.msk.bf16.mxu0 %vm961_vm0, %v3415_v5  ;;  %v3416_v13 = vld [vmem:[%s3914_s24 + $0x200] ss:$8 sps:$4 sm:$0xff]   ;;  %v3421_v15 = vld [vmem:[%s3914_s24 + $0x214] ss:$8 sps:$4 sm:$0xff]  }
  0x12   : > { %2703 = vmatprep.mubr.msk.bf16.mxu1 %vm961_vm0, %v3418_v6  ;;  %v3423_v16 = vld [vmem:[%s3914_s24 + $0x10] ss:$8 sps:$4 sm:$0xff]   ;;  %v3425_v18 = vld [vmem:[%s3914_s24 + $0x24] ss:$8 sps:$4 sm:$0xff]   ;;  %v3429_v20 = vld [vmem:[%s3914_s24 + $0x20] ss:$8 sps:$4 sm:$0xff]  }
  0x13   : > { %1161 = vmatpush1.bf16.msra.mxu0 %v3407_v4  ;;  %3389 = vmatpush1.bf16.msra.mxu1 %v3407_v4  ;;  %v3424_v17 = vld [vmem:[%s3914_s24 + $0x210] ss:$8 sps:$4 sm:$0xff]   ;;  %v3427_v19 = vld [vmem:[%s3914_s24 + $0x224] ss:$8 sps:$4 sm:$0xff]   ;;  %v3430_v21 = vld [vmem:[%s3914_s24 + $0x220] ss:$8 sps:$4 sm:$0xff]  }
  0x14   : > { %1162 = vmatprep.subr.bf16.mxu0 %v3870_v1  ;;  %3381 = vmatprep.subr.bf16.mxu1 %v3870_v1  ;;  %v3431_v22 = vld [vmem:[%s3914_s24 + $0x34] ss:$8 sps:$4 sm:$0xff]   ;;  %v3435_v24 = vld [vmem:[%s3914_s24 + $0x30] ss:$8 sps:$4 sm:$0xff]   ;;  %v3437_v26 = vld [vmem:[%s3914_s24 + $0x44] ss:$8 sps:$4 sm:$0xff]  }
  0x15   : > { %v3433_v23 = vld [vmem:[%s3914_s24 + $0x234] ss:$8 sps:$4 sm:$0xff]   ;;  %v3436_v25 = vld [vmem:[%s3914_s24 + $0x230] ss:$8 sps:$4 sm:$0xff]   ;;  %v3439_v27 = vld [vmem:[%s3914_s24 + $0x244] ss:$8 sps:$4 sm:$0xff]  }
  0x16   : > { %v3441_v28 = vld [vmem:[%s3914_s24 + $0x40] ss:$8 sps:$4 sm:$0xff]   ;;  %v3443_v30 = vld [vmem:[%s3914_s24 + $0x54] ss:$8 sps:$4 sm:$0xff]   ;;  %v3447_v32 = vld [vmem:[%s3914_s24 + $0x50] ss:$8 sps:$4 sm:$0xff]  }
  0x17   : > { %1163 = vmatpush1.bf16.msra.mxu0 %v3408_v7  ;;  %3390 = vmatpush1.bf16.msra.mxu1 %v3408_v7  ;;  %v3442_v29 = vld [vmem:[%s3914_s24 + $0x240] ss:$8 sps:$4 sm:$0xff]   ;;  %v3445_v31 = vld [vmem:[%s3914_s24 + $0x254] ss:$8 sps:$4 sm:$0xff]   ;;  %v3448_v33 = vld [vmem:[%s3914_s24 + $0x250] ss:$8 sps:$4 sm:$0xff]  }
  0x18   : > { %1164 = vmatprep.subr.bf16.mxu0 %v3870_v1  ;;  %3382 = vmatprep.subr.bf16.mxu1 %v3870_v1  ;;  %v3449_v34 = vld [vmem:[%s3914_s24 + $0x64] ss:$8 sps:$4 sm:$0xff]   ;;  %v3453_v36 = vld [vmem:[%s3914_s24 + $0x60] ss:$8 sps:$4 sm:$0xff]   ;;  %v3455_v38 = vld [vmem:[%s3914_s24 + $0x74] ss:$8 sps:$4 sm:$0xff]  }
  0x19   : > { %v3451_v35 = vld [vmem:[%s3914_s24 + $0x264] ss:$8 sps:$4 sm:$0xff]   ;;  %v3454_v37 = vld [vmem:[%s3914_s24 + $0x260] ss:$8 sps:$4 sm:$0xff]   ;;  %v3457_v39 = vld [vmem:[%s3914_s24 + $0x274] ss:$8 sps:$4 sm:$0xff]  }
  0x1a   : > { %v3459_v40 = vld [vmem:[%s3914_s24 + $0x70] ss:$8 sps:$4 sm:$0xff]   ;;  %v3461_v42 = vld [vmem:[%s3914_s24 + $0x84] ss:$8 sps:$4 sm:$0xff]   ;;  %v3465_v44 = vld [vmem:[%s3914_s24 + $0x80] ss:$8 sps:$4 sm:$0xff]  }
  0x1b   : > { %1165 = vmatpush1.bf16.msra.mxu0 %v3409_v8  ;;  %3391 = vmatpush1.bf16.msra.mxu1 %v3409_v8  ;;  %v3460_v41 = vld [vmem:[%s3914_s24 + $0x270] ss:$8 sps:$4 sm:$0xff]   ;;  %v3463_v43 = vld [vmem:[%s3914_s24 + $0x284] ss:$8 sps:$4 sm:$0xff]   ;;  %v3466_v45 = vld [vmem:[%s3914_s24 + $0x280] ss:$8 sps:$4 sm:$0xff]  }
  0x1c   : > { %1166 = vmatprep.subr.bf16.mxu0 %v3870_v1  ;;  %3383 = vmatprep.subr.bf16.mxu1 %v3870_v1  ;;  %v3467_v46 = vld [vmem:[%s3914_s24 + $0x94] ss:$8 sps:$4 sm:$0xff]   ;;  %v3471_v48 = vld [vmem:[%s3914_s24 + $0x90] ss:$8 sps:$4 sm:$0xff]   ;;  %v3473_v50 = vld [vmem:[%s3914_s24 + $0xa4] ss:$8 sps:$4 sm:$0xff]  }
  0x1d   : > { %v3469_v47 = vld [vmem:[%s3914_s24 + $0x294] ss:$8 sps:$4 sm:$0xff]   ;;  %v3472_v49 = vld [vmem:[%s3914_s24 + $0x290] ss:$8 sps:$4 sm:$0xff]   ;;  %v3475_v51 = vld [vmem:[%s3914_s24 + $0x2a4] ss:$8 sps:$4 sm:$0xff]  }
  0x1e   : > { %v3477_v52 = vld [vmem:[%s3914_s24 + $0xa0] ss:$8 sps:$4 sm:$0xff]   ;;  %v3479_v54 = vld [vmem:[%s3914_s24 + $0xb4] ss:$8 sps:$4 sm:$0xff]   ;;  %v3483_v56 = vld [vmem:[%s3914_s24 + $0xb0] ss:$8 sps:$4 sm:$0xff]  }
  0x1f   : > { %1167 = vmatpush1.bf16.msra.mxu0 %v3410_v9  ;;  %3392 = vmatpush1.bf16.msra.mxu1 %v3410_v9  ;;  %v3478_v53 = vld [vmem:[%s3914_s24 + $0x2a0] ss:$8 sps:$4 sm:$0xff]   ;;  %v3481_v55 = vld [vmem:[%s3914_s24 + $0x2b4] ss:$8 sps:$4 sm:$0xff]   ;;  %v3484_v57 = vld [vmem:[%s3914_s24 + $0x2b0] ss:$8 sps:$4 sm:$0xff]  }
  0x20   : > { %1168 = vmatprep.subr.bf16.mxu0 %v3870_v1  ;;  %3384 = vmatprep.subr.bf16.mxu1 %v3870_v1  ;;  %v3485_v58 = vld [vmem:[%s3914_s24 + $0xc4] ss:$8 sps:$4 sm:$0xff]   ;;  %v3489_v60 = vld [vmem:[%s3914_s24 + $0xc0] ss:$8 sps:$4 sm:$0xff]   ;;  %v3491_v62 = vld [vmem:[%s3914_s24 + $0xd4] ss:$8 sps:$4 sm:$0xff]  }
  0x21   : > { %v3487_v59 = vld [vmem:[%s3914_s24 + $0x2c4] ss:$8 sps:$4 sm:$0xff]   ;;  %v3490_v61 = vld [vmem:[%s3914_s24 + $0x2c0] ss:$8 sps:$4 sm:$0xff]   ;;  %v3493_v63 = vld [vmem:[%s3914_s24 + $0x2d4] ss:$8 sps:$4 sm:$0xff]  }
  0x22   : > { %v3495_v0 = vld [vmem:[%s3914_s24 + $0xd0] ss:$8 sps:$4 sm:$0xff]   ;;  %v3497_v2 = vld [vmem:[%s3914_s24 + $0xe4] ss:$8 sps:$4 sm:$0xff]   ;;  %v3501_v4 = vld [vmem:[%s3914_s24 + $0xe0] ss:$8 sps:$4 sm:$0xff]  }
  0x23   : > { %1169 = vmatpush1.bf16.msra.mxu0 %v3411_v10  ;;  %3393 = vmatpush1.bf16.msra.mxu1 %v3411_v10  ;;  %v3499_v3 = vld [vmem:[%s3914_s24 + $0x2e4] ss:$8 sps:$4 sm:$0xff]   ;;  %v3502_v5 = vld [vmem:[%s3914_s24 + $0x2e0] ss:$8 sps:$4 sm:$0xff]   ;;  %v3503_v6 = vld [vmem:[%s3914_s24 + $0xf4] ss:$8 sps:$4 sm:$0xff]  }
  0x24   : > { %1170 = vmatprep.subr.bf16.mxu0 %v3870_v1  ;;  %3385 = vmatprep.subr.bf16.mxu1 %v3870_v1  ;;  %v3496_v1 = vld [vmem:[%s3914_s24 + $0x2d0] ss:$8 sps:$4 sm:$0xff]   ;;  %v3505_v7 = vld [vmem:[%s3914_s24 + $0x2f4] ss:$8 sps:$4 sm:$0xff]   ;;  %v3509_v10 = vld [vmem:[%s3914_s24 + $0x104] ss:$8 sps:$4 sm:$0xff]  }
  0x25   : > { %v3507_v8 = vld [vmem:[%s3914_s24 + $0xf0] ss:$8 sps:$4 sm:$0xff]  }
  0x26   : > { %v3508_v9 = vld [vmem:[%s3914_s24 + $0x2f0] ss:$8 sps:$4 sm:$0xff]  }
  0x27   : > { %1171 = vmatpush1.bf16.msra.mxu0 %v3412_v11  ;;  %3394 = vmatpush1.bf16.msra.mxu1 %v3412_v11  ;;  %v3511_v11 = vld [vmem:[%s3914_s24 + $0x304] ss:$8 sps:$4 sm:$0xff]  }
  0x2a   : > { %1187 = vmatmul.mubr.bf16.vlgmr.msra.gmra.mrb[0].mxu0 %v3413_v12  ;;  %1443 = vmatmul.mubr.bf16.vlgmr.msra.gmra.mrb[0].mxu1 %v3416_v13  ;;  %v3513_v12 = vld [vmem:[%s3914_s24 + $0x100] ss:$8 sps:$4 sm:$0xff]  }
  0x2b   : > { %2672 = vmatprep.mubr.msk.bf16.mxu0 %vm961_vm0, %v3419_v14  ;;  %2704 = vmatprep.mubr.msk.bf16.mxu1 %vm961_vm0, %v3421_v15  ;;  %v3514_v13 = vld [vmem:[%s3914_s24 + $0x300] ss:$8 sps:$4 sm:$0xff]   ;;  %v3515_v14 = vld [vmem:[%s3914_s24 + $0x114] ss:$8 sps:$4 sm:$0xff]  }
  0x2c   : > { %v3517_v15 = vld [vmem:[%s3914_s24 + $0x314] ss:$8 sps:$4 sm:$0xff]  }
  0x32   : > { %1195 = vmatmul.mubr.bf16.gmra.mrb[4].mxu0 %v3423_v16  ;;  %1451 = vmatmul.mubr.bf16.gmra.mrb[4].mxu1 %v3424_v17  ;;  %v3519_v16 = vld [vmem:[%s3914_s24 + $0x110] ss:$8 sps:$4 sm:$0xff]  }
  0x33   : > { %2673 = vmatprep.mubr.msk.bf16.mxu0 %vm961_vm0, %v3425_v18  ;;  %2705 = vmatprep.mubr.msk.bf16.mxu1 %vm961_vm0, %v3427_v19  ;;  %v3520_v17 = vld [vmem:[%s3914_s24 + $0x310] ss:$8 sps:$4 sm:$0xff]   ;;  %v3521_v18 = vld [vmem:[%s3914_s24 + $0x124] ss:$8 sps:$4 sm:$0xff]  }
  0x34   : > { %v3523_v19 = vld [vmem:[%s3914_s24 + $0x324] ss:$8 sps:$4 sm:$0xff]  }
  0x3a   : > { %1203 = vmatmul.mubr.bf16.gmra.mrb[8].mxu0 %v3429_v20  ;;  %1459 = vmatmul.mubr.bf16.gmra.mrb[8].mxu1 %v3430_v21  ;;  %v3525_v20 = vld [vmem:[%s3914_s24 + $0x120] ss:$8 sps:$4 sm:$0xff]  }
  0x3b   : > { %2674 = vmatprep.mubr.msk.bf16.mxu0 %vm961_vm0, %v3431_v22  ;;  %2706 = vmatprep.mubr.msk.bf16.mxu1 %vm961_vm0, %v3433_v23  ;;  %v3526_v21 = vld [vmem:[%s3914_s24 + $0x320] ss:$8 sps:$4 sm:$0xff]   ;;  %v3527_v22 = vld [vmem:[%s3914_s24 + $0x134] ss:$8 sps:$4 sm:$0xff]  }
  0x3c   : > { %v3529_v23 = vld [vmem:[%s3914_s24 + $0x334] ss:$8 sps:$4 sm:$0xff]  }
  0x42   : > { %1211 = vmatmul.mubr.bf16.gmra.mrb[12].mxu0 %v3435_v24  ;;  %1467 = vmatmul.mubr.bf16.gmra.mrb[12].mxu1 %v3436_v25  ;;  %v3531_v24 = vld [vmem:[%s3914_s24 + $0x130] ss:$8 sps:$4 sm:$0xff]  }
  0x43   : > { %2675 = vmatprep.mubr.msk.bf16.mxu0 %vm961_vm0, %v3437_v26  ;;  %2707 = vmatprep.mubr.msk.bf16.mxu1 %vm961_vm0, %v3439_v27  ;;  %v3532_v25 = vld [vmem:[%s3914_s24 + $0x330] ss:$8 sps:$4 sm:$0xff]   ;;  %v3533_v26 = vld [vmem:[%s3914_s24 + $0x144] ss:$8 sps:$4 sm:$0xff]  }
  0x44   : > { %v3535_v27 = vld [vmem:[%s3914_s24 + $0x344] ss:$8 sps:$4 sm:$0xff]  }
  0x4a   : > { %1219 = vmatmul.mubr.bf16.gmra.mrb[16].mxu0 %v3441_v28  ;;  %1475 = vmatmul.mubr.bf16.gmra.mrb[16].mxu1 %v3442_v29  ;;  %v3537_v28 = vld [vmem:[%s3914_s24 + $0x140] ss:$8 sps:$4 sm:$0xff]  }
  0x4b   : > { %2676 = vmatprep.mubr.msk.bf16.mxu0 %vm961_vm0, %v3443_v30  ;;  %2708 = vmatprep.mubr.msk.bf16.mxu1 %vm961_vm0, %v3445_v31  ;;  %v3538_v29 = vld [vmem:[%s3914_s24 + $0x340] ss:$8 sps:$4 sm:$0xff]   ;;  %v3539_v30 = vld [vmem:[%s3914_s24 + $0x154] ss:$8 sps:$4 sm:$0xff]  }
  0x4c   : > { %v3541_v31 = vld [vmem:[%s3914_s24 + $0x354] ss:$8 sps:$4 sm:$0xff]  }
  0x52   : > { %1227 = vmatmul.mubr.bf16.gmra.mrb[20].mxu0 %v3447_v32  ;;  %1483 = vmatmul.mubr.bf16.gmra.mrb[20].mxu1 %v3448_v33  ;;  %v3543_v32 = vld [vmem:[%s3914_s24 + $0x150] ss:$8 sps:$4 sm:$0xff]  }
  0x53   : > { %2677 = vmatprep.mubr.msk.bf16.mxu0 %vm961_vm0, %v3449_v34  ;;  %2709 = vmatprep.mubr.msk.bf16.mxu1 %vm961_vm0, %v3451_v35  ;;  %v3544_v33 = vld [vmem:[%s3914_s24 + $0x350] ss:$8 sps:$4 sm:$0xff]   ;;  %v3545_v34 = vld [vmem:[%s3914_s24 + $0x164] ss:$8 sps:$4 sm:$0xff]  }
  0x54   : > { %v3547_v35 = vld [vmem:[%s3914_s24 + $0x364] ss:$8 sps:$4 sm:$0xff]  }
  0x5a   : > { %1235 = vmatmul.mubr.bf16.gmra.mrb[24].mxu0 %v3453_v36  ;;  %1491 = vmatmul.mubr.bf16.gmra.mrb[24].mxu1 %v3454_v37  ;;  %v3549_v36 = vld [vmem:[%s3914_s24 + $0x160] ss:$8 sps:$4 sm:$0xff]  }
  0x5b   : > { %2678 = vmatprep.mubr.msk.bf16.mxu0 %vm961_vm0, %v3455_v38  ;;  %2710 = vmatprep.mubr.msk.bf16.mxu1 %vm961_vm0, %v3457_v39  ;;  %v3550_v37 = vld [vmem:[%s3914_s24 + $0x360] ss:$8 sps:$4 sm:$0xff]   ;;  %v3551_v38 = vld [vmem:[%s3914_s24 + $0x174] ss:$8 sps:$4 sm:$0xff]  }
  0x5c   : > { %v3553_v39 = vld [vmem:[%s3914_s24 + $0x374] ss:$8 sps:$4 sm:$0xff]  }
  0x62   : > { %1243 = vmatmul.mubr.bf16.gmra.mrb[28].mxu0 %v3459_v40  ;;  %1499 = vmatmul.mubr.bf16.gmra.mrb[28].mxu1 %v3460_v41  ;;  %v3555_v40 = vld [vmem:[%s3914_s24 + $0x170] ss:$8 sps:$4 sm:$0xff]  }
  0x63   : > { %2679 = vmatprep.mubr.msk.bf16.mxu0 %vm961_vm0, %v3461_v42  ;;  %2711 = vmatprep.mubr.msk.bf16.mxu1 %vm961_vm0, %v3463_v43  ;;  %v3556_v41 = vld [vmem:[%s3914_s24 + $0x370] ss:$8 sps:$4 sm:$0xff]   ;;  %v3557_v42 = vld [vmem:[%s3914_s24 + $0x184] ss:$8 sps:$4 sm:$0xff]  }
  0x64   : > { %v3559_v43 = vld [vmem:[%s3914_s24 + $0x384] ss:$8 sps:$4 sm:$0xff]  }
  0x6a   : > { %1251 = vmatmul.mubr.bf16.gmra.mrb[32].mxu0 %v3465_v44  ;;  %1507 = vmatmul.mubr.bf16.gmra.mrb[32].mxu1 %v3466_v45  ;;  %v3561_v44 = vld [vmem:[%s3914_s24 + $0x180] ss:$8 sps:$4 sm:$0xff]  }
  0x6b   : > { %2680 = vmatprep.mubr.msk.bf16.mxu0 %vm961_vm0, %v3467_v46  ;;  %2712 = vmatprep.mubr.msk.bf16.mxu1 %vm961_vm0, %v3469_v47  ;;  %v3562_v45 = vld [vmem:[%s3914_s24 + $0x380] ss:$8 sps:$4 sm:$0xff]   ;;  %v3563_v46 = vld [vmem:[%s3914_s24 + $0x194] ss:$8 sps:$4 sm:$0xff]  }
  0x6c   : > { %v3565_v47 = vld [vmem:[%s3914_s24 + $0x394] ss:$8 sps:$4 sm:$0xff]  }
  0x72   : > { %1259 = vmatmul.mubr.bf16.gmra.mrb[36].mxu0 %v3471_v48  ;;  %1515 = vmatmul.mubr.bf16.gmra.mrb[36].mxu1 %v3472_v49  ;;  %v3567_v48 = vld [vmem:[%s3914_s24 + $0x190] ss:$8 sps:$4 sm:$0xff]  }
  0x73   : > { %2681 = vmatprep.mubr.msk.bf16.mxu0 %vm961_vm0, %v3473_v50  ;;  %2713 = vmatprep.mubr.msk.bf16.mxu1 %vm961_vm0, %v3475_v51  ;;  %v3568_v49 = vld [vmem:[%s3914_s24 + $0x390] ss:$8 sps:$4 sm:$0xff]   ;;  %v3569_v50 = vld [vmem:[%s3914_s24 + $0x1a4] ss:$8 sps:$4 sm:$0xff]  }
  0x74   : > { %v3571_v51 = vld [vmem:[%s3914_s24 + $0x3a4] ss:$8 sps:$4 sm:$0xff]  }
  0x7a   : > { %1267 = vmatmul.mubr.bf16.gmra.mrb[40].mxu0 %v3477_v52  ;;  %1523 = vmatmul.mubr.bf16.gmra.mrb[40].mxu1 %v3478_v53  ;;  %v3573_v52 = vld [vmem:[%s3914_s24 + $0x1a0] ss:$8 sps:$4 sm:$0xff]  }
  0x7b   : > { %2682 = vmatprep.mubr.msk.bf16.mxu0 %vm961_vm0, %v3479_v54  ;;  %2714 = vmatprep.mubr.msk.bf16.mxu1 %vm961_vm0, %v3481_v55  ;;  %v3574_v53 = vld [vmem:[%s3914_s24 + $0x3a0] ss:$8 sps:$4 sm:$0xff]   ;;  %v3575_v54 = vld [vmem:[%s3914_s24 + $0x1b4] ss:$8 sps:$4 sm:$0xff]  }
  0x7c   : > { %v3577_v55 = vld [vmem:[%s3914_s24 + $0x3b4] ss:$8 sps:$4 sm:$0xff]  }
  0x82   : > { %1275 = vmatmul.mubr.bf16.gmra.mrb[44].mxu0 %v3483_v56  ;;  %1531 = vmatmul.mubr.bf16.gmra.mrb[44].mxu1 %v3484_v57  ;;  %v4101_v56 = vld [vmem:[%s4339_s2] ss:$0 sm:$0xff] }
  0x83   : > { %2683 = vmatprep.mubr.msk.bf16.mxu0 %vm961_vm0, %v3485_v58  ;;  %2715 = vmatprep.mubr.msk.bf16.mxu1 %vm961_vm0, %v3487_v59 }
  0x8a   : > { %1283 = vmatmul.mubr.bf16.gmra.mrb[48].mxu0 %v3489_v60  ;;  %1539 = vmatmul.mubr.bf16.gmra.mrb[48].mxu1 %v3490_v61 }
  0x8b   : > { %2684 = vmatprep.mubr.msk.bf16.mxu0 %vm961_vm0, %v3491_v62  ;;  %2716 = vmatprep.mubr.msk.bf16.mxu1 %vm961_vm0, %v3493_v63  ;;  %v3579_v63 = vld [vmem:[%s3914_s24 + $0x1b0] ss:$8 sps:$4 sm:$0xff]  }
  0x92   : > { %1291 = vmatmul.mubr.bf16.gmra.mrb[52].mxu0 %v3495_v0  ;;  %1547 = vmatmul.mubr.bf16.gmra.mrb[52].mxu1 %v3496_v1  ;;  %v3580_v0 = vld [vmem:[%s3914_s24 + $0x3b0] ss:$8 sps:$4 sm:$0xff]  }
  0x93   : > { %2685 = vmatprep.mubr.msk.bf16.mxu0 %vm961_vm0, %v3497_v2  ;;  %2717 = vmatprep.mubr.msk.bf16.mxu1 %vm961_vm0, %v3499_v3  ;;  %v3581_v3 = vld [vmem:[%s3914_s24 + $0x1c4] ss:$8 sps:$4 sm:$0xff]  }
  0x9a   : > { %1299 = vmatmul.mubr.bf16.gmra.mrb[56].mxu0 %v3501_v4  ;;  %1555 = vmatmul.mubr.bf16.gmra.mrb[56].mxu1 %v3502_v5  ;;  %v3583_v4 = vld [vmem:[%s3914_s24 + $0x3c4] ss:$8 sps:$4 sm:$0xff]  }
  0x9b   : > { %2686 = vmatprep.mubr.msk.bf16.mxu0 %vm961_vm0, %v3503_v6  ;;  %2718 = vmatprep.mubr.msk.bf16.mxu1 %vm961_vm0, %v3505_v7 }
  0xa2   : > { %1307 = vmatmul.mubr.bf16.gmra.mrb[60].mxu0 %v3507_v8  ;;  %1563 = vmatmul.mubr.bf16.gmra.mrb[60].mxu1 %v3508_v9 }
  0xa3   : > { %2687 = vmatprep.mubr.msk.bf16.mxu0 %vm961_vm0, %v3509_v10  ;;  %2719 = vmatprep.mubr.msk.bf16.mxu1 %vm961_vm0, %v3511_v11 }
  0xaa   : > { %1315 = vmatmul.mubr.bf16.gmra.mrb[64].mxu0 %v3513_v12  ;;  %1571 = vmatmul.mubr.bf16.gmra.mrb[64].mxu1 %v3514_v13 }
  0xab   : > { %2688 = vmatprep.mubr.msk.bf16.mxu0 %vm961_vm0, %v3515_v14  ;;  %2720 = vmatprep.mubr.msk.bf16.mxu1 %vm961_vm0, %v3517_v15  ;;  %v3585_v15 = vld [vmem:[%s3914_s24 + $0x1c0] ss:$8 sps:$4 sm:$0xff]  }
  0xb2   : > { %1323 = vmatmul.mubr.bf16.gmra.mrb[68].mxu0 %v3519_v16  ;;  %1579 = vmatmul.mubr.bf16.gmra.mrb[68].mxu1 %v3520_v17  ;;  %v3586_v16 = vld [vmem:[%s3914_s24 + $0x3c0] ss:$8 sps:$4 sm:$0xff]  }
  0xb3   : > { %2689 = vmatprep.mubr.msk.bf16.mxu0 %vm961_vm0, %v3521_v18  ;;  %2721 = vmatprep.mubr.msk.bf16.mxu1 %vm961_vm0, %v3523_v19  ;;  %v3587_v19 = vld [vmem:[%s3914_s24 + $0x1d4] ss:$8 sps:$4 sm:$0xff]  }
  0xba   : > { %1331 = vmatmul.mubr.bf16.gmra.mrb[72].mxu0 %v3525_v20  ;;  %1587 = vmatmul.mubr.bf16.gmra.mrb[72].mxu1 %v3526_v21  ;;  %v3589_v20 = vld [vmem:[%s3914_s24 + $0x3d4] ss:$8 sps:$4 sm:$0xff]  }
  0xbb   : > { %2690 = vmatprep.mubr.msk.bf16.mxu0 %vm961_vm0, %v3527_v22  ;;  %2722 = vmatprep.mubr.msk.bf16.mxu1 %vm961_vm0, %v3529_v23 }
  0xc2   : > { %1339 = vmatmul.mubr.bf16.gmra.mrb[76].mxu0 %v3531_v24  ;;  %1595 = vmatmul.mubr.bf16.gmra.mrb[76].mxu1 %v3532_v25 }
  0xc3   : > { %2691 = vmatprep.mubr.msk.bf16.mxu0 %vm961_vm0, %v3533_v26  ;;  %2723 = vmatprep.mubr.msk.bf16.mxu1 %vm961_vm0, %v3535_v27 }
  0xca   : > { %1347 = vmatmul.mubr.bf16.gmra.mrb[80].mxu0 %v3537_v28  ;;  %1603 = vmatmul.mubr.bf16.gmra.mrb[80].mxu1 %v3538_v29 }
  0xcb   : > { %2692 = vmatprep.mubr.msk.bf16.mxu0 %vm961_vm0, %v3539_v30  ;;  %2724 = vmatprep.mubr.msk.bf16.mxu1 %vm961_vm0, %v3541_v31 }
  0xd2   : > { %1355 = vmatmul.mubr.bf16.gmra.mrb[84].mxu0 %v3543_v32  ;;  %1611 = vmatmul.mubr.bf16.gmra.mrb[84].mxu1 %v3544_v33 }
  0xd3   : > { %2693 = vmatprep.mubr.msk.bf16.mxu0 %vm961_vm0, %v3545_v34  ;;  %2725 = vmatprep.mubr.msk.bf16.mxu1 %vm961_vm0, %v3547_v35 }
  0xda   : > { %1363 = vmatmul.mubr.bf16.gmra.mrb[88].mxu0 %v3549_v36  ;;  %1619 = vmatmul.mubr.bf16.gmra.mrb[88].mxu1 %v3550_v37  ;;  %v3591_v37 = vld [vmem:[%s3914_s24 + $0x1d0] ss:$8 sps:$4 sm:$0xff]  }
  0xdb   : > { %2694 = vmatprep.mubr.msk.bf16.mxu0 %vm961_vm0, %v3551_v38  ;;  %2726 = vmatprep.mubr.msk.bf16.mxu1 %vm961_vm0, %v3553_v39  ;;  %v3592_v38 = vld [vmem:[%s3914_s24 + $0x3d0] ss:$8 sps:$4 sm:$0xff]  }
  0xe2   : > { %1371 = vmatmul.mubr.bf16.gmra.mrb[92].mxu0 %v3555_v40  ;;  %1627 = vmatmul.mubr.bf16.gmra.mrb[92].mxu1 %v3556_v41  ;;  %v3593_v41 = vld [vmem:[%s3914_s24 + $0x1e4] ss:$8 sps:$4 sm:$0xff]  }
  0xe3   : > { %2695 = vmatprep.mubr.msk.bf16.mxu0 %vm961_vm0, %v3557_v42  ;;  %2727 = vmatprep.mubr.msk.bf16.mxu1 %vm961_vm0, %v3559_v43  ;;  %v3595_v42 = vld [vmem:[%s3914_s24 + $0x3e4] ss:$8 sps:$4 sm:$0xff]  }
  0xea   : > { %1379 = vmatmul.mubr.bf16.gmra.mrb[96].mxu0 %v3561_v44  ;;  %1635 = vmatmul.mubr.bf16.gmra.mrb[96].mxu1 %v3562_v45 }
  0xeb   : > { %2696 = vmatprep.mubr.msk.bf16.mxu0 %vm961_vm0, %v3563_v46  ;;  %2728 = vmatprep.mubr.msk.bf16.mxu1 %vm961_vm0, %v3565_v47 }
  0xf2   : > { %1387 = vmatmul.mubr.bf16.gmra.mrb[100].mxu0 %v3567_v48  ;;  %1643 = vmatmul.mubr.bf16.gmra.mrb[100].mxu1 %v3568_v49 }
  0xf3   : > { %2697 = vmatprep.mubr.msk.bf16.mxu0 %vm961_vm0, %v3569_v50  ;;  %2729 = vmatprep.mubr.msk.bf16.mxu1 %vm961_vm0, %v3571_v51 }
  0xfa   : > { %1395 = vmatmul.mubr.bf16.gmra.mrb[104].mxu0 %v3573_v52  ;;  %1651 = vmatmul.mubr.bf16.gmra.mrb[104].mxu1 %v3574_v53 }
  0xfb   : > { %2698 = vmatprep.mubr.msk.bf16.mxu0 %vm961_vm0, %v3575_v54  ;;  %2730 = vmatprep.mubr.msk.bf16.mxu1 %vm961_vm0, %v3577_v55 }
  0xfd   : > { %v1188_v57 = vpop.f32.mrb[0].mxu0  ;;  %v1444_v58 = vpop.f32.mrb[0].mxu1 }
  0xfe   : > { %v1189_v59 = vadd.f32 %v4101_v56, %v1188_v57  ;;  %v1445_v60 = vadd.f32 %v4101_v56, %v1444_v58  ;;  %v1190_v61 = vpop.f32.mrb[1].mxu0  ;;  %v1446_v62 = vpop.f32.mrb[1].mxu1 }
  0xff   : > { %v1191_v1 = vpop.f32.mrb[2].mxu0  ;;  %v1447_v2 = vpop.f32.mrb[2].mxu1  ;;  %v3598_v61 = vld [vmem:[%s3914_s24 + $0x3e0] ss:$8 sps:$4 sm:$0xff]  }
 0x100   : > { %3605 = vtanh.f32 %v1189_v59  ;;  %v1192_v5 = vadd.f32 %v4101_v56, %v1191_v1  ;;  %v1448_v6 = vadd.f32 %v4101_v56, %v1447_v2  ;;  %v1193_v7 = vpop.f32.mrb[3].mxu0  ;;  %v1449_v8 = vpop.f32.mrb[3].mxu1  ;;  %v3601_v1 = vld [vmem:[%s3914_s24 + $0x3f4] ss:$8 sps:$4 sm:$0xff]  }
 0x101   : > { %3607 = vtanh.f32 %v1445_v60  ;;  %v3597_v60 = vld [vmem:[%s3914_s24 + $0x1e0] ss:$8 sps:$4 sm:$0xff]  }
 0x102   : > { %3609 = vtanh.f32 %v1192_v5  ;;  %1403 = vmatmul.mubr.bf16.gmra.mrb[108].mxu0 %v3579_v63  ;;  %1659 = vmatmul.mubr.bf16.gmra.mrb[108].mxu1 %v3580_v0  ;;  %v3599_v0 = vld [vmem:[%s3914_s24 + $0x1f4] ss:$8 sps:$4 sm:$0xff]  }
 0x103   : > { %3611 = vtanh.f32 %v1448_v6  ;;  %2699 = vmatprep.mubr.msk.bf16.mxu0 %vm961_vm0, %v3581_v3  ;;  %2731 = vmatprep.mubr.msk.bf16.mxu1 %vm961_vm0, %v3583_v4 }
 0x105   : > { %v1196_v9 = vpop.f32.mrb[4].mxu0  ;;  %v1452_v10 = vpop.f32.mrb[4].mxu1 }
 0x106   : > { %v1197_v11 = vadd.f32 %v4101_v56, %v1196_v9  ;;  %v1453_v12 = vadd.f32 %v4101_v56, %v1452_v10  ;;  %v1198_v13 = vpop.f32.mrb[5].mxu0  ;;  %v1454_v14 = vpop.f32.mrb[5].mxu1 }
 0x107   : > { %v1199_v17 = vpop.f32.mrb[6].mxu0  ;;  %v1455_v18 = vpop.f32.mrb[6].mxu1 }
 0x108   : > { %3613 = vtanh.f32 %v1197_v11  ;;  %v1200_v21 = vadd.f32 %v4101_v56, %v1199_v17  ;;  %v1456_v22 = vadd.f32 %v4101_v56, %v1455_v18  ;;  %v1201_v23 = vpop.f32.mrb[7].mxu0  ;;  %v1457_v24 = vpop.f32.mrb[7].mxu1  ;;  %v3603_v18 = vld [vmem:[%s3914_s24 + $0x1f0] ss:$8 sps:$4 sm:$0xff]  }
 0x109   : > { %3615 = vtanh.f32 %v1453_v12 }
 0x10a   : > { %v3606_v25 = vpop.eup %3605  ;;  %3617 = vtanh.f32 %v1200_v21  ;;  %1411 = vmatmul.mubr.bf16.gmra.mrb[112].mxu0 %v3585_v15  ;;  %1667 = vmatmul.mubr.bf16.gmra.mrb[112].mxu1 %v3586_v16 }
 0x10b   : > { %v3608_v26 = vpop.eup %3607  ;;  %3619 = vtanh.f32 %v1456_v22  ;;  %2700 = vmatprep.mubr.msk.bf16.mxu0 %vm961_vm0, %v3587_v19  ;;  %2732 = vmatprep.mubr.msk.bf16.mxu1 %vm961_vm0, %v3589_v20  ;;  %v3604_v19 = vld [vmem:[%s3914_s24 + $0x3f0] ss:$8 sps:$4 sm:$0xff]  }
 0x10c   : > { %v3610_v27 = vpop.eup %3609 }
 0x10d   : > { %v3612_v28 = vpop.eup %3611  ;;  %v2997_v29 = vpack.c.bf16 %v3610_v27, %v3606_v25  ;;  %v1204_v30 = vpop.f32.mrb[8].mxu0 }
 0x10e   : > { %v1460_v31 = vpop.f32.mrb[8].mxu1  ;;  %v3157_v32 = vpack.c.bf16 %v3612_v28, %v3608_v26  ;;  %v1205_v33 = vadd.f32 %v4101_v56, %v1204_v30  ;;  %v1206_v35 = vpop.f32.mrb[9].mxu0 }
 0x10f   : > { %v1461_v34 = vadd.f32 %v4101_v56, %v1460_v31  ;;  %v1462_v36 = vpop.f32.mrb[9].mxu1  ;;  %2998 = vst [vmem:[%s4129_s17] sm:$0xff] %v2997_v29   ;;  %v1207_v39 = vpop.f32.mrb[10].mxu0 }
 0x110   : > { %v1463_v40 = vpop.f32.mrb[10].mxu1  ;;  %3345 = vst [vmem:[%s4129_s17 + $0x100] sm:$0xff] %v3157_v32   ;;  %3621 = vtanh.f32 %v1205_v33  ;;  %v1208_v43 = vadd.f32 %v4101_v56, %v1207_v39  ;;  %v1209_v45 = vpop.f32.mrb[11].mxu0 }
 0x111   : > { %v1464_v44 = vadd.f32 %v4101_v56, %v1463_v40  ;;  %v1465_v46 = vpop.f32.mrb[11].mxu1  ;;  %3623 = vtanh.f32 %v1461_v34 }
 0x112   : > { %v3614_v47 = vpop.eup %3613  ;;  %3625 = vtanh.f32 %v1208_v43  ;;  %1419 = vmatmul.mubr.bf16.gmra.mrb[116].mxu0 %v3591_v37  ;;  %1675 = vmatmul.mubr.bf16.gmra.mrb[116].mxu1 %v3592_v38 }
 0x113   : > { %v3616_v48 = vpop.eup %3615  ;;  %3627 = vtanh.f32 %v1464_v44  ;;  %2701 = vmatprep.mubr.msk.bf16.mxu0 %vm961_vm0, %v3593_v41  ;;  %2733 = vmatprep.mubr.msk.bf16.mxu1 %vm961_vm0, %v3595_v42 }
 0x114   : > { %v3618_v49 = vpop.eup %3617 }
 0x115   : > { %v3620_v50 = vpop.eup %3619  ;;  %v3002_v51 = vpack.c.bf16 %v3618_v49, %v3614_v47  ;;  %v1212_v52 = vpop.f32.mrb[12].mxu0 }
 0x116   : > { %v1468_v53 = vpop.f32.mrb[12].mxu1  ;;  %v3162_v54 = vpack.c.bf16 %v3620_v50, %v3616_v48  ;;  %v1213_v55 = vadd.f32 %v4101_v56, %v1212_v52  ;;  %v1214_v58 = vpop.f32.mrb[13].mxu0 }
 0x117   : > { %v1469_v57 = vadd.f32 %v4101_v56, %v1468_v53  ;;  %v1470_v59 = vpop.f32.mrb[13].mxu1  ;;  %3314 = vst [vmem:[%s4129_s17 + $0x8] sm:$0xff] %v3002_v51   ;;  %v1215_v62 = vpop.f32.mrb[14].mxu0 }
 0x118   : > { %v1471_v63 = vpop.f32.mrb[14].mxu1  ;;  %3346 = vst [vmem:[%s4129_s17 + $0x108] sm:$0xff] %v3162_v54   ;;  %3629 = vtanh.f32 %v1213_v55  ;;  %v1216_v2 = vadd.f32 %v4101_v56, %v1215_v62  ;;  %v1217_v4 = vpop.f32.mrb[15].mxu0 }
 0x119   : > { %v1472_v3 = vadd.f32 %v4101_v56, %v1471_v63  ;;  %v1473_v5 = vpop.f32.mrb[15].mxu1  ;;  %3631 = vtanh.f32 %v1469_v57 }
 0x11a   : > { %v3622_v6 = vpop.eup %3621  ;;  %3633 = vtanh.f32 %v1216_v2  ;;  %1427 = vmatmul.mubr.bf16.gmra.mrb[120].mxu0 %v3597_v60  ;;  %1683 = vmatmul.mubr.bf16.gmra.mrb[120].mxu1 %v3598_v61 }
 0x11b   : > { %v3624_v7 = vpop.eup %3623  ;;  %3635 = vtanh.f32 %v1472_v3  ;;  %2702 = vmatprep.mubr.msk.bf16.mxu0 %vm961_vm0, %v3599_v0  ;;  %2734 = vmatprep.mubr.msk.bf16.mxu1 %vm961_vm0, %v3601_v1 }
 0x11c   : > { %v3626_v8 = vpop.eup %3625 }
 0x11d   : > { %v3628_v9 = vpop.eup %3627  ;;  %v3007_v10 = vpack.c.bf16 %v3626_v8, %v3622_v6  ;;  %v1220_v11 = vpop.f32.mrb[16].mxu0 }
 0x11e   : > { %v1476_v12 = vpop.f32.mrb[16].mxu1  ;;  %v3167_v13 = vpack.c.bf16 %v3628_v9, %v3624_v7  ;;  %v1221_v14 = vadd.f32 %v4101_v56, %v1220_v11  ;;  %v1222_v16 = vpop.f32.mrb[17].mxu0 }
 0x11f   : > { %v1477_v15 = vadd.f32 %v4101_v56, %v1476_v12  ;;  %v1478_v17 = vpop.f32.mrb[17].mxu1  ;;  %3315 = vst [vmem:[%s4129_s17 + $0x10] sm:$0xff] %v3007_v10   ;;  %v1223_v20 = vpop.f32.mrb[18].mxu0 }
 0x120   : > { %v1479_v21 = vpop.f32.mrb[18].mxu1  ;;  %3347 = vst [vmem:[%s4129_s17 + $0x110] sm:$0xff] %v3167_v13   ;;  %3637 = vtanh.f32 %v1221_v14  ;;  %v1224_v22 = vadd.f32 %v4101_v56, %v1223_v20  ;;  %v1225_v24 = vpop.f32.mrb[19].mxu0 }
 0x121   : > { %v1480_v23 = vadd.f32 %v4101_v56, %v1479_v21  ;;  %v1481_v25 = vpop.f32.mrb[19].mxu1  ;;  %3639 = vtanh.f32 %v1477_v15 }
 0x122   : > { %v3630_v26 = vpop.eup %3629  ;;  %3641 = vtanh.f32 %v1224_v22  ;;  %1435 = vmatmul.mubr.bf16.gmra.mrb[124].mxu0 %v3603_v18  ;;  %1691 = vmatmul.mubr.bf16.gmra.mrb[124].mxu1 %v3604_v19 }
 0x123   : > { %v3632_v27 = vpop.eup %3631  ;;  %3643 = vtanh.f32 %v1480_v23 }
 0x124   : > { %v3634_v28 = vpop.eup %3633 }
 0x125   : > { %v3636_v29 = vpop.eup %3635  ;;  %v3012_v30 = vpack.c.bf16 %v3634_v28, %v3630_v26  ;;  %v1228_v31 = vpop.f32.mrb[20].mxu0 }
 0x126   : > { %v1484_v32 = vpop.f32.mrb[20].mxu1  ;;  %v3172_v33 = vpack.c.bf16 %v3636_v29, %v3632_v27  ;;  %v1229_v34 = vadd.f32 %v4101_v56, %v1228_v31  ;;  %v1230_v36 = vpop.f32.mrb[21].mxu0 }
 0x127   : > { %v1485_v35 = vadd.f32 %v4101_v56, %v1484_v32  ;;  %v1486_v37 = vpop.f32.mrb[21].mxu1  ;;  %3316 = vst [vmem:[%s4129_s17 + $0x18] sm:$0xff] %v3012_v30   ;;  %v1231_v38 = vpop.f32.mrb[22].mxu0 }
 0x128   : > { %v1487_v39 = vpop.f32.mrb[22].mxu1  ;;  %3348 = vst [vmem:[%s4129_s17 + $0x118] sm:$0xff] %v3172_v33   ;;  %3645 = vtanh.f32 %v1229_v34  ;;  %v1232_v40 = vadd.f32 %v4101_v56, %v1231_v38  ;;  %v1233_v42 = vpop.f32.mrb[23].mxu0 }
 0x129   : > { %v1488_v41 = vadd.f32 %v4101_v56, %v1487_v39  ;;  %v1489_v43 = vpop.f32.mrb[23].mxu1  ;;  %3647 = vtanh.f32 %v1485_v35 }
 0x12a   : > { %v3638_v44 = vpop.eup %3637  ;;  %3649 = vtanh.f32 %v1232_v40 }
 0x12b   : > { %v3640_v45 = vpop.eup %3639  ;;  %3651 = vtanh.f32 %v1488_v41 }
 0x12c   : > { %v3642_v46 = vpop.eup %3641 }
 0x12d   : > { %v3644_v47 = vpop.eup %3643  ;;  %v3017_v48 = vpack.c.bf16 %v3642_v46, %v3638_v44  ;;  %v1236_v49 = vpop.f32.mrb[24].mxu0 }
 0x12e   : > { %v1492_v50 = vpop.f32.mrb[24].mxu1  ;;  %v3177_v51 = vpack.c.bf16 %v3644_v47, %v3640_v45  ;;  %v1237_v52 = vadd.f32 %v4101_v56, %v1236_v49  ;;  %v1238_v54 = vpop.f32.mrb[25].mxu0 }
 0x12f   : > { %v1493_v53 = vadd.f32 %v4101_v56, %v1492_v50  ;;  %v1494_v55 = vpop.f32.mrb[25].mxu1  ;;  %3317 = vst [vmem:[%s4129_s17 + $0x20] sm:$0xff] %v3017_v48   ;;  %v1239_v57 = vpop.f32.mrb[26].mxu0 }
 0x130   : > { %v1495_v58 = vpop.f32.mrb[26].mxu1  ;;  %3349 = vst [vmem:[%s4129_s17 + $0x120] sm:$0xff] %v3177_v51   ;;  %3653 = vtanh.f32 %v1237_v52  ;;  %v1240_v59 = vadd.f32 %v4101_v56, %v1239_v57  ;;  %v1241_v61 = vpop.f32.mrb[27].mxu0 }
 0x131   : > { %v1496_v60 = vadd.f32 %v4101_v56, %v1495_v58  ;;  %v1497_v62 = vpop.f32.mrb[27].mxu1  ;;  %3655 = vtanh.f32 %v1493_v53 }
 0x132   : > { %v3646_v63 = vpop.eup %3645  ;;  %3657 = vtanh.f32 %v1240_v59 }
 0x133   : > { %v3648_v0 = vpop.eup %3647  ;;  %3659 = vtanh.f32 %v1496_v60 }
 0x134   : > { %v3650_v1 = vpop.eup %3649 }
 0x135   : > { %v3652_v2 = vpop.eup %3651  ;;  %v3022_v3 = vpack.c.bf16 %v3650_v1, %v3646_v63  ;;  %v1244_v4 = vpop.f32.mrb[28].mxu0 }
 0x136   : > { %v1500_v5 = vpop.f32.mrb[28].mxu1  ;;  %v3182_v6 = vpack.c.bf16 %v3652_v2, %v3648_v0  ;;  %v1245_v7 = vadd.f32 %v4101_v56, %v1244_v4  ;;  %v1246_v9 = vpop.f32.mrb[29].mxu0 }
 0x137   : > { %v1501_v8 = vadd.f32 %v4101_v56, %v1500_v5  ;;  %v1502_v10 = vpop.f32.mrb[29].mxu1  ;;  %3318 = vst [vmem:[%s4129_s17 + $0x28] sm:$0xff] %v3022_v3   ;;  %v1247_v11 = vpop.f32.mrb[30].mxu0 }
 0x138   : > { %v1503_v12 = vpop.f32.mrb[30].mxu1  ;;  %3350 = vst [vmem:[%s4129_s17 + $0x128] sm:$0xff] %v3182_v6   ;;  %3661 = vtanh.f32 %v1245_v7  ;;  %v1248_v13 = vadd.f32 %v4101_v56, %v1247_v11  ;;  %v1249_v15 = vpop.f32.mrb[31].mxu0 }
 0x139   : > { %v1504_v14 = vadd.f32 %v4101_v56, %v1503_v12  ;;  %v1505_v16 = vpop.f32.mrb[31].mxu1  ;;  %3663 = vtanh.f32 %v1501_v8 }
 0x13a   : > { %v3654_v17 = vpop.eup %3653  ;;  %3665 = vtanh.f32 %v1248_v13 }
 0x13b   : > { %v3656_v18 = vpop.eup %3655  ;;  %3667 = vtanh.f32 %v1504_v14 }
 0x13c   : > { %v3658_v19 = vpop.eup %3657 }
 0x13d   : > { %v3660_v20 = vpop.eup %3659  ;;  %v3027_v21 = vpack.c.bf16 %v3658_v19, %v3654_v17  ;;  %v1252_v22 = vpop.f32.mrb[32].mxu0 }
 0x13e   : > { %v1508_v23 = vpop.f32.mrb[32].mxu1  ;;  %v3187_v24 = vpack.c.bf16 %v3660_v20, %v3656_v18  ;;  %v1253_v25 = vadd.f32 %v4101_v56, %v1252_v22  ;;  %v1254_v27 = vpop.f32.mrb[33].mxu0 }
 0x13f   : > { %v1509_v26 = vadd.f32 %v4101_v56, %v1508_v23  ;;  %v1510_v28 = vpop.f32.mrb[33].mxu1  ;;  %3319 = vst [vmem:[%s4129_s17 + $0x30] sm:$0xff] %v3027_v21   ;;  %v1255_v29 = vpop.f32.mrb[34].mxu0 }
 0x140   : > { %v1511_v30 = vpop.f32.mrb[34].mxu1  ;;  %3351 = vst [vmem:[%s4129_s17 + $0x130] sm:$0xff] %v3187_v24   ;;  %3669 = vtanh.f32 %v1253_v25  ;;  %v1256_v31 = vadd.f32 %v4101_v56, %v1255_v29  ;;  %v1257_v33 = vpop.f32.mrb[35].mxu0 }
 0x141   : > { %v1512_v32 = vadd.f32 %v4101_v56, %v1511_v30  ;;  %v1513_v34 = vpop.f32.mrb[35].mxu1  ;;  %3671 = vtanh.f32 %v1509_v26 }
 0x142   : > { %v3662_v35 = vpop.eup %3661  ;;  %3673 = vtanh.f32 %v1256_v31 }
 0x143   : > { %v3664_v36 = vpop.eup %3663  ;;  %3675 = vtanh.f32 %v1512_v32 }
 0x144   : > { %v3666_v37 = vpop.eup %3665 }
 0x145   : > { %v3668_v38 = vpop.eup %3667  ;;  %v3032_v39 = vpack.c.bf16 %v3666_v37, %v3662_v35  ;;  %v1260_v40 = vpop.f32.mrb[36].mxu0 }
 0x146   : > { %v1516_v41 = vpop.f32.mrb[36].mxu1  ;;  %v3192_v42 = vpack.c.bf16 %v3668_v38, %v3664_v36  ;;  %v1261_v43 = vadd.f32 %v4101_v56, %v1260_v40  ;;  %v1262_v45 = vpop.f32.mrb[37].mxu0 }
 0x147   : > { %v1517_v44 = vadd.f32 %v4101_v56, %v1516_v41  ;;  %v1518_v46 = vpop.f32.mrb[37].mxu1  ;;  %3320 = vst [vmem:[%s4129_s17 + $0x38] sm:$0xff] %v3032_v39   ;;  %v1263_v47 = vpop.f32.mrb[38].mxu0 }
 0x148   : > { %v1519_v48 = vpop.f32.mrb[38].mxu1  ;;  %3352 = vst [vmem:[%s4129_s17 + $0x138] sm:$0xff] %v3192_v42   ;;  %3677 = vtanh.f32 %v1261_v43  ;;  %v1264_v49 = vadd.f32 %v4101_v56, %v1263_v47  ;;  %v1265_v51 = vpop.f32.mrb[39].mxu0 }
 0x149   : > { %v1520_v50 = vadd.f32 %v4101_v56, %v1519_v48  ;;  %v1521_v52 = vpop.f32.mrb[39].mxu1  ;;  %3679 = vtanh.f32 %v1517_v44 }
 0x14a   : > { %v3670_v53 = vpop.eup %3669  ;;  %3681 = vtanh.f32 %v1264_v49 }
 0x14b   : > { %v3672_v54 = vpop.eup %3671  ;;  %3683 = vtanh.f32 %v1520_v50 }
 0x14c   : > { %v3674_v55 = vpop.eup %3673 }
 0x14d   : > { %v3676_v57 = vpop.eup %3675  ;;  %v3037_v58 = vpack.c.bf16 %v3674_v55, %v3670_v53  ;;  %v1268_v59 = vpop.f32.mrb[40].mxu0 }
 0x14e   : > { %v1524_v60 = vpop.f32.mrb[40].mxu1  ;;  %v3197_v61 = vpack.c.bf16 %v3676_v57, %v3672_v54  ;;  %v1269_v62 = vadd.f32 %v4101_v56, %v1268_v59  ;;  %v1270_v0 = vpop.f32.mrb[41].mxu0 }
 0x14f   : > { %v1525_v63 = vadd.f32 %v4101_v56, %v1524_v60  ;;  %v1526_v1 = vpop.f32.mrb[41].mxu1  ;;  %3321 = vst [vmem:[%s4129_s17 + $0x40] sm:$0xff] %v3037_v58   ;;  %v1271_v2 = vpop.f32.mrb[42].mxu0 }
 0x150   : > { %v1527_v3 = vpop.f32.mrb[42].mxu1  ;;  %3353 = vst [vmem:[%s4129_s17 + $0x140] sm:$0xff] %v3197_v61   ;;  %3685 = vtanh.f32 %v1269_v62  ;;  %v1272_v4 = vadd.f32 %v4101_v56, %v1271_v2  ;;  %v1273_v6 = vpop.f32.mrb[43].mxu0 }
 0x151   : > { %v1528_v5 = vadd.f32 %v4101_v56, %v1527_v3  ;;  %v1529_v7 = vpop.f32.mrb[43].mxu1  ;;  %3687 = vtanh.f32 %v1525_v63 }
 0x152   : > { %v3678_v8 = vpop.eup %3677  ;;  %3689 = vtanh.f32 %v1272_v4 }
 0x153   : > { %v3680_v9 = vpop.eup %3679  ;;  %3691 = vtanh.f32 %v1528_v5 }
 0x154   : > { %v3682_v10 = vpop.eup %3681 }
 0x155   : > { %v3684_v11 = vpop.eup %3683  ;;  %v3042_v12 = vpack.c.bf16 %v3682_v10, %v3678_v8  ;;  %v1276_v13 = vpop.f32.mrb[44].mxu0 }
 0x156   : > { %v1532_v14 = vpop.f32.mrb[44].mxu1  ;;  %v3202_v15 = vpack.c.bf16 %v3684_v11, %v3680_v9  ;;  %v1277_v16 = vadd.f32 %v4101_v56, %v1276_v13  ;;  %v1278_v18 = vpop.f32.mrb[45].mxu0 }
 0x157   : > { %v1533_v17 = vadd.f32 %v4101_v56, %v1532_v14  ;;  %v1534_v19 = vpop.f32.mrb[45].mxu1  ;;  %3322 = vst [vmem:[%s4129_s17 + $0x48] sm:$0xff] %v3042_v12   ;;  %v1279_v20 = vpop.f32.mrb[46].mxu0 }
 0x158   : > { %v1535_v21 = vpop.f32.mrb[46].mxu1  ;;  %3354 = vst [vmem:[%s4129_s17 + $0x148] sm:$0xff] %v3202_v15   ;;  %3693 = vtanh.f32 %v1277_v16  ;;  %v1280_v22 = vadd.f32 %v4101_v56, %v1279_v20  ;;  %v1281_v24 = vpop.f32.mrb[47].mxu0 }
 0x159   : > { %v1536_v23 = vadd.f32 %v4101_v56, %v1535_v21  ;;  %v1537_v25 = vpop.f32.mrb[47].mxu1  ;;  %3695 = vtanh.f32 %v1533_v17 }
 0x15a   : > { %v3686_v26 = vpop.eup %3685  ;;  %3697 = vtanh.f32 %v1280_v22 }
 0x15b   : > { %v3688_v27 = vpop.eup %3687  ;;  %3699 = vtanh.f32 %v1536_v23 }
 0x15c   : > { %v3690_v28 = vpop.eup %3689 }
 0x15d   : > { %v3692_v29 = vpop.eup %3691  ;;  %v3047_v30 = vpack.c.bf16 %v3690_v28, %v3686_v26  ;;  %v1284_v31 = vpop.f32.mrb[48].mxu0 }
 0x15e   : > { %v1540_v32 = vpop.f32.mrb[48].mxu1  ;;  %v3207_v33 = vpack.c.bf16 %v3692_v29, %v3688_v27  ;;  %v1285_v34 = vadd.f32 %v4101_v56, %v1284_v31  ;;  %v1286_v36 = vpop.f32.mrb[49].mxu0 }
 0x15f   : > { %v1541_v35 = vadd.f32 %v4101_v56, %v1540_v32  ;;  %v1542_v37 = vpop.f32.mrb[49].mxu1  ;;  %3323 = vst [vmem:[%s4129_s17 + $0x50] sm:$0xff] %v3047_v30   ;;  %v1287_v38 = vpop.f32.mrb[50].mxu0 }
 0x160   : > { %v1543_v39 = vpop.f32.mrb[50].mxu1  ;;  %3355 = vst [vmem:[%s4129_s17 + $0x150] sm:$0xff] %v3207_v33   ;;  %3701 = vtanh.f32 %v1285_v34  ;;  %v1288_v40 = vadd.f32 %v4101_v56, %v1287_v38  ;;  %v1289_v42 = vpop.f32.mrb[51].mxu0 }
 0x161   : > { %v1544_v41 = vadd.f32 %v4101_v56, %v1543_v39  ;;  %v1545_v43 = vpop.f32.mrb[51].mxu1  ;;  %3703 = vtanh.f32 %v1541_v35 }
 0x162   : > { %v3694_v44 = vpop.eup %3693  ;;  %3705 = vtanh.f32 %v1288_v40 }
 0x163   : > { %v3696_v45 = vpop.eup %3695  ;;  %3707 = vtanh.f32 %v1544_v41 }
 0x164   : > { %v3698_v46 = vpop.eup %3697 }
 0x165   : > { %v3700_v47 = vpop.eup %3699  ;;  %v3052_v48 = vpack.c.bf16 %v3698_v46, %v3694_v44  ;;  %v1292_v49 = vpop.f32.mrb[52].mxu0 }
 0x166   : > { %v1548_v50 = vpop.f32.mrb[52].mxu1  ;;  %v3212_v51 = vpack.c.bf16 %v3700_v47, %v3696_v45  ;;  %v1293_v52 = vadd.f32 %v4101_v56, %v1292_v49  ;;  %v1294_v54 = vpop.f32.mrb[53].mxu0 }
 0x167   : > { %v1549_v53 = vadd.f32 %v4101_v56, %v1548_v50  ;;  %v1550_v55 = vpop.f32.mrb[53].mxu1  ;;  %3324 = vst [vmem:[%s4129_s17 + $0x58] sm:$0xff] %v3052_v48   ;;  %v1295_v57 = vpop.f32.mrb[54].mxu0 }
 0x168   : > { %v1551_v58 = vpop.f32.mrb[54].mxu1  ;;  %3356 = vst [vmem:[%s4129_s17 + $0x158] sm:$0xff] %v3212_v51   ;;  %3709 = vtanh.f32 %v1293_v52  ;;  %v1296_v59 = vadd.f32 %v4101_v56, %v1295_v57  ;;  %v1297_v61 = vpop.f32.mrb[55].mxu0 }
 0x169   : > { %v1552_v60 = vadd.f32 %v4101_v56, %v1551_v58  ;;  %v1553_v62 = vpop.f32.mrb[55].mxu1  ;;  %3711 = vtanh.f32 %v1549_v53 }
 0x16a   : > { %v3702_v63 = vpop.eup %3701  ;;  %3713 = vtanh.f32 %v1296_v59 }
 0x16b   : > { %v3704_v0 = vpop.eup %3703  ;;  %3715 = vtanh.f32 %v1552_v60 }
 0x16c   : > { %v3706_v1 = vpop.eup %3705 }
 0x16d   : > { %v3708_v2 = vpop.eup %3707  ;;  %v3057_v3 = vpack.c.bf16 %v3706_v1, %v3702_v63  ;;  %v1300_v4 = vpop.f32.mrb[56].mxu0 }
 0x16e   : > { %v1556_v5 = vpop.f32.mrb[56].mxu1  ;;  %v3217_v6 = vpack.c.bf16 %v3708_v2, %v3704_v0  ;;  %v1301_v7 = vadd.f32 %v4101_v56, %v1300_v4  ;;  %v1302_v9 = vpop.f32.mrb[57].mxu0 }
 0x16f   : > { %v1557_v8 = vadd.f32 %v4101_v56, %v1556_v5  ;;  %v1558_v10 = vpop.f32.mrb[57].mxu1  ;;  %3325 = vst [vmem:[%s4129_s17 + $0x60] sm:$0xff] %v3057_v3   ;;  %v1303_v11 = vpop.f32.mrb[58].mxu0 }
 0x170   : > { %v1559_v12 = vpop.f32.mrb[58].mxu1  ;;  %3357 = vst [vmem:[%s4129_s17 + $0x160] sm:$0xff] %v3217_v6   ;;  %3717 = vtanh.f32 %v1301_v7  ;;  %v1304_v13 = vadd.f32 %v4101_v56, %v1303_v11  ;;  %v1305_v15 = vpop.f32.mrb[59].mxu0 }
 0x171   : > { %v1560_v14 = vadd.f32 %v4101_v56, %v1559_v12  ;;  %v1561_v16 = vpop.f32.mrb[59].mxu1  ;;  %3719 = vtanh.f32 %v1557_v8 }
 0x172   : > { %v3710_v17 = vpop.eup %3709  ;;  %3721 = vtanh.f32 %v1304_v13 }
 0x173   : > { %v3712_v18 = vpop.eup %3711  ;;  %3723 = vtanh.f32 %v1560_v14 }
 0x174   : > { %v3714_v19 = vpop.eup %3713 }
 0x175   : > { %v3716_v20 = vpop.eup %3715  ;;  %v3062_v21 = vpack.c.bf16 %v3714_v19, %v3710_v17  ;;  %v1308_v22 = vpop.f32.mrb[60].mxu0 }
 0x176   : > { %v1564_v23 = vpop.f32.mrb[60].mxu1  ;;  %v3222_v24 = vpack.c.bf16 %v3716_v20, %v3712_v18  ;;  %v1309_v25 = vadd.f32 %v4101_v56, %v1308_v22  ;;  %v1310_v27 = vpop.f32.mrb[61].mxu0 }
 0x177   : > { %v1565_v26 = vadd.f32 %v4101_v56, %v1564_v23  ;;  %v1566_v28 = vpop.f32.mrb[61].mxu1  ;;  %3326 = vst [vmem:[%s4129_s17 + $0x68] sm:$0xff] %v3062_v21   ;;  %v1311_v29 = vpop.f32.mrb[62].mxu0 }
 0x178   : > { %v1567_v30 = vpop.f32.mrb[62].mxu1  ;;  %3358 = vst [vmem:[%s4129_s17 + $0x168] sm:$0xff] %v3222_v24   ;;  %3725 = vtanh.f32 %v1309_v25  ;;  %v1312_v31 = vadd.f32 %v4101_v56, %v1311_v29  ;;  %v1313_v33 = vpop.f32.mrb[63].mxu0 }
 0x179   : > { %v1568_v32 = vadd.f32 %v4101_v56, %v1567_v30  ;;  %v1569_v34 = vpop.f32.mrb[63].mxu1  ;;  %3727 = vtanh.f32 %v1565_v26 }
 0x17a   : > { %v3718_v35 = vpop.eup %3717  ;;  %3729 = vtanh.f32 %v1312_v31 }
 0x17b   : > { %v3720_v36 = vpop.eup %3719  ;;  %3731 = vtanh.f32 %v1568_v32 }
 0x17c   : > { %v3722_v37 = vpop.eup %3721 }
 0x17d   : > { %v3724_v38 = vpop.eup %3723  ;;  %v3067_v39 = vpack.c.bf16 %v3722_v37, %v3718_v35  ;;  %v1316_v40 = vpop.f32.mrb[64].mxu0 }
 0x17e   : > { %v1572_v41 = vpop.f32.mrb[64].mxu1  ;;  %v3227_v42 = vpack.c.bf16 %v3724_v38, %v3720_v36  ;;  %v1317_v43 = vadd.f32 %v4101_v56, %v1316_v40  ;;  %v1318_v45 = vpop.f32.mrb[65].mxu0 }
 0x17f   : > { %v1573_v44 = vadd.f32 %v4101_v56, %v1572_v41  ;;  %v1574_v46 = vpop.f32.mrb[65].mxu1  ;;  %3327 = vst [vmem:[%s4129_s17 + $0x70] sm:$0xff] %v3067_v39   ;;  %v1319_v47 = vpop.f32.mrb[66].mxu0 }
 0x180   : > { %v1575_v48 = vpop.f32.mrb[66].mxu1  ;;  %3359 = vst [vmem:[%s4129_s17 + $0x170] sm:$0xff] %v3227_v42   ;;  %3733 = vtanh.f32 %v1317_v43  ;;  %v1320_v49 = vadd.f32 %v4101_v56, %v1319_v47  ;;  %v1321_v51 = vpop.f32.mrb[67].mxu0 }
 0x181   : > { %v1576_v50 = vadd.f32 %v4101_v56, %v1575_v48  ;;  %v1577_v52 = vpop.f32.mrb[67].mxu1  ;;  %3735 = vtanh.f32 %v1573_v44 }
 0x182   : > { %v3726_v53 = vpop.eup %3725  ;;  %3737 = vtanh.f32 %v1320_v49  ;;  %v4256_v52 = vld [vmem:[%s4339_s2] ss:$0 sm:$0xff] }
 0x183   : > { %v3728_v54 = vpop.eup %3727  ;;  %3739 = vtanh.f32 %v1576_v50 }
 0x184   : > { %v3730_v55 = vpop.eup %3729 }
 0x185   : > { %v3732_v57 = vpop.eup %3731  ;;  %v3072_v58 = vpack.c.bf16 %v3730_v55, %v3726_v53  ;;  %v1324_v59 = vpop.f32.mrb[68].mxu0 }
 0x186   : > { %v1580_v60 = vpop.f32.mrb[68].mxu1  ;;  %v3232_v61 = vpack.c.bf16 %v3732_v57, %v3728_v54  ;;  %v1325_v62 = vadd.f32 %v4101_v56, %v1324_v59  ;;  %v1326_v0 = vpop.f32.mrb[69].mxu0 }
 0x187   : > { %v1581_v63 = vadd.f32 %v4101_v56, %v1580_v60  ;;  %v1582_v1 = vpop.f32.mrb[69].mxu1  ;;  %3328 = vst [vmem:[%s4129_s17 + $0x78] sm:$0xff] %v3072_v58   ;;  %v1327_v2 = vpop.f32.mrb[70].mxu0 }
 0x188   : > { %v1583_v3 = vpop.f32.mrb[70].mxu1  ;;  %3360 = vst [vmem:[%s4129_s17 + $0x178] sm:$0xff] %v3232_v61   ;;  %3741 = vtanh.f32 %v1325_v62  ;;  %v1328_v4 = vadd.f32 %v4101_v56, %v1327_v2  ;;  %v1329_v6 = vpop.f32.mrb[71].mxu0 }
 0x189   : > { %v1584_v5 = vadd.f32 %v4101_v56, %v1583_v3  ;;  %v1585_v7 = vpop.f32.mrb[71].mxu1  ;;  %3743 = vtanh.f32 %v1581_v63 }
 0x18a   : > { %v3734_v8 = vpop.eup %3733  ;;  %3745 = vtanh.f32 %v1328_v4 }
 0x18b   : > { %v3736_v9 = vpop.eup %3735  ;;  %3747 = vtanh.f32 %v1584_v5 }
 0x18c   : > { %v3738_v10 = vpop.eup %3737 }
 0x18d   : > { %v3740_v11 = vpop.eup %3739  ;;  %v3077_v12 = vpack.c.bf16 %v3738_v10, %v3734_v8  ;;  %v1332_v13 = vpop.f32.mrb[72].mxu0 }
 0x18e   : > { %v1588_v14 = vpop.f32.mrb[72].mxu1  ;;  %v3237_v15 = vpack.c.bf16 %v3740_v11, %v3736_v9  ;;  %v1333_v16 = vadd.f32 %v4101_v56, %v1332_v13  ;;  %v1334_v18 = vpop.f32.mrb[73].mxu0 }
 0x18f   : > { %v1589_v17 = vadd.f32 %v4101_v56, %v1588_v14  ;;  %v1590_v19 = vpop.f32.mrb[73].mxu1  ;;  %3329 = vst [vmem:[%s4129_s17 + $0x80] sm:$0xff] %v3077_v12   ;;  %v1335_v20 = vpop.f32.mrb[74].mxu0 }
 0x190   : > { %v1591_v21 = vpop.f32.mrb[74].mxu1  ;;  %3361 = vst [vmem:[%s4129_s17 + $0x180] sm:$0xff] %v3237_v15   ;;  %3749 = vtanh.f32 %v1333_v16  ;;  %v1336_v22 = vadd.f32 %v4101_v56, %v1335_v20  ;;  %v1337_v24 = vpop.f32.mrb[75].mxu0 }
 0x191   : > { %v1592_v23 = vadd.f32 %v4101_v56, %v1591_v21  ;;  %v1593_v25 = vpop.f32.mrb[75].mxu1  ;;  %3751 = vtanh.f32 %v1589_v17 }
 0x192   : > { %v3742_v26 = vpop.eup %3741  ;;  %3753 = vtanh.f32 %v1336_v22 }
 0x193   : > { %v3744_v27 = vpop.eup %3743  ;;  %3755 = vtanh.f32 %v1592_v23 }
 0x194   : > { %v3746_v28 = vpop.eup %3745 }
 0x195   : > { %v3748_v29 = vpop.eup %3747  ;;  %v3082_v30 = vpack.c.bf16 %v3746_v28, %v3742_v26  ;;  %v1340_v31 = vpop.f32.mrb[76].mxu0 }
 0x196   : > { %v1596_v32 = vpop.f32.mrb[76].mxu1  ;;  %v3242_v33 = vpack.c.bf16 %v3748_v29, %v3744_v27  ;;  %v1341_v34 = vadd.f32 %v4101_v56, %v1340_v31  ;;  %v1342_v36 = vpop.f32.mrb[77].mxu0 }
 0x197   : > { %v1597_v35 = vadd.f32 %v4101_v56, %v1596_v32  ;;  %v1598_v37 = vpop.f32.mrb[77].mxu1  ;;  %3330 = vst [vmem:[%s4129_s17 + $0x88] sm:$0xff] %v3082_v30   ;;  %v1343_v38 = vpop.f32.mrb[78].mxu0 }
 0x198   : > { %v1599_v39 = vpop.f32.mrb[78].mxu1  ;;  %3362 = vst [vmem:[%s4129_s17 + $0x188] sm:$0xff] %v3242_v33   ;;  %3757 = vtanh.f32 %v1341_v34  ;;  %v1344_v40 = vadd.f32 %v4101_v56, %v1343_v38  ;;  %v1345_v42 = vpop.f32.mrb[79].mxu0 }
 0x199   : > { %v1600_v41 = vadd.f32 %v4101_v56, %v1599_v39  ;;  %v1601_v43 = vpop.f32.mrb[79].mxu1  ;;  %3759 = vtanh.f32 %v1597_v35 }
 0x19a   : > { %v3750_v44 = vpop.eup %3749  ;;  %3761 = vtanh.f32 %v1344_v40 }
 0x19b   : > { %v3752_v45 = vpop.eup %3751  ;;  %3763 = vtanh.f32 %v1600_v41 }
 0x19c   : > { %v3754_v46 = vpop.eup %3753 }
 0x19d   : > { %v3756_v47 = vpop.eup %3755  ;;  %v3087_v48 = vpack.c.bf16 %v3754_v46, %v3750_v44  ;;  %v1348_v49 = vpop.f32.mrb[80].mxu0 }
 0x19e   : > { %v1604_v50 = vpop.f32.mrb[80].mxu1  ;;  %v3247_v51 = vpack.c.bf16 %v3756_v47, %v3752_v45  ;;  %v1349_v56 = vadd.f32 %v4256_v52, %v1348_v49  ;;  %v1350_v54 = vpop.f32.mrb[81].mxu0 }
 0x19f   : > { %v1605_v53 = vadd.f32 %v4256_v52, %v1604_v50  ;;  %v1606_v55 = vpop.f32.mrb[81].mxu1  ;;  %3331 = vst [vmem:[%s4129_s17 + $0x90] sm:$0xff] %v3087_v48   ;;  %v1351_v57 = vpop.f32.mrb[82].mxu0 }
 0x1a0   : > { %v1607_v58 = vpop.f32.mrb[82].mxu1  ;;  %3363 = vst [vmem:[%s4129_s17 + $0x190] sm:$0xff] %v3247_v51   ;;  %3765 = vtanh.f32 %v1349_v56  ;;  %v1352_v59 = vadd.f32 %v4256_v52, %v1351_v57  ;;  %v1353_v61 = vpop.f32.mrb[83].mxu0 }
 0x1a1   : > { %v1608_v60 = vadd.f32 %v4256_v52, %v1607_v58  ;;  %v1609_v62 = vpop.f32.mrb[83].mxu1  ;;  %3767 = vtanh.f32 %v1605_v53 }
 0x1a2   : > { %v3758_v63 = vpop.eup %3757  ;;  %3769 = vtanh.f32 %v1352_v59 }
 0x1a3   : > { %v3760_v0 = vpop.eup %3759  ;;  %3771 = vtanh.f32 %v1608_v60 }
 0x1a4   : > { %v3762_v1 = vpop.eup %3761 }
 0x1a5   : > { %v3764_v2 = vpop.eup %3763  ;;  %v3092_v3 = vpack.c.bf16 %v3762_v1, %v3758_v63  ;;  %v1356_v4 = vpop.f32.mrb[84].mxu0 }
 0x1a6   : > { %v1612_v5 = vpop.f32.mrb[84].mxu1  ;;  %v3252_v6 = vpack.c.bf16 %v3764_v2, %v3760_v0  ;;  %v1357_v7 = vadd.f32 %v4256_v52, %v1356_v4  ;;  %v1358_v9 = vpop.f32.mrb[85].mxu0 }
 0x1a7   : > { %v1613_v8 = vadd.f32 %v4256_v52, %v1612_v5  ;;  %v1614_v10 = vpop.f32.mrb[85].mxu1  ;;  %3332 = vst [vmem:[%s4129_s17 + $0x98] sm:$0xff] %v3092_v3   ;;  %v1359_v11 = vpop.f32.mrb[86].mxu0 }
 0x1a8   : > { %v1615_v12 = vpop.f32.mrb[86].mxu1  ;;  %3364 = vst [vmem:[%s4129_s17 + $0x198] sm:$0xff] %v3252_v6   ;;  %3773 = vtanh.f32 %v1357_v7  ;;  %v1360_v13 = vadd.f32 %v4256_v52, %v1359_v11  ;;  %v1361_v15 = vpop.f32.mrb[87].mxu0 }
 0x1a9   : > { %v1616_v14 = vadd.f32 %v4256_v52, %v1615_v12  ;;  %v1617_v16 = vpop.f32.mrb[87].mxu1  ;;  %3775 = vtanh.f32 %v1613_v8 }
 0x1aa   : > { %v3766_v17 = vpop.eup %3765  ;;  %3777 = vtanh.f32 %v1360_v13 }
 0x1ab   : > { %v3768_v18 = vpop.eup %3767  ;;  %3779 = vtanh.f32 %v1616_v14 }
 0x1ac   : > { %v3770_v19 = vpop.eup %3769 }
 0x1ad   : > { %v3772_v20 = vpop.eup %3771  ;;  %v3097_v21 = vpack.c.bf16 %v3770_v19, %v3766_v17  ;;  %v1364_v22 = vpop.f32.mrb[88].mxu0 }
 0x1ae   : > { %v1620_v23 = vpop.f32.mrb[88].mxu1  ;;  %v3257_v24 = vpack.c.bf16 %v3772_v20, %v3768_v18  ;;  %v1365_v25 = vadd.f32 %v4256_v52, %v1364_v22  ;;  %v1366_v27 = vpop.f32.mrb[89].mxu0 }
 0x1af   : > { %v1621_v26 = vadd.f32 %v4256_v52, %v1620_v23  ;;  %v1622_v28 = vpop.f32.mrb[89].mxu1  ;;  %3333 = vst [vmem:[%s4129_s17 + $0xa0] sm:$0xff] %v3097_v21   ;;  %v1367_v29 = vpop.f32.mrb[90].mxu0 }
 0x1b0   : > { %v1623_v30 = vpop.f32.mrb[90].mxu1  ;;  %3365 = vst [vmem:[%s4129_s17 + $0x1a0] sm:$0xff] %v3257_v24   ;;  %3781 = vtanh.f32 %v1365_v25  ;;  %v1368_v31 = vadd.f32 %v4256_v52, %v1367_v29  ;;  %v1369_v33 = vpop.f32.mrb[91].mxu0 }
 0x1b1   : > { %v1624_v32 = vadd.f32 %v4256_v52, %v1623_v30  ;;  %v1625_v34 = vpop.f32.mrb[91].mxu1  ;;  %3783 = vtanh.f32 %v1621_v26 }
 0x1b2   : > { %v3774_v35 = vpop.eup %3773  ;;  %3785 = vtanh.f32 %v1368_v31 }
 0x1b3   : > { %v3776_v36 = vpop.eup %3775  ;;  %3787 = vtanh.f32 %v1624_v32 }
 0x1b4   : > { %v3778_v37 = vpop.eup %3777 }
 0x1b5   : > { %v3780_v38 = vpop.eup %3779  ;;  %v3102_v39 = vpack.c.bf16 %v3778_v37, %v3774_v35  ;;  %v1372_v40 = vpop.f32.mrb[92].mxu0 }
 0x1b6   : > { %v1628_v41 = vpop.f32.mrb[92].mxu1  ;;  %v3262_v42 = vpack.c.bf16 %v3780_v38, %v3776_v36  ;;  %v1373_v43 = vadd.f32 %v4256_v52, %v1372_v40  ;;  %v1374_v45 = vpop.f32.mrb[93].mxu0 }
 0x1b7   : > { %v1629_v44 = vadd.f32 %v4256_v52, %v1628_v41  ;;  %v1630_v46 = vpop.f32.mrb[93].mxu1  ;;  %3334 = vst [vmem:[%s4129_s17 + $0xa8] sm:$0xff] %v3102_v39   ;;  %v1375_v47 = vpop.f32.mrb[94].mxu0 }
 0x1b8   : > { %v1631_v48 = vpop.f32.mrb[94].mxu1  ;;  %3366 = vst [vmem:[%s4129_s17 + $0x1a8] sm:$0xff] %v3262_v42   ;;  %3789 = vtanh.f32 %v1373_v43  ;;  %v1376_v49 = vadd.f32 %v4256_v52, %v1375_v47  ;;  %v1377_v51 = vpop.f32.mrb[95].mxu0 }
 0x1b9   : > { %v1632_v50 = vadd.f32 %v4256_v52, %v1631_v48  ;;  %v1633_v56 = vpop.f32.mrb[95].mxu1  ;;  %3791 = vtanh.f32 %v1629_v44 }
 0x1ba   : > { %v3782_v53 = vpop.eup %3781  ;;  %3793 = vtanh.f32 %v1376_v49 }
 0x1bb   : > { %v3784_v54 = vpop.eup %3783  ;;  %3795 = vtanh.f32 %v1632_v50 }
 0x1bc   : > { %v3786_v55 = vpop.eup %3785 }
 0x1bd   : > { %v3788_v57 = vpop.eup %3787  ;;  %v3107_v58 = vpack.c.bf16 %v3786_v55, %v3782_v53  ;;  %v1380_v59 = vpop.f32.mrb[96].mxu0 }
 0x1be   : > { %v1636_v60 = vpop.f32.mrb[96].mxu1  ;;  %v3267_v61 = vpack.c.bf16 %v3788_v57, %v3784_v54  ;;  %v1381_v62 = vadd.f32 %v4256_v52, %v1380_v59  ;;  %v1382_v0 = vpop.f32.mrb[97].mxu0 }
 0x1bf   : > { %v1637_v63 = vadd.f32 %v4256_v52, %v1636_v60  ;;  %v1638_v1 = vpop.f32.mrb[97].mxu1  ;;  %3335 = vst [vmem:[%s4129_s17 + $0xb0] sm:$0xff] %v3107_v58   ;;  %v1383_v2 = vpop.f32.mrb[98].mxu0 }
 0x1c0   : > { %v1639_v3 = vpop.f32.mrb[98].mxu1  ;;  %3367 = vst [vmem:[%s4129_s17 + $0x1b0] sm:$0xff] %v3267_v61   ;;  %3797 = vtanh.f32 %v1381_v62  ;;  %v1384_v4 = vadd.f32 %v4256_v52, %v1383_v2  ;;  %v1385_v6 = vpop.f32.mrb[99].mxu0 }
 0x1c1   : > { %v1640_v5 = vadd.f32 %v4256_v52, %v1639_v3  ;;  %v1641_v7 = vpop.f32.mrb[99].mxu1  ;;  %3799 = vtanh.f32 %v1637_v63 }
 0x1c2   : > { %v3790_v8 = vpop.eup %3789  ;;  %3801 = vtanh.f32 %v1384_v4 }
 0x1c3   : > { %v3792_v9 = vpop.eup %3791  ;;  %3803 = vtanh.f32 %v1640_v5 }
 0x1c4   : > { %v3794_v10 = vpop.eup %3793 }
 0x1c5   : > { %v3796_v11 = vpop.eup %3795  ;;  %v3112_v12 = vpack.c.bf16 %v3794_v10, %v3790_v8  ;;  %v1388_v13 = vpop.f32.mrb[100].mxu0 }
 0x1c6   : > { %v1644_v14 = vpop.f32.mrb[100].mxu1  ;;  %v3272_v15 = vpack.c.bf16 %v3796_v11, %v3792_v9  ;;  %v1389_v16 = vadd.f32 %v4256_v52, %v1388_v13  ;;  %v1390_v18 = vpop.f32.mrb[101].mxu0 }
 0x1c7   : > { %v1645_v17 = vadd.f32 %v4256_v52, %v1644_v14  ;;  %v1646_v19 = vpop.f32.mrb[101].mxu1  ;;  %3336 = vst [vmem:[%s4129_s17 + $0xb8] sm:$0xff] %v3112_v12   ;;  %v1391_v20 = vpop.f32.mrb[102].mxu0 }
 0x1c8   : > { %v1647_v21 = vpop.f32.mrb[102].mxu1  ;;  %3368 = vst [vmem:[%s4129_s17 + $0x1b8] sm:$0xff] %v3272_v15   ;;  %3805 = vtanh.f32 %v1389_v16  ;;  %v1392_v22 = vadd.f32 %v4256_v52, %v1391_v20  ;;  %v1393_v24 = vpop.f32.mrb[103].mxu0 }
 0x1c9   : > { %v1648_v23 = vadd.f32 %v4256_v52, %v1647_v21  ;;  %v1649_v25 = vpop.f32.mrb[103].mxu1  ;;  %3807 = vtanh.f32 %v1645_v17 }
 0x1ca   : > { %v3798_v26 = vpop.eup %3797  ;;  %3809 = vtanh.f32 %v1392_v22 }
 0x1cb   : > { %v3800_v27 = vpop.eup %3799  ;;  %3811 = vtanh.f32 %v1648_v23 }
 0x1cc   : > { %v3802_v28 = vpop.eup %3801 }
 0x1cd   : > { %v3804_v29 = vpop.eup %3803  ;;  %v3117_v30 = vpack.c.bf16 %v3802_v28, %v3798_v26  ;;  %v1396_v31 = vpop.f32.mrb[104].mxu0 }
 0x1ce   : > { %v1652_v32 = vpop.f32.mrb[104].mxu1  ;;  %v3277_v33 = vpack.c.bf16 %v3804_v29, %v3800_v27  ;;  %v1397_v34 = vadd.f32 %v4256_v52, %v1396_v31  ;;  %v1398_v36 = vpop.f32.mrb[105].mxu0 }
 0x1cf   : > { %v1653_v35 = vadd.f32 %v4256_v52, %v1652_v32  ;;  %v1654_v37 = vpop.f32.mrb[105].mxu1  ;;  %3337 = vst [vmem:[%s4129_s17 + $0xc0] sm:$0xff] %v3117_v30   ;;  %v1399_v38 = vpop.f32.mrb[106].mxu0 }
 0x1d0   : > { %v1655_v39 = vpop.f32.mrb[106].mxu1  ;;  %3369 = vst [vmem:[%s4129_s17 + $0x1c0] sm:$0xff] %v3277_v33   ;;  %3813 = vtanh.f32 %v1397_v34  ;;  %v1400_v40 = vadd.f32 %v4256_v52, %v1399_v38  ;;  %v1401_v42 = vpop.f32.mrb[107].mxu0 }
 0x1d1   : > { %v1656_v41 = vadd.f32 %v4256_v52, %v1655_v39  ;;  %v1657_v43 = vpop.f32.mrb[107].mxu1  ;;  %3815 = vtanh.f32 %v1653_v35 }
 0x1d2   : > { %v3806_v44 = vpop.eup %3805  ;;  %3817 = vtanh.f32 %v1400_v40 }
 0x1d3   : > { %v3808_v45 = vpop.eup %3807  ;;  %3819 = vtanh.f32 %v1656_v41 }
 0x1d4   : > { %v3810_v46 = vpop.eup %3809 }
 0x1d5   : > { %v3812_v47 = vpop.eup %3811  ;;  %v3122_v48 = vpack.c.bf16 %v3810_v46, %v3806_v44  ;;  %v1404_v49 = vpop.f32.mrb[108].mxu0 }
 0x1d6   : > { %v1660_v50 = vpop.f32.mrb[108].mxu1  ;;  %v3282_v51 = vpack.c.bf16 %v3812_v47, %v3808_v45  ;;  %v1405_v56 = vadd.f32 %v4256_v52, %v1404_v49  ;;  %v1406_v54 = vpop.f32.mrb[109].mxu0 }
 0x1d7   : > { %v1661_v53 = vadd.f32 %v4256_v52, %v1660_v50  ;;  %v1662_v55 = vpop.f32.mrb[109].mxu1  ;;  %3338 = vst [vmem:[%s4129_s17 + $0xc8] sm:$0xff] %v3122_v48   ;;  %v1407_v57 = vpop.f32.mrb[110].mxu0 }
 0x1d8   : > { %v1663_v58 = vpop.f32.mrb[110].mxu1  ;;  %3370 = vst [vmem:[%s4129_s17 + $0x1c8] sm:$0xff] %v3282_v51   ;;  %3821 = vtanh.f32 %v1405_v56  ;;  %v1408_v59 = vadd.f32 %v4256_v52, %v1407_v57  ;;  %v1409_v61 = vpop.f32.mrb[111].mxu0 }
 0x1d9   : > { %v1664_v60 = vadd.f32 %v4256_v52, %v1663_v58  ;;  %v1665_v62 = vpop.f32.mrb[111].mxu1  ;;  %3823 = vtanh.f32 %v1661_v53 }
 0x1da   : > { %v3814_v63 = vpop.eup %3813  ;;  %3825 = vtanh.f32 %v1408_v59 }
 0x1db   : > { %v3816_v0 = vpop.eup %3815  ;;  %3827 = vtanh.f32 %v1664_v60 }
 0x1dc   : > { %v3818_v1 = vpop.eup %3817 }
 0x1dd   : > { %v3820_v2 = vpop.eup %3819  ;;  %v3127_v3 = vpack.c.bf16 %v3818_v1, %v3814_v63  ;;  %v1412_v4 = vpop.f32.mrb[112].mxu0 }
 0x1de   : > { %v1668_v5 = vpop.f32.mrb[112].mxu1  ;;  %v3287_v6 = vpack.c.bf16 %v3820_v2, %v3816_v0  ;;  %v1413_v7 = vadd.f32 %v4256_v52, %v1412_v4  ;;  %v1414_v9 = vpop.f32.mrb[113].mxu0 }
 0x1df   : > { %v1669_v8 = vadd.f32 %v4256_v52, %v1668_v5  ;;  %v1670_v10 = vpop.f32.mrb[113].mxu1  ;;  %3339 = vst [vmem:[%s4129_s17 + $0xd0] sm:$0xff] %v3127_v3   ;;  %v1415_v11 = vpop.f32.mrb[114].mxu0 }
 0x1e0   : > { %v1671_v12 = vpop.f32.mrb[114].mxu1  ;;  %3371 = vst [vmem:[%s4129_s17 + $0x1d0] sm:$0xff] %v3287_v6   ;;  %3829 = vtanh.f32 %v1413_v7  ;;  %v1416_v13 = vadd.f32 %v4256_v52, %v1415_v11  ;;  %v1417_v15 = vpop.f32.mrb[115].mxu0 }
 0x1e1   : > { %v1672_v14 = vadd.f32 %v4256_v52, %v1671_v12  ;;  %v1673_v16 = vpop.f32.mrb[115].mxu1  ;;  %3831 = vtanh.f32 %v1669_v8 }
 0x1e2   : > { %v3822_v17 = vpop.eup %3821  ;;  %3833 = vtanh.f32 %v1416_v13 }
 0x1e3   : > { %v3824_v18 = vpop.eup %3823  ;;  %3835 = vtanh.f32 %v1672_v14 }
 0x1e4   : > { %v3826_v19 = vpop.eup %3825 }
 0x1e5   : > { %v3828_v20 = vpop.eup %3827  ;;  %v3132_v21 = vpack.c.bf16 %v3826_v19, %v3822_v17  ;;  %v1420_v22 = vpop.f32.mrb[116].mxu0 }
 0x1e6   : > { %v1676_v23 = vpop.f32.mrb[116].mxu1  ;;  %v3292_v24 = vpack.c.bf16 %v3828_v20, %v3824_v18  ;;  %v1421_v25 = vadd.f32 %v4256_v52, %v1420_v22  ;;  %v1422_v27 = vpop.f32.mrb[117].mxu0 }
 0x1e7   : > { %v1677_v26 = vadd.f32 %v4256_v52, %v1676_v23  ;;  %v1678_v28 = vpop.f32.mrb[117].mxu1  ;;  %3340 = vst [vmem:[%s4129_s17 + $0xd8] sm:$0xff] %v3132_v21   ;;  %v1423_v29 = vpop.f32.mrb[118].mxu0 }
 0x1e8   : > { %v1679_v30 = vpop.f32.mrb[118].mxu1  ;;  %3372 = vst [vmem:[%s4129_s17 + $0x1d8] sm:$0xff] %v3292_v24   ;;  %3837 = vtanh.f32 %v1421_v25  ;;  %v1424_v31 = vadd.f32 %v4256_v52, %v1423_v29  ;;  %v1425_v33 = vpop.f32.mrb[119].mxu0 }
 0x1e9   : > { %v1680_v32 = vadd.f32 %v4256_v52, %v1679_v30  ;;  %v1681_v34 = vpop.f32.mrb[119].mxu1  ;;  %3839 = vtanh.f32 %v1677_v26 }
 0x1ea   : > { %v3830_v35 = vpop.eup %3829  ;;  %3841 = vtanh.f32 %v1424_v31 }
 0x1eb   : > { %v3832_v36 = vpop.eup %3831  ;;  %3843 = vtanh.f32 %v1680_v32 }
 0x1ec   : > { %v3834_v37 = vpop.eup %3833 }
 0x1ed   : > { %v3836_v38 = vpop.eup %3835  ;;  %v3137_v39 = vpack.c.bf16 %v3834_v37, %v3830_v35  ;;  %v1428_v40 = vpop.f32.mrb[120].mxu0 }
 0x1ee   : > { %v1684_v41 = vpop.f32.mrb[120].mxu1  ;;  %v3297_v42 = vpack.c.bf16 %v3836_v38, %v3832_v36  ;;  %v1429_v43 = vadd.f32 %v4256_v52, %v1428_v40  ;;  %v1430_v45 = vpop.f32.mrb[121].mxu0 }
 0x1ef   : > { %v1685_v44 = vadd.f32 %v4256_v52, %v1684_v41  ;;  %v1686_v46 = vpop.f32.mrb[121].mxu1  ;;  %3341 = vst [vmem:[%s4129_s17 + $0xe0] sm:$0xff] %v3137_v39   ;;  %v1431_v47 = vpop.f32.mrb[122].mxu0 }
 0x1f0   : > { %v1687_v48 = vpop.f32.mrb[122].mxu1  ;;  %3373 = vst [vmem:[%s4129_s17 + $0x1e0] sm:$0xff] %v3297_v42   ;;  %3845 = vtanh.f32 %v1429_v43  ;;  %v1432_v49 = vadd.f32 %v4256_v52, %v1431_v47  ;;  %v1433_v51 = vpop.f32.mrb[123].mxu0 }
 0x1f1   : > { %v1688_v50 = vadd.f32 %v4256_v52, %v1687_v48  ;;  %v1689_v56 = vpop.f32.mrb[123].mxu1  ;;  %3847 = vtanh.f32 %v1685_v44 }
 0x1f2   : > { %v3838_v53 = vpop.eup %3837  ;;  %3849 = vtanh.f32 %v1432_v49 }
 0x1f3   : > { %v3840_v54 = vpop.eup %3839  ;;  %3851 = vtanh.f32 %v1688_v50 }
 0x1f4   : > { %v3842_v55 = vpop.eup %3841 }
 0x1f5   : > { %v3844_v57 = vpop.eup %3843  ;;  %v3142_v58 = vpack.c.bf16 %v3842_v55, %v3838_v53  ;;  %v1436_v59 = vpop.f32.mrb[124].mxu0 }
 0x1f6   : > { %v1692_v60 = vpop.f32.mrb[124].mxu1  ;;  %v3302_v61 = vpack.c.bf16 %v3844_v57, %v3840_v54  ;;  %v1437_v62 = vadd.f32 %v4256_v52, %v1436_v59  ;;  %v1438_v0 = vpop.f32.mrb[125].mxu0 }
 0x1f7   : > { %v1693_v63 = vadd.f32 %v4256_v52, %v1692_v60  ;;  %v1694_v1 = vpop.f32.mrb[125].mxu1  ;;  %3342 = vst [vmem:[%s4129_s17 + $0xe8] sm:$0xff] %v3142_v58   ;;  %v1439_v2 = vpop.f32.mrb[126].mxu0 }
 0x1f8   : > { %v1695_v3 = vpop.f32.mrb[126].mxu1  ;;  %3374 = vst [vmem:[%s4129_s17 + $0x1e8] sm:$0xff] %v3302_v61   ;;  %3853 = vtanh.f32 %v1437_v62  ;;  %v1440_v4 = vadd.f32 %v4256_v52, %v1439_v2  ;;  %v1441_v6 = vpop.f32.mrb[127].mxu0 }
 0x1f9   : > { %v1696_v5 = vadd.f32 %v4256_v52, %v1695_v3  ;;  %v1697_v7 = vpop.f32.mrb[127].mxu1  ;;  %3855 = vtanh.f32 %v1693_v63 }
 0x1fa   : > { %v3846_v8 = vpop.eup %3845  ;;  %3857 = vtanh.f32 %v1440_v4 }
 0x1fb   : > { %v3848_v9 = vpop.eup %3847  ;;  %3859 = vtanh.f32 %v1696_v5 }
 0x1fc   : > { %v3850_v10 = vpop.eup %3849 }
 0x1fd   : > { %v3852_v11 = vpop.eup %3851  ;;  %v3147_v12 = vpack.c.bf16 %v3850_v10, %v3846_v8 }
 0x1fe   : > { %v3307_v13 = vpack.c.bf16 %v3852_v11, %v3848_v9 }
 0x1ff   : > { %3343 = vst [vmem:[%s4129_s17 + $0xf0] sm:$0xff] %v3147_v12  }
 0x200   : > { %3375 = vst [vmem:[%s4129_s17 + $0x1f0] sm:$0xff] %v3307_v13  }
 0x202   : > { %v3854_v14 = vpop.eup %3853 }
 0x203   : > { %v3856_v15 = vpop.eup %3855 }
 0x204   : > { %v3858_v16 = vpop.eup %3857 }
 0x205   : > { %v3860_v17 = vpop.eup %3859  ;;  %v3152_v52 = vpack.c.bf16 %v3858_v16, %v3854_v14 }
 0x206   : > { %v3312_v18 = vpack.c.bf16 %v3860_v17, %v3856_v15 }
 0x207   : > { %3344 = vst [vmem:[%s4129_s17 + $0xf8] sm:$0xff] %v3152_v52  }
 0x208   : > { %3376 = vst [vmem:[%s4129_s17 + $0x1f8] sm:$0xff] %v3312_v18  }
 0x209 PF: > { %s13_s12 = sadd.s32 1, %s3868_s12  }
 0x20a   : > { %p10_p4 = scmp.ge.s32.totalorder %s13_s12, 4  }
 0x20c   :  { %12 = sbr.rel (!%p10_p4) target bundleno = 1 (0x1), region = 62 }

</bundles_post_ra>
